<compile_context>
chip_gen: v5e
topology: v5e:2x2
jax: 0.10.0
libtpu: 0.0.40
codegen_flags: <defaults>
</compile_context>

<pallas_src>
import jax
import jax.numpy as jnp
import numpy as np
from jax import lax
from jax.experimental import pallas as pl
from jax.experimental.pallas import tpu as pltpu

KH = 5  # conv kernel height / width


def _round_up(a, m):
    return (a + m - 1) // m * m


# ------------------------- Fused, batch-tiled forward kernel -------------------------

def _net_kernel(x_ref, w1_ref, b1_ref, w2_ref, b2_ref,
                f1_ref, fb1_ref, f2_ref, fb2_ref, f3_ref, fb3_ref,
                o_ref, p1_buf, z_buf):
    f32 = jnp.float32
    cdt = w1_ref.dtype                       # MXU operand dtype (bf16)
    bt = x_ref.shape[1]                      # images per grid step (B_TILE)

    # conv1 bias broadcast hoisted (JAX does not CSE broadcast_in_dim).
    b1b = jnp.broadcast_to(b1_ref[...], (bt, b1_ref.shape[1]))   # [bt, 72]
    b2 = b2_ref[...]                                             # [1, 260]

    # ---- conv1 (+bias+ReLU) with the 2x2 max-pool fused, batched over images.
    # x_ref[r] is the dense [bt, 48] slab of input row r for all images in the
    # tile, so every Toeplitz matmul has M = bt.  Pooled row hp consumes conv1
    # output rows 2*hp (even) and 2*hp+1 (odd).
    for hp in range(6):
        acc_e = jnp.dot(x_ref[2 * hp], w1_ref[0], preferred_element_type=f32)
        acc_o = jnp.dot(x_ref[2 * hp + 1], w1_ref[0], preferred_element_type=f32)
        for kh in range(1, KH):
            acc_e = acc_e + jnp.dot(x_ref[2 * hp + kh], w1_ref[kh],
                                    preferred_element_type=f32)
            acc_o = acc_o + jnp.dot(x_ref[2 * hp + 1 + kh], w1_ref[kh],
                                    preferred_element_type=f32)
        # H-pool: max of the two ReLU'd row parities.
        yh = jnp.maximum(jnp.maximum(acc_e + b1b, 0.0),
                         jnp.maximum(acc_o + b1b, 0.0))          # [bt, 72]
        # W-pool: max of neighbouring w column groups; the even-w groups hold
        # the fully pooled values (conv2's Toeplitz weights only read those).
        p1_buf[hp] = jnp.maximum(yh[:, :66], yh[:, 6:]).astype(cdt)   # [bt, 66]

    # ---- conv2 (+bias+ReLU), batched: output row ho = sum_kh p1[ho+kh] @ W2[kh].
    for ho in range(2):
        acc2 = jnp.dot(p1_buf[ho], w2_ref[0], preferred_element_type=f32)
        for kh in range(1, KH):
            acc2 = acc2 + jnp.dot(p1_buf[ho + kh], w2_ref[kh],
                                  preferred_element_type=f32)
        z_buf[ho] = jnp.maximum(acc2 + b2, 0.0).astype(cdt)      # [bt, 260]

    # ---- flatten (torch NCHW order folded into f1) + fc1/fc2/fc3, M = bt.
    z = (jnp.dot(z_buf[0], f1_ref[0], preferred_element_type=f32)
         + jnp.dot(z_buf[1], f1_ref[1], preferred_element_type=f32)
         + fb1_ref[...])
    z = jnp.maximum(z, 0.0)                                      # [bt, 120]
    z = jnp.maximum(jnp.dot(z.astype(cdt), f2_ref[...],
                            preferred_element_type=f32) + fb2_ref[...], 0.0)
    z = jnp.dot(z.astype(cdt), f3_ref[...],
                preferred_element_type=f32) + fb3_ref[...]       # [bt, 10]
    o_ref[...] = z.astype(o_ref.dtype)


# ------------------------- One-time weight preprocessing -------------------------

def prepare_params(params, compute_dtype=jnp.bfloat16):
    """Repack PyTorch-layout weights (once, host-side) into the matmul-friendly
    layouts the fused kernel consumes: conv Toeplitz slabs (bf16 MXU operands),
    pooled-column-aware conv2 weights, flatten-order-folded fc1, pre-transposed
    fc2/fc3, and f32 biases tiled to the kernel's column layouts."""
    w1 = np.asarray(params['w1'], np.float32)        # [6, 3, 5, 5]   (O, C, KH, KW)
    b1 = np.asarray(params['b1'], np.float32)
    w2 = np.asarray(params['w2'], np.float32)        # [130, 6, 5, 5]
    b2 = np.asarray(params['b2'], np.float32)
    fc1_w = np.asarray(params['fc1_w'], np.float32)  # [120, 520]
    fc1_b = np.asarray(params['fc1_b'], np.float32)
    fc2_w = np.asarray(params['fc2_w'], np.float32)  # [84, 120]
    fc2_b = np.asarray(params['fc2_b'], np.float32)
    fc3_w = np.asarray(params['fc3_w'], np.float32)  # [10, 84]
    fc3_b = np.asarray(params['fc3_b'], np.float32)

    O1, C1, KH_, KW = w1.shape                       # 6, 3, 5, 5
    W_IN = 16
    W1_OUT = W_IN - KW + 1                           # 12
    # conv1 Toeplitz slabs matching the kernel's x layout [h, b, c*16 + w]:
    #   w1m[kh, c*W_IN + wi, wo*O1 + o] = w1[o, c, kh, wi - wo]
    w1m = np.zeros((KH_, C1 * W_IN, W1_OUT * O1), np.float32)        # [5, 48, 72]
    for kh in range(KH_):
        for kw in range(KW):
            blk = w1[:, :, kh, kw]                                   # [O1, C1]
            for wo in range(W1_OUT):
                wi = wo + kw
                for c in range(C1):
                    w1m[kh, c * W_IN + wi, wo * O1:(wo + 1) * O1] = blk[:, c]
    b1t = np.tile(b1, W1_OUT)[None, :]                               # [1, 72]

    O2, C2 = w2.shape[0], w2.shape[1]                # 130, 6
    PW = W1_OUT // 2                                 # pooled width = 6
    W2_OUT = PW - KW + 1                             # 2
    NCOL = (W1_OUT - 1) * C2                         # 66 cols of the p1 slab
    # conv2 Toeplitz slabs reading p1's even-w column groups:
    #   w2m[kh, 2*(wo+kw)*C2 + c1, wo*O2 + o] = w2[o, c1, kh, kw]
    w2m = np.zeros((KH_, NCOL, W2_OUT * O2), np.float32)             # [5, 66, 260]
    for kh in range(KH_):
        for kw in range(KW):
            blk = w2[:, :, kh, kw].T                                 # [C2, O2]
            for wo in range(W2_OUT):
                wcol = 2 * (wo + kw)
                w2m[kh, wcol * C2:(wcol + 1) * C2, wo * O2:(wo + 1) * O2] = blk
    b2t = np.tile(b2, W2_OUT)[None, :]                               # [1, 260]

    # fc1 consumes z_buf[ho][b, wo*O2 + o]; torch.flatten (NCHW) index is
    # o*4 + ho*2 + wo — fold that permutation into the weights.
    fr = fc1_w.reshape(fc1_w.shape[0], O2, 2, 2)                     # [n, o, ho, wo]
    f1 = np.zeros((2, W2_OUT * O2, fc1_w.shape[0]), np.float32)      # [2, 260, 120]
    for ho in range(2):
        f1[ho] = np.transpose(fr[:, :, ho, :], (2, 1, 0)).reshape(W2_OUT * O2, -1)

    cd = compute_dtype
    return {
        'w1m': jnp.asarray(w1m, cd), 'b1t': jnp.asarray(b1t),
        'w2m': jnp.asarray(w2m, cd), 'b2t': jnp.asarray(b2t),
        'f1': jnp.asarray(f1, cd), 'fb1': jnp.asarray(fc1_b[None, :]),
        'f2': jnp.asarray(np.ascontiguousarray(fc2_w.T), cd),        # [120, 84]
        'fb2': jnp.asarray(fc2_b[None, :]),
        'f3': jnp.asarray(np.ascontiguousarray(fc3_w.T), cd),        # [84, 10]
        'fb3': jnp.asarray(fc3_b[None, :]),
    }


# ------------------------- Forward pass (single pallas_call) -------------------------

def net_forward(kp, x_nchw, *, b_tile=None):
    """Fused Net forward.  One pallas_call; the grid tiles the (padded) batch."""
    B = x_nchw.shape[0]
    if b_tile is None:
        # Sweep point (8..64; larger for big B) — b_tile is the matmul M dim.
        b_tile = int(min(64, max(8, _round_up(B, 8))))
    Bp = _round_up(B, b_tile)

    # Only per-call layout glue: NCHW -> [H, B, C*W] so that every conv1 input
    # row is one dense [b_tile, 48] slab inside the kernel (batch = matmul M).
    x3 = jnp.transpose(x_nchw, (2, 0, 1, 3)).reshape(16, B, 48)
    if Bp != B:
        x3 = jnp.pad(x3, ((0, 0), (0, Bp - B), (0, 0)))
    cdt = kp['w1m'].dtype
    x3 = x3.astype(cdt)

    out = pl.pallas_call(
        _net_kernel,
        out_shape=jax.ShapeDtypeStruct((Bp, 10), jnp.float32),
        grid=(Bp // b_tile,),
        in_specs=[
            pl.BlockSpec((16, b_tile, 48), lambda b: (0, b, 0)),   # x rows (batch-tiled)
            # Grid-invariant weights below: DMA'd once (constant index maps).
            pl.BlockSpec((5, 48, 72), lambda b: (0, 0, 0)),        # conv1 Toeplitz
            pl.BlockSpec((1, 72), lambda b: (0, 0)),               # conv1 bias (tiled)
            pl.BlockSpec((5, 66, 260), lambda b: (0, 0, 0)),       # conv2 Toeplitz
            pl.BlockSpec((1, 260), lambda b: (0, 0)),              # conv2 bias (tiled)
            pl.BlockSpec((2, 260, 120), lambda b: (0, 0, 0)),      # fc1 (flatten folded)
            pl.BlockSpec((1, 120), lambda b: (0, 0)),
            pl.BlockSpec((120, 84), lambda b: (0, 0)),             # fc2 (pre-transposed)
            pl.BlockSpec((1, 84), lambda b: (0, 0)),
            pl.BlockSpec((84, 10), lambda b: (0, 0)),              # fc3 (pre-transposed)
            pl.BlockSpec((1, 10), lambda b: (0, 0)),
        ],
        out_specs=pl.BlockSpec((b_tile, 10), lambda b: (b, 0)),    # dense writeback
        scratch_shapes=[
            pltpu.VMEM((6, b_tile, 66), cdt),    # pooled conv1 rows
            pltpu.VMEM((2, b_tile, 260), cdt),   # conv2 output rows (fc1 input)
        ],
        # TODO(synk): on v7x, pltpu.CORE_PARALLEL on this axis shards the batch
        # grid across the two TensorCores; "parallel" kept for v5e/v6e portability.
        compiler_params=pltpu.CompilerParams(
            dimension_semantics=("parallel",)),
    )(x3, kp['w1m'], kp['b1t'], kp['w2m'], kp['b2t'],
      kp['f1'], kp['fb1'], kp['f2'], kp['fb2'], kp['f3'], kp['fb3'])
    return out[:B]


# ------------------------- Pure-JAX reference -------------------------

def net_reference(params, x):
    dn = ('NCHW', 'OIHW', 'NCHW')
    y = lax.conv_general_dilated(x, params['w1'], (1, 1), 'VALID',
                                 dimension_numbers=dn)
    y = jax.nn.relu(y + params['b1'][None, :, None, None])
    y = lax.reduce_window(y, -jnp.inf, lax.max, (1, 1, 2, 2), (1, 1, 2, 2), 'VALID')
    y = lax.conv_general_dilated(y, params['w2'], (1, 1), 'VALID',
                                 dimension_numbers=dn)
    y = jax.nn.relu(y + params['b2'][None, :, None, None])
    y = y.reshape(y.shape[0], -1)
    y = jax.nn.relu(y @ params['fc1_w'].T + params['fc1_b'])
    y = jax.nn.relu(y @ params['fc2_w'].T + params['fc2_b'])
    y = y @ params['fc3_w'].T + params['fc3_b']
    return y


# ------------------------- Main -------------------------

if __name__ == "__main__":
    key = jax.random.PRNGKey(0)
    ks = jax.random.split(key, 12)

    def nrm(k, shape, scale=0.05):
        return (scale * jax.random.normal(k, shape)).astype(jnp.float32)

    params = {
        'w1': nrm(ks[0], (6, 3, 5, 5)),      'b1': nrm(ks[1], (6,)),
        'w2': nrm(ks[2], (130, 6, 5, 5)),    'b2': nrm(ks[3], (130,)),
        'fc1_w': nrm(ks[4], (120, 520)),     'fc1_b': nrm(ks[5], (120,)),
        'fc2_w': nrm(ks[6], (84, 120)),      'fc2_b': nrm(ks[7], (84,)),
        'fc3_w': nrm(ks[8], (10, 84)),       'fc3_b': nrm(ks[9], (10,)),
    }

    kparams = prepare_params(params)        # one-time, host-side weight repack
    fwd = jax.jit(net_forward, static_argnames=("b_tile",))

    # Tolerance is for bf16 MXU operands with f32 accumulation.
    TOL = dict(rtol=2e-3, atol=2e-3)

    # Small-batch check (B=2, padded to one 8-image tile).
    x = jax.random.normal(ks[10], (2, 3, 16, 16), dtype=jnp.float32)   # NCHW
    out = jax.block_until_ready(fwd(kparams, x))
    assert out.shape == (2, 10)
    ref = jax.block_until_ready(net_reference(params, x))
    np.testing.assert_allclose(np.asarray(out), np.asarray(ref), **TOL)

    # Multi-tile check with a ragged tail (B=20, b_tile=8 -> grid of 3, padded).
    xb = jax.random.normal(ks[11], (20, 3, 16, 16), dtype=jnp.float32)
    outb = jax.block_until_ready(fwd(kparams, xb, b_tile=8))
    assert outb.shape == (20, 10)
    refb = jax.block_until_ready(net_reference(params, xb))
    np.testing.assert_allclose(np.asarray(outb), np.asarray(refb), **TOL)

    print("KERNEL_OK")
</pallas_src>

<mosaic_0001>
module attributes {stable_mosaic.version = 11 : i64} {
  func.func @_net_kernel(%arg0: i32, %arg1: memref<16x8x48xbf16, #tpu.memory_space<vmem>>, %arg2: memref<5x48x72xbf16, #tpu.memory_space<vmem>>, %arg3: memref<1x72xf32, #tpu.memory_space<vmem>>, %arg4: memref<5x66x260xbf16, #tpu.memory_space<vmem>>, %arg5: memref<1x260xf32, #tpu.memory_space<vmem>>, %arg6: memref<2x260x120xbf16, #tpu.memory_space<vmem>>, %arg7: memref<1x120xf32, #tpu.memory_space<vmem>>, %arg8: memref<120x84xbf16, #tpu.memory_space<vmem>>, %arg9: memref<1x84xf32, #tpu.memory_space<vmem>>, %arg10: memref<84x10xbf16, #tpu.memory_space<vmem>>, %arg11: memref<1x10xf32, #tpu.memory_space<vmem>>, %arg12: memref<8x10xf32, #tpu.memory_space<vmem>>, %arg13: memref<6x8x66xbf16, #tpu.memory_space<vmem>>, %arg14: memref<2x8x260xbf16, #tpu.memory_space<vmem>>) attributes {dimension_semantics = [#tpu.dimension_semantics<parallel>], iteration_bounds = array<i64: 1>, scalar_prefetch = 0 : i64, scratch_operands = 2 : i64, tpu.core_type = #tpu.core_type<tc>, window_params = [{transform_indices = @transform_0, window_bounds = array<i64: 16, 8, 48>}, {pipeline_mode = #tpu.pipeline_mode<synchronous>, transform_indices = @transform_1, window_bounds = array<i64: 5, 48, 72>}, {pipeline_mode = #tpu.pipeline_mode<synchronous>, transform_indices = @transform_2, window_bounds = array<i64: 1, 72>}, {pipeline_mode = #tpu.pipeline_mode<synchronous>, transform_indices = @transform_3, window_bounds = array<i64: 5, 66, 260>}, {pipeline_mode = #tpu.pipeline_mode<synchronous>, transform_indices = @transform_4, window_bounds = array<i64: 1, 260>}, {pipeline_mode = #tpu.pipeline_mode<synchronous>, transform_indices = @transform_5, window_bounds = array<i64: 2, 260, 120>}, {pipeline_mode = #tpu.pipeline_mode<synchronous>, transform_indices = @transform_6, window_bounds = array<i64: 1, 120>}, {pipeline_mode = #tpu.pipeline_mode<synchronous>, transform_indices = @transform_7, window_bounds = array<i64: 120, 84>}, {pipeline_mode = #tpu.pipeline_mode<synchronous>, transform_indices = @transform_8, window_bounds = array<i64: 1, 84>}, {pipeline_mode = #tpu.pipeline_mode<synchronous>, transform_indices = @transform_9, window_bounds = array<i64: 84, 10>}, {pipeline_mode = #tpu.pipeline_mode<synchronous>, transform_indices = @transform_10, window_bounds = array<i64: 1, 10>}, {transform_indices = @transform_11, window_bounds = array<i64: 8, 10>}]} {
    %c0 = arith.constant 0 : index
    %c0_0 = arith.constant 0 : index
    %0 = vector.load %arg3[%c0, %c0_0] : memref<1x72xf32, #tpu.memory_space<vmem>>, vector<1x72xf32>
    %1 = vector.shape_cast %0 : vector<1x72xf32> to vector<1x72xf32>
    %2 = vector.broadcast %1 : vector<1x72xf32> to vector<8x72xf32>
    %c0_1 = arith.constant 0 : index
    %c0_2 = arith.constant 0 : index
    %3 = vector.load %arg5[%c0_1, %c0_2] : memref<1x260xf32, #tpu.memory_space<vmem>>, vector<1x260xf32>
    %c0_3 = arith.constant 0 : index
    %c0_4 = arith.constant 0 : index
    %c0_5 = arith.constant 0 : index
    %4 = vector.load %arg1[%c0_3, %c0_4, %c0_5] : memref<16x8x48xbf16, #tpu.memory_space<vmem>>, vector<1x8x48xbf16>
    %5 = vector.shape_cast %4 : vector<1x8x48xbf16> to vector<8x48xbf16>
    %c0_6 = arith.constant 0 : index
    %c0_7 = arith.constant 0 : index
    %c0_8 = arith.constant 0 : index
    %6 = vector.load %arg2[%c0_6, %c0_7, %c0_8] : memref<5x48x72xbf16, #tpu.memory_space<vmem>>, vector<1x48x72xbf16>
    %7 = vector.shape_cast %6 : vector<1x48x72xbf16> to vector<48x72xbf16>
    %cst = arith.constant dense<0.000000e+00> : vector<8x72xf32>
    %8 = tpu.matmul %5, %7, %cst {dimension_numbers = #tpu.dot_dimension_numbers<[1], [0], [0], [1], [0, 0, 1, 1], [], []>} : vector<8x48xbf16>, vector<48x72xbf16>, vector<8x72xf32> -> vector<8x72xf32>
    %c1 = arith.constant 1 : index
    %c0_9 = arith.constant 0 : index
    %c0_10 = arith.constant 0 : index
    %9 = vector.load %arg1[%c1, %c0_9, %c0_10] : memref<16x8x48xbf16, #tpu.memory_space<vmem>>, vector<1x8x48xbf16>
    %10 = vector.shape_cast %9 : vector<1x8x48xbf16> to vector<8x48xbf16>
    %c0_11 = arith.constant 0 : index
    %c0_12 = arith.constant 0 : index
    %c0_13 = arith.constant 0 : index
    %11 = vector.load %arg2[%c0_11, %c0_12, %c0_13] : memref<5x48x72xbf16, #tpu.memory_space<vmem>>, vector<1x48x72xbf16>
    %12 = vector.shape_cast %11 : vector<1x48x72xbf16> to vector<48x72xbf16>
    %cst_14 = arith.constant dense<0.000000e+00> : vector<8x72xf32>
    %13 = tpu.matmul %10, %12, %cst_14 {dimension_numbers = #tpu.dot_dimension_numbers<[1], [0], [0], [1], [0, 0, 1, 1], [], []>} : vector<8x48xbf16>, vector<48x72xbf16>, vector<8x72xf32> -> vector<8x72xf32>
    %c1_15 = arith.constant 1 : index
    %c0_16 = arith.constant 0 : index
    %c0_17 = arith.constant 0 : index
    %14 = vector.load %arg1[%c1_15, %c0_16, %c0_17] : memref<16x8x48xbf16, #tpu.memory_space<vmem>>, vector<1x8x48xbf16>
    %15 = vector.shape_cast %14 : vector<1x8x48xbf16> to vector<8x48xbf16>
    %c1_18 = arith.constant 1 : index
    %c0_19 = arith.constant 0 : index
    %c0_20 = arith.constant 0 : index
    %16 = vector.load %arg2[%c1_18, %c0_19, %c0_20] : memref<5x48x72xbf16, #tpu.memory_space<vmem>>, vector<1x48x72xbf16>
    %17 = vector.shape_cast %16 : vector<1x48x72xbf16> to vector<48x72xbf16>
    %cst_21 = arith.constant dense<0.000000e+00> : vector<8x72xf32>
    %18 = tpu.matmul %15, %17, %cst_21 {dimension_numbers = #tpu.dot_dimension_numbers<[1], [0], [0], [1], [0, 0, 1, 1], [], []>} : vector<8x48xbf16>, vector<48x72xbf16>, vector<8x72xf32> -> vector<8x72xf32>
    %19 = arith.addf %8, %18 : vector<8x72xf32>
    %c2 = arith.constant 2 : index
    %c0_22 = arith.constant 0 : index
    %c0_23 = arith.constant 0 : index
    %20 = vector.load %arg1[%c2, %c0_22, %c0_23] : memref<16x8x48xbf16, #tpu.memory_space<vmem>>, vector<1x8x48xbf16>
    %21 = vector.shape_cast %20 : vector<1x8x48xbf16> to vector<8x48xbf16>
    %c1_24 = arith.constant 1 : index
    %c0_25 = arith.constant 0 : index
    %c0_26 = arith.constant 0 : index
    %22 = vector.load %arg2[%c1_24, %c0_25, %c0_26] : memref<5x48x72xbf16, #tpu.memory_space<vmem>>, vector<1x48x72xbf16>
    %23 = vector.shape_cast %22 : vector<1x48x72xbf16> to vector<48x72xbf16>
    %cst_27 = arith.constant dense<0.000000e+00> : vector<8x72xf32>
    %24 = tpu.matmul %21, %23, %cst_27 {dimension_numbers = #tpu.dot_dimension_numbers<[1], [0], [0], [1], [0, 0, 1, 1], [], []>} : vector<8x48xbf16>, vector<48x72xbf16>, vector<8x72xf32> -> vector<8x72xf32>
    %25 = arith.addf %13, %24 : vector<8x72xf32>
    %c2_28 = arith.constant 2 : index
    %c0_29 = arith.constant 0 : index
    %c0_30 = arith.constant 0 : index
    %26 = vector.load %arg1[%c2_28, %c0_29, %c0_30] : memref<16x8x48xbf16, #tpu.memory_space<vmem>>, vector<1x8x48xbf16>
    %27 = vector.shape_cast %26 : vector<1x8x48xbf16> to vector<8x48xbf16>
    %c2_31 = arith.constant 2 : index
    %c0_32 = arith.constant 0 : index
    %c0_33 = arith.constant 0 : index
    %28 = vector.load %arg2[%c2_31, %c0_32, %c0_33] : memref<5x48x72xbf16, #tpu.memory_space<vmem>>, vector<1x48x72xbf16>
    %29 = vector.shape_cast %28 : vector<1x48x72xbf16> to vector<48x72xbf16>
    %cst_34 = arith.constant dense<0.000000e+00> : vector<8x72xf32>
    %30 = tpu.matmul %27, %29, %cst_34 {dimension_numbers = #tpu.dot_dimension_numbers<[1], [0], [0], [1], [0, 0, 1, 1], [], []>} : vector<8x48xbf16>, vector<48x72xbf16>, vector<8x72xf32> -> vector<8x72xf32>
    %31 = arith.addf %19, %30 : vector<8x72xf32>
    %c3 = arith.constant 3 : index
    %c0_35 = arith.constant 0 : index
    %c0_36 = arith.constant 0 : index
    %32 = vector.load %arg1[%c3, %c0_35, %c0_36] : memref<16x8x48xbf16, #tpu.memory_space<vmem>>, vector<1x8x48xbf16>
    %33 = vector.shape_cast %32 : vector<1x8x48xbf16> to vector<8x48xbf16>
    %c2_37 = arith.constant 2 : index
    %c0_38 = arith.constant 0 : index
    %c0_39 = arith.constant 0 : index
    %34 = vector.load %arg2[%c2_37, %c0_38, %c0_39] : memref<5x48x72xbf16, #tpu.memory_space<vmem>>, vector<1x48x72xbf16>
    %35 = vector.shape_cast %34 : vector<1x48x72xbf16> to vector<48x72xbf16>
    %cst_40 = arith.constant dense<0.000000e+00> : vector<8x72xf32>
    %36 = tpu.matmul %33, %35, %cst_40 {dimension_numbers = #tpu.dot_dimension_numbers<[1], [0], [0], [1], [0, 0, 1, 1], [], []>} : vector<8x48xbf16>, vector<48x72xbf16>, vector<8x72xf32> -> vector<8x72xf32>
    %37 = arith.addf %25, %36 : vector<8x72xf32>
    %c3_41 = arith.constant 3 : index
    %c0_42 = arith.constant 0 : index
    %c0_43 = arith.constant 0 : index
    %38 = vector.load %arg1[%c3_41, %c0_42, %c0_43] : memref<16x8x48xbf16, #tpu.memory_space<vmem>>, vector<1x8x48xbf16>
    %39 = vector.shape_cast %38 : vector<1x8x48xbf16> to vector<8x48xbf16>
    %c3_44 = arith.constant 3 : index
    %c0_45 = arith.constant 0 : index
    %c0_46 = arith.constant 0 : index
    %40 = vector.load %arg2[%c3_44, %c0_45, %c0_46] : memref<5x48x72xbf16, #tpu.memory_space<vmem>>, vector<1x48x72xbf16>
    %41 = vector.shape_cast %40 : vector<1x48x72xbf16> to vector<48x72xbf16>
    %cst_47 = arith.constant dense<0.000000e+00> : vector<8x72xf32>
    %42 = tpu.matmul %39, %41, %cst_47 {dimension_numbers = #tpu.dot_dimension_numbers<[1], [0], [0], [1], [0, 0, 1, 1], [], []>} : vector<8x48xbf16>, vector<48x72xbf16>, vector<8x72xf32> -> vector<8x72xf32>
    %43 = arith.addf %31, %42 : vector<8x72xf32>
    %c4 = arith.constant 4 : index
    %c0_48 = arith.constant 0 : index
    %c0_49 = arith.constant 0 : index
    %44 = vector.load %arg1[%c4, %c0_48, %c0_49] : memref<16x8x48xbf16, #tpu.memory_space<vmem>>, vector<1x8x48xbf16>
    %45 = vector.shape_cast %44 : vector<1x8x48xbf16> to vector<8x48xbf16>
    %c3_50 = arith.constant 3 : index
    %c0_51 = arith.constant 0 : index
    %c0_52 = arith.constant 0 : index
    %46 = vector.load %arg2[%c3_50, %c0_51, %c0_52] : memref<5x48x72xbf16, #tpu.memory_space<vmem>>, vector<1x48x72xbf16>
    %47 = vector.shape_cast %46 : vector<1x48x72xbf16> to vector<48x72xbf16>
    %cst_53 = arith.constant dense<0.000000e+00> : vector<8x72xf32>
    %48 = tpu.matmul %45, %47, %cst_53 {dimension_numbers = #tpu.dot_dimension_numbers<[1], [0], [0], [1], [0, 0, 1, 1], [], []>} : vector<8x48xbf16>, vector<48x72xbf16>, vector<8x72xf32> -> vector<8x72xf32>
    %49 = arith.addf %37, %48 : vector<8x72xf32>
    %c4_54 = arith.constant 4 : index
    %c0_55 = arith.constant 0 : index
    %c0_56 = arith.constant 0 : index
    %50 = vector.load %arg1[%c4_54, %c0_55, %c0_56] : memref<16x8x48xbf16, #tpu.memory_space<vmem>>, vector<1x8x48xbf16>
    %51 = vector.shape_cast %50 : vector<1x8x48xbf16> to vector<8x48xbf16>
    %c4_57 = arith.constant 4 : index
    %c0_58 = arith.constant 0 : index
    %c0_59 = arith.constant 0 : index
    %52 = vector.load %arg2[%c4_57, %c0_58, %c0_59] : memref<5x48x72xbf16, #tpu.memory_space<vmem>>, vector<1x48x72xbf16>
    %53 = vector.shape_cast %52 : vector<1x48x72xbf16> to vector<48x72xbf16>
    %cst_60 = arith.constant dense<0.000000e+00> : vector<8x72xf32>
    %54 = tpu.matmul %51, %53, %cst_60 {dimension_numbers = #tpu.dot_dimension_numbers<[1], [0], [0], [1], [0, 0, 1, 1], [], []>} : vector<8x48xbf16>, vector<48x72xbf16>, vector<8x72xf32> -> vector<8x72xf32>
    %55 = arith.addf %43, %54 : vector<8x72xf32>
    %c5 = arith.constant 5 : index
    %c0_61 = arith.constant 0 : index
    %c0_62 = arith.constant 0 : index
    %56 = vector.load %arg1[%c5, %c0_61, %c0_62] : memref<16x8x48xbf16, #tpu.memory_space<vmem>>, vector<1x8x48xbf16>
    %57 = vector.shape_cast %56 : vector<1x8x48xbf16> to vector<8x48xbf16>
    %c4_63 = arith.constant 4 : index
    %c0_64 = arith.constant 0 : index
    %c0_65 = arith.constant 0 : index
    %58 = vector.load %arg2[%c4_63, %c0_64, %c0_65] : memref<5x48x72xbf16, #tpu.memory_space<vmem>>, vector<1x48x72xbf16>
    %59 = vector.shape_cast %58 : vector<1x48x72xbf16> to vector<48x72xbf16>
    %cst_66 = arith.constant dense<0.000000e+00> : vector<8x72xf32>
    %60 = tpu.matmul %57, %59, %cst_66 {dimension_numbers = #tpu.dot_dimension_numbers<[1], [0], [0], [1], [0, 0, 1, 1], [], []>} : vector<8x48xbf16>, vector<48x72xbf16>, vector<8x72xf32> -> vector<8x72xf32>
    %61 = arith.addf %49, %60 : vector<8x72xf32>
    %62 = arith.addf %55, %2 : vector<8x72xf32>
    %cst_67 = arith.constant 0.000000e+00 : f32
    %63 = vector.broadcast %cst_67 : f32 to vector<8x72xf32>
    %64 = arith.maximumf %62, %63 : vector<8x72xf32>
    %65 = arith.addf %61, %2 : vector<8x72xf32>
    %cst_68 = arith.constant 0.000000e+00 : f32
    %66 = vector.broadcast %cst_68 : f32 to vector<8x72xf32>
    %67 = arith.maximumf %65, %66 : vector<8x72xf32>
    %68 = arith.maximumf %64, %67 : vector<8x72xf32>
    %69 = vector.extract_strided_slice %68 {offsets = [0, 0], sizes = [8, 66], strides = [1, 1]} : vector<8x72xf32> to vector<8x66xf32>
    %70 = vector.extract_strided_slice %68 {offsets = [0, 6], sizes = [8, 66], strides = [1, 1]} : vector<8x72xf32> to vector<8x66xf32>
    %71 = arith.maximumf %69, %70 : vector<8x66xf32>
    %72 = arith.truncf %71 : vector<8x66xf32> to vector<8x66xbf16>
    %c0_69 = arith.constant 0 : index
    %c0_70 = arith.constant 0 : index
    %c0_71 = arith.constant 0 : index
    %73 = vector.load %arg13[%c0_69, %c0_70, %c0_71] : memref<6x8x66xbf16, #tpu.memory_space<vmem>>, vector<1x8x66xbf16>
    %74 = vector.shape_cast %73 : vector<1x8x66xbf16> to vector<8x66xbf16>
    %75 = vector.shape_cast %72 : vector<8x66xbf16> to vector<1x8x66xbf16>
    tpu.vector_store %arg13[%c0_69, %c0_70, %c0_71], %75 {strides = array<i32>} : memref<6x8x66xbf16, #tpu.memory_space<vmem>>, vector<1x8x66xbf16>,
    %c2_72 = arith.constant 2 : index
    %c0_73 = arith.constant 0 : index
    %c0_74 = arith.constant 0 : index
    %76 = vector.load %arg1[%c2_72, %c0_73, %c0_74] : memref<16x8x48xbf16, #tpu.memory_space<vmem>>, vector<1x8x48xbf16>
    %77 = vector.shape_cast %76 : vector<1x8x48xbf16> to vector<8x48xbf16>
    %c0_75 = arith.constant 0 : index
    %c0_76 = arith.constant 0 : index
    %c0_77 = arith.constant 0 : index
    %78 = vector.load %arg2[%c0_75, %c0_76, %c0_77] : memref<5x48x72xbf16, #tpu.memory_space<vmem>>, vector<1x48x72xbf16>
    %79 = vector.shape_cast %78 : vector<1x48x72xbf16> to vector<48x72xbf16>
    %cst_78 = arith.constant dense<0.000000e+00> : vector<8x72xf32>
    %80 = tpu.matmul %77, %79, %cst_78 {dimension_numbers = #tpu.dot_dimension_numbers<[1], [0], [0], [1], [0, 0, 1, 1], [], []>} : vector<8x48xbf16>, vector<48x72xbf16>, vector<8x72xf32> -> vector<8x72xf32>
    %c3_79 = arith.constant 3 : index
    %c0_80 = arith.constant 0 : index
    %c0_81 = arith.constant 0 : index
    %81 = vector.load %arg1[%c3_79, %c0_80, %c0_81] : memref<16x8x48xbf16, #tpu.memory_space<vmem>>, vector<1x8x48xbf16>
    %82 = vector.shape_cast %81 : vector<1x8x48xbf16> to vector<8x48xbf16>
    %c0_82 = arith.constant 0 : index
    %c0_83 = arith.constant 0 : index
    %c0_84 = arith.constant 0 : index
    %83 = vector.load %arg2[%c0_82, %c0_83, %c0_84] : memref<5x48x72xbf16, #tpu.memory_space<vmem>>, vector<1x48x72xbf16>
    %84 = vector.shape_cast %83 : vector<1x48x72xbf16> to vector<48x72xbf16>
    %cst_85 = arith.constant dense<0.000000e+00> : vector<8x72xf32>
    %85 = tpu.matmul %82, %84, %cst_85 {dimension_numbers = #tpu.dot_dimension_numbers<[1], [0], [0], [1], [0, 0, 1, 1], [], []>} : vector<8x48xbf16>, vector<48x72xbf16>, vector<8x72xf32> -> vector<8x72xf32>
    %c3_86 = arith.constant 3 : index
    %c0_87 = arith.constant 0 : index
    %c0_88 = arith.constant 0 : index
    %86 = vector.load %arg1[%c3_86, %c0_87, %c0_88] : memref<16x8x48xbf16, #tpu.memory_space<vmem>>, vector<1x8x48xbf16>
    %87 = vector.shape_cast %86 : vector<1x8x48xbf16> to vector<8x48xbf16>
    %c1_89 = arith.constant 1 : index
    %c0_90 = arith.constant 0 : index
    %c0_91 = arith.constant 0 : index
    %88 = vector.load %arg2[%c1_89, %c0_90, %c0_91] : memref<5x48x72xbf16, #tpu.memory_space<vmem>>, vector<1x48x72xbf16>
    %89 = vector.shape_cast %88 : vector<1x48x72xbf16> to vector<48x72xbf16>
    %cst_92 = arith.constant dense<0.000000e+00> : vector<8x72xf32>
    %90 = tpu.matmul %87, %89, %cst_92 {dimension_numbers = #tpu.dot_dimension_numbers<[1], [0], [0], [1], [0, 0, 1, 1], [], []>} : vector<8x48xbf16>, vector<48x72xbf16>, vector<8x72xf32> -> vector<8x72xf32>
    %91 = arith.addf %80, %90 : vector<8x72xf32>
    %c4_93 = arith.constant 4 : index
    %c0_94 = arith.constant 0 : index
    %c0_95 = arith.constant 0 : index
    %92 = vector.load %arg1[%c4_93, %c0_94, %c0_95] : memref<16x8x48xbf16, #tpu.memory_space<vmem>>, vector<1x8x48xbf16>
    %93 = vector.shape_cast %92 : vector<1x8x48xbf16> to vector<8x48xbf16>
    %c1_96 = arith.constant 1 : index
    %c0_97 = arith.constant 0 : index
    %c0_98 = arith.constant 0 : index
    %94 = vector.load %arg2[%c1_96, %c0_97, %c0_98] : memref<5x48x72xbf16, #tpu.memory_space<vmem>>, vector<1x48x72xbf16>
    %95 = vector.shape_cast %94 : vector<1x48x72xbf16> to vector<48x72xbf16>
    %cst_99 = arith.constant dense<0.000000e+00> : vector<8x72xf32>
    %96 = tpu.matmul %93, %95, %cst_99 {dimension_numbers = #tpu.dot_dimension_numbers<[1], [0], [0], [1], [0, 0, 1, 1], [], []>} : vector<8x48xbf16>, vector<48x72xbf16>, vector<8x72xf32> -> vector<8x72xf32>
    %97 = arith.addf %85, %96 : vector<8x72xf32>
    %c4_100 = arith.constant 4 : index
    %c0_101 = arith.constant 0 : index
    %c0_102 = arith.constant 0 : index
    %98 = vector.load %arg1[%c4_100, %c0_101, %c0_102] : memref<16x8x48xbf16, #tpu.memory_space<vmem>>, vector<1x8x48xbf16>
    %99 = vector.shape_cast %98 : vector<1x8x48xbf16> to vector<8x48xbf16>
    %c2_103 = arith.constant 2 : index
    %c0_104 = arith.constant 0 : index
    %c0_105 = arith.constant 0 : index
    %100 = vector.load %arg2[%c2_103, %c0_104, %c0_105] : memref<5x48x72xbf16, #tpu.memory_space<vmem>>, vector<1x48x72xbf16>
    %101 = vector.shape_cast %100 : vector<1x48x72xbf16> to vector<48x72xbf16>
    %cst_106 = arith.constant dense<0.000000e+00> : vector<8x72xf32>
    %102 = tpu.matmul %99, %101, %cst_106 {dimension_numbers = #tpu.dot_dimension_numbers<[1], [0], [0], [1], [0, 0, 1, 1], [], []>} : vector<8x48xbf16>, vector<48x72xbf16>, vector<8x72xf32> -> vector<8x72xf32>
    %103 = arith.addf %91, %102 : vector<8x72xf32>
    %c5_107 = arith.constant 5 : index
    %c0_108 = arith.constant 0 : index
    %c0_109 = arith.constant 0 : index
    %104 = vector.load %arg1[%c5_107, %c0_108, %c0_109] : memref<16x8x48xbf16, #tpu.memory_space<vmem>>, vector<1x8x48xbf16>
    %105 = vector.shape_cast %104 : vector<1x8x48xbf16> to vector<8x48xbf16>
    %c2_110 = arith.constant 2 : index
    %c0_111 = arith.constant 0 : index
    %c0_112 = arith.constant 0 : index
    %106 = vector.load %arg2[%c2_110, %c0_111, %c0_112] : memref<5x48x72xbf16, #tpu.memory_space<vmem>>, vector<1x48x72xbf16>
    %107 = vector.shape_cast %106 : vector<1x48x72xbf16> to vector<48x72xbf16>
    %cst_113 = arith.constant dense<0.000000e+00> : vector<8x72xf32>
    %108 = tpu.matmul %105, %107, %cst_113 {dimension_numbers = #tpu.dot_dimension_numbers<[1], [0], [0], [1], [0, 0, 1, 1], [], []>} : vector<8x48xbf16>, vector<48x72xbf16>, vector<8x72xf32> -> vector<8x72xf32>
    %109 = arith.addf %97, %108 : vector<8x72xf32>
    %c5_114 = arith.constant 5 : index
    %c0_115 = arith.constant 0 : index
    %c0_116 = arith.constant 0 : index
    %110 = vector.load %arg1[%c5_114, %c0_115, %c0_116] : memref<16x8x48xbf16, #tpu.memory_space<vmem>>, vector<1x8x48xbf16>
    %111 = vector.shape_cast %110 : vector<1x8x48xbf16> to vector<8x48xbf16>
    %c3_117 = arith.constant 3 : index
    %c0_118 = arith.constant 0 : index
    %c0_119 = arith.constant 0 : index
    %112 = vector.load %arg2[%c3_117, %c0_118, %c0_119] : memref<5x48x72xbf16, #tpu.memory_space<vmem>>, vector<1x48x72xbf16>
    %113 = vector.shape_cast %112 : vector<1x48x72xbf16> to vector<48x72xbf16>
    %cst_120 = arith.constant dense<0.000000e+00> : vector<8x72xf32>
    %114 = tpu.matmul %111, %113, %cst_120 {dimension_numbers = #tpu.dot_dimension_numbers<[1], [0], [0], [1], [0, 0, 1, 1], [], []>} : vector<8x48xbf16>, vector<48x72xbf16>, vector<8x72xf32> -> vector<8x72xf32>
    %115 = arith.addf %103, %114 : vector<8x72xf32>
    %c6 = arith.constant 6 : index
    %c0_121 = arith.constant 0 : index
    %c0_122 = arith.constant 0 : index
    %116 = vector.load %arg1[%c6, %c0_121, %c0_122] : memref<16x8x48xbf16, #tpu.memory_space<vmem>>, vector<1x8x48xbf16>
    %117 = vector.shape_cast %116 : vector<1x8x48xbf16> to vector<8x48xbf16>
    %c3_123 = arith.constant 3 : index
    %c0_124 = arith.constant 0 : index
    %c0_125 = arith.constant 0 : index
    %118 = vector.load %arg2[%c3_123, %c0_124, %c0_125] : memref<5x48x72xbf16, #tpu.memory_space<vmem>>, vector<1x48x72xbf16>
    %119 = vector.shape_cast %118 : vector<1x48x72xbf16> to vector<48x72xbf16>
    %cst_126 = arith.constant dense<0.000000e+00> : vector<8x72xf32>
    %120 = tpu.matmul %117, %119, %cst_126 {dimension_numbers = #tpu.dot_dimension_numbers<[1], [0], [0], [1], [0, 0, 1, 1], [], []>} : vector<8x48xbf16>, vector<48x72xbf16>, vector<8x72xf32> -> vector<8x72xf32>
    %121 = arith.addf %109, %120 : vector<8x72xf32>
    %c6_127 = arith.constant 6 : index
    %c0_128 = arith.constant 0 : index
    %c0_129 = arith.constant 0 : index
    %122 = vector.load %arg1[%c6_127, %c0_128, %c0_129] : memref<16x8x48xbf16, #tpu.memory_space<vmem>>, vector<1x8x48xbf16>
    %123 = vector.shape_cast %122 : vector<1x8x48xbf16> to vector<8x48xbf16>
    %c4_130 = arith.constant 4 : index
    %c0_131 = arith.constant 0 : index
    %c0_132 = arith.constant 0 : index
    %124 = vector.load %arg2[%c4_130, %c0_131, %c0_132] : memref<5x48x72xbf16, #tpu.memory_space<vmem>>, vector<1x48x72xbf16>
    %125 = vector.shape_cast %124 : vector<1x48x72xbf16> to vector<48x72xbf16>
    %cst_133 = arith.constant dense<0.000000e+00> : vector<8x72xf32>
    %126 = tpu.matmul %123, %125, %cst_133 {dimension_numbers = #tpu.dot_dimension_numbers<[1], [0], [0], [1], [0, 0, 1, 1], [], []>} : vector<8x48xbf16>, vector<48x72xbf16>, vector<8x72xf32> -> vector<8x72xf32>
    %127 = arith.addf %115, %126 : vector<8x72xf32>
    %c7 = arith.constant 7 : index
    %c0_134 = arith.constant 0 : index
    %c0_135 = arith.constant 0 : index
    %128 = vector.load %arg1[%c7, %c0_134, %c0_135] : memref<16x8x48xbf16, #tpu.memory_space<vmem>>, vector<1x8x48xbf16>
    %129 = vector.shape_cast %128 : vector<1x8x48xbf16> to vector<8x48xbf16>
    %c4_136 = arith.constant 4 : index
    %c0_137 = arith.constant 0 : index
    %c0_138 = arith.constant 0 : index
    %130 = vector.load %arg2[%c4_136, %c0_137, %c0_138] : memref<5x48x72xbf16, #tpu.memory_space<vmem>>, vector<1x48x72xbf16>
    %131 = vector.shape_cast %130 : vector<1x48x72xbf16> to vector<48x72xbf16>
    %cst_139 = arith.constant dense<0.000000e+00> : vector<8x72xf32>
    %132 = tpu.matmul %129, %131, %cst_139 {dimension_numbers = #tpu.dot_dimension_numbers<[1], [0], [0], [1], [0, 0, 1, 1], [], []>} : vector<8x48xbf16>, vector<48x72xbf16>, vector<8x72xf32> -> vector<8x72xf32>
    %133 = arith.addf %121, %132 : vector<8x72xf32>
    %134 = arith.addf %127, %2 : vector<8x72xf32>
    %cst_140 = arith.constant 0.000000e+00 : f32
    %135 = vector.broadcast %cst_140 : f32 to vector<8x72xf32>
    %136 = arith.maximumf %134, %135 : vector<8x72xf32>
    %137 = arith.addf %133, %2 : vector<8x72xf32>
    %cst_141 = arith.constant 0.000000e+00 : f32
    %138 = vector.broadcast %cst_141 : f32 to vector<8x72xf32>
    %139 = arith.maximumf %137, %138 : vector<8x72xf32>
    %140 = arith.maximumf %136, %139 : vector<8x72xf32>
    %141 = vector.extract_strided_slice %140 {offsets = [0, 0], sizes = [8, 66], strides = [1, 1]} : vector<8x72xf32> to vector<8x66xf32>
    %142 = vector.extract_strided_slice %140 {offsets = [0, 6], sizes = [8, 66], strides = [1, 1]} : vector<8x72xf32> to vector<8x66xf32>
    %143 = arith.maximumf %141, %142 : vector<8x66xf32>
    %144 = arith.truncf %143 : vector<8x66xf32> to vector<8x66xbf16>
    %c1_142 = arith.constant 1 : index
    %c0_143 = arith.constant 0 : index
    %c0_144 = arith.constant 0 : index
    %145 = vector.load %arg13[%c1_142, %c0_143, %c0_144] : memref<6x8x66xbf16, #tpu.memory_space<vmem>>, vector<1x8x66xbf16>
    %146 = vector.shape_cast %145 : vector<1x8x66xbf16> to vector<8x66xbf16>
    %147 = vector.shape_cast %144 : vector<8x66xbf16> to vector<1x8x66xbf16>
    tpu.vector_store %arg13[%c1_142, %c0_143, %c0_144], %147 {strides = array<i32>} : memref<6x8x66xbf16, #tpu.memory_space<vmem>>, vector<1x8x66xbf16>,
    %c4_145 = arith.constant 4 : index
    %c0_146 = arith.constant 0 : index
    %c0_147 = arith.constant 0 : index
    %148 = vector.load %arg1[%c4_145, %c0_146, %c0_147] : memref<16x8x48xbf16, #tpu.memory_space<vmem>>, vector<1x8x48xbf16>
    %149 = vector.shape_cast %148 : vector<1x8x48xbf16> to vector<8x48xbf16>
    %c0_148 = arith.constant 0 : index
    %c0_149 = arith.constant 0 : index
    %c0_150 = arith.constant 0 : index
    %150 = vector.load %arg2[%c0_148, %c0_149, %c0_150] : memref<5x48x72xbf16, #tpu.memory_space<vmem>>, vector<1x48x72xbf16>
    %151 = vector.shape_cast %150 : vector<1x48x72xbf16> to vector<48x72xbf16>
    %cst_151 = arith.constant dense<0.000000e+00> : vector<8x72xf32>
    %152 = tpu.matmul %149, %151, %cst_151 {dimension_numbers = #tpu.dot_dimension_numbers<[1], [0], [0], [1], [0, 0, 1, 1], [], []>} : vector<8x48xbf16>, vector<48x72xbf16>, vector<8x72xf32> -> vector<8x72xf32>
    %c5_152 = arith.constant 5 : index
    %c0_153 = arith.constant 0 : index
    %c0_154 = arith.constant 0 : index
    %153 = vector.load %arg1[%c5_152, %c0_153, %c0_154] : memref<16x8x48xbf16, #tpu.memory_space<vmem>>, vector<1x8x48xbf16>
    %154 = vector.shape_cast %153 : vector<1x8x48xbf16> to vector<8x48xbf16>
    %c0_155 = arith.constant 0 : index
    %c0_156 = arith.constant 0 : index
    %c0_157 = arith.constant 0 : index
    %155 = vector.load %arg2[%c0_155, %c0_156, %c0_157] : memref<5x48x72xbf16, #tpu.memory_space<vmem>>, vector<1x48x72xbf16>
    %156 = vector.shape_cast %155 : vector<1x48x72xbf16> to vector<48x72xbf16>
    %cst_158 = arith.constant dense<0.000000e+00> : vector<8x72xf32>
    %157 = tpu.matmul %154, %156, %cst_158 {dimension_numbers = #tpu.dot_dimension_numbers<[1], [0], [0], [1], [0, 0, 1, 1], [], []>} : vector<8x48xbf16>, vector<48x72xbf16>, vector<8x72xf32> -> vector<8x72xf32>
    %c5_159 = arith.constant 5 : index
    %c0_160 = arith.constant 0 : index
    %c0_161 = arith.constant 0 : index
    %158 = vector.load %arg1[%c5_159, %c0_160, %c0_161] : memref<16x8x48xbf16, #tpu.memory_space<vmem>>, vector<1x8x48xbf16>
    %159 = vector.shape_cast %158 : vector<1x8x48xbf16> to vector<8x48xbf16>
    %c1_162 = arith.constant 1 : index
    %c0_163 = arith.constant 0 : index
    %c0_164 = arith.constant 0 : index
    %160 = vector.load %arg2[%c1_162, %c0_163, %c0_164] : memref<5x48x72xbf16, #tpu.memory_space<vmem>>, vector<1x48x72xbf16>
    %161 = vector.shape_cast %160 : vector<1x48x72xbf16> to vector<48x72xbf16>
    %cst_165 = arith.constant dense<0.000000e+00> : vector<8x72xf32>
    %162 = tpu.matmul %159, %161, %cst_165 {dimension_numbers = #tpu.dot_dimension_numbers<[1], [0], [0], [1], [0, 0, 1, 1], [], []>} : vector<8x48xbf16>, vector<48x72xbf16>, vector<8x72xf32> -> vector<8x72xf32>
    %163 = arith.addf %152, %162 : vector<8x72xf32>
    %c6_166 = arith.constant 6 : index
    %c0_167 = arith.constant 0 : index
    %c0_168 = arith.constant 0 : index
    %164 = vector.load %arg1[%c6_166, %c0_167, %c0_168] : memref<16x8x48xbf16, #tpu.memory_space<vmem>>, vector<1x8x48xbf16>
    %165 = vector.shape_cast %164 : vector<1x8x48xbf16> to vector<8x48xbf16>
    %c1_169 = arith.constant 1 : index
    %c0_170 = arith.constant 0 : index
    %c0_171 = arith.constant 0 : index
    %166 = vector.load %arg2[%c1_169, %c0_170, %c0_171] : memref<5x48x72xbf16, #tpu.memory_space<vmem>>, vector<1x48x72xbf16>
    %167 = vector.shape_cast %166 : vector<1x48x72xbf16> to vector<48x72xbf16>
    %cst_172 = arith.constant dense<0.000000e+00> : vector<8x72xf32>
    %168 = tpu.matmul %165, %167, %cst_172 {dimension_numbers = #tpu.dot_dimension_numbers<[1], [0], [0], [1], [0, 0, 1, 1], [], []>} : vector<8x48xbf16>, vector<48x72xbf16>, vector<8x72xf32> -> vector<8x72xf32>
    %169 = arith.addf %157, %168 : vector<8x72xf32>
    %c6_173 = arith.constant 6 : index
    %c0_174 = arith.constant 0 : index
    %c0_175 = arith.constant 0 : index
    %170 = vector.load %arg1[%c6_173, %c0_174, %c0_175] : memref<16x8x48xbf16, #tpu.memory_space<vmem>>, vector<1x8x48xbf16>
    %171 = vector.shape_cast %170 : vector<1x8x48xbf16> to vector<8x48xbf16>
    %c2_176 = arith.constant 2 : index
    %c0_177 = arith.constant 0 : index
    %c0_178 = arith.constant 0 : index
    %172 = vector.load %arg2[%c2_176, %c0_177, %c0_178] : memref<5x48x72xbf16, #tpu.memory_space<vmem>>, vector<1x48x72xbf16>
    %173 = vector.shape_cast %172 : vector<1x48x72xbf16> to vector<48x72xbf16>
    %cst_179 = arith.constant dense<0.000000e+00> : vector<8x72xf32>
    %174 = tpu.matmul %171, %173, %cst_179 {dimension_numbers = #tpu.dot_dimension_numbers<[1], [0], [0], [1], [0, 0, 1, 1], [], []>} : vector<8x48xbf16>, vector<48x72xbf16>, vector<8x72xf32> -> vector<8x72xf32>
    %175 = arith.addf %163, %174 : vector<8x72xf32>
    %c7_180 = arith.constant 7 : index
    %c0_181 = arith.constant 0 : index
    %c0_182 = arith.constant 0 : index
    %176 = vector.load %arg1[%c7_180, %c0_181, %c0_182] : memref<16x8x48xbf16, #tpu.memory_space<vmem>>, vector<1x8x48xbf16>
    %177 = vector.shape_cast %176 : vector<1x8x48xbf16> to vector<8x48xbf16>
    %c2_183 = arith.constant 2 : index
    %c0_184 = arith.constant 0 : index
    %c0_185 = arith.constant 0 : index
    %178 = vector.load %arg2[%c2_183, %c0_184, %c0_185] : memref<5x48x72xbf16, #tpu.memory_space<vmem>>, vector<1x48x72xbf16>
    %179 = vector.shape_cast %178 : vector<1x48x72xbf16> to vector<48x72xbf16>
    %cst_186 = arith.constant dense<0.000000e+00> : vector<8x72xf32>
    %180 = tpu.matmul %177, %179, %cst_186 {dimension_numbers = #tpu.dot_dimension_numbers<[1], [0], [0], [1], [0, 0, 1, 1], [], []>} : vector<8x48xbf16>, vector<48x72xbf16>, vector<8x72xf32> -> vector<8x72xf32>
    %181 = arith.addf %169, %180 : vector<8x72xf32>
    %c7_187 = arith.constant 7 : index
    %c0_188 = arith.constant 0 : index
    %c0_189 = arith.constant 0 : index
    %182 = vector.load %arg1[%c7_187, %c0_188, %c0_189] : memref<16x8x48xbf16, #tpu.memory_space<vmem>>, vector<1x8x48xbf16>
    %183 = vector.shape_cast %182 : vector<1x8x48xbf16> to vector<8x48xbf16>
    %c3_190 = arith.constant 3 : index
    %c0_191 = arith.constant 0 : index
    %c0_192 = arith.constant 0 : index
    %184 = vector.load %arg2[%c3_190, %c0_191, %c0_192] : memref<5x48x72xbf16, #tpu.memory_space<vmem>>, vector<1x48x72xbf16>
    %185 = vector.shape_cast %184 : vector<1x48x72xbf16> to vector<48x72xbf16>
    %cst_193 = arith.constant dense<0.000000e+00> : vector<8x72xf32>
    %186 = tpu.matmul %183, %185, %cst_193 {dimension_numbers = #tpu.dot_dimension_numbers<[1], [0], [0], [1], [0, 0, 1, 1], [], []>} : vector<8x48xbf16>, vector<48x72xbf16>, vector<8x72xf32> -> vector<8x72xf32>
    %187 = arith.addf %175, %186 : vector<8x72xf32>
    %c8 = arith.constant 8 : index
    %c0_194 = arith.constant 0 : index
    %c0_195 = arith.constant 0 : index
    %188 = vector.load %arg1[%c8, %c0_194, %c0_195] : memref<16x8x48xbf16, #tpu.memory_space<vmem>>, vector<1x8x48xbf16>
    %189 = vector.shape_cast %188 : vector<1x8x48xbf16> to vector<8x48xbf16>
    %c3_196 = arith.constant 3 : index
    %c0_197 = arith.constant 0 : index
    %c0_198 = arith.constant 0 : index
    %190 = vector.load %arg2[%c3_196, %c0_197, %c0_198] : memref<5x48x72xbf16, #tpu.memory_space<vmem>>, vector<1x48x72xbf16>
    %191 = vector.shape_cast %190 : vector<1x48x72xbf16> to vector<48x72xbf16>
    %cst_199 = arith.constant dense<0.000000e+00> : vector<8x72xf32>
    %192 = tpu.matmul %189, %191, %cst_199 {dimension_numbers = #tpu.dot_dimension_numbers<[1], [0], [0], [1], [0, 0, 1, 1], [], []>} : vector<8x48xbf16>, vector<48x72xbf16>, vector<8x72xf32> -> vector<8x72xf32>
    %193 = arith.addf %181, %192 : vector<8x72xf32>
    %c8_200 = arith.constant 8 : index
    %c0_201 = arith.constant 0 : index
    %c0_202 = arith.constant 0 : index
    %194 = vector.load %arg1[%c8_200, %c0_201, %c0_202] : memref<16x8x48xbf16, #tpu.memory_space<vmem>>, vector<1x8x48xbf16>
    %195 = vector.shape_cast %194 : vector<1x8x48xbf16> to vector<8x48xbf16>
    %c4_203 = arith.constant 4 : index
    %c0_204 = arith.constant 0 : index
    %c0_205 = arith.constant 0 : index
    %196 = vector.load %arg2[%c4_203, %c0_204, %c0_205] : memref<5x48x72xbf16, #tpu.memory_space<vmem>>, vector<1x48x72xbf16>
    %197 = vector.shape_cast %196 : vector<1x48x72xbf16> to vector<48x72xbf16>
    %cst_206 = arith.constant dense<0.000000e+00> : vector<8x72xf32>
    %198 = tpu.matmul %195, %197, %cst_206 {dimension_numbers = #tpu.dot_dimension_numbers<[1], [0], [0], [1], [0, 0, 1, 1], [], []>} : vector<8x48xbf16>, vector<48x72xbf16>, vector<8x72xf32> -> vector<8x72xf32>
    %199 = arith.addf %187, %198 : vector<8x72xf32>
    %c9 = arith.constant 9 : index
    %c0_207 = arith.constant 0 : index
    %c0_208 = arith.constant 0 : index
    %200 = vector.load %arg1[%c9, %c0_207, %c0_208] : memref<16x8x48xbf16, #tpu.memory_space<vmem>>, vector<1x8x48xbf16>
    %201 = vector.shape_cast %200 : vector<1x8x48xbf16> to vector<8x48xbf16>
    %c4_209 = arith.constant 4 : index
    %c0_210 = arith.constant 0 : index
    %c0_211 = arith.constant 0 : index
    %202 = vector.load %arg2[%c4_209, %c0_210, %c0_211] : memref<5x48x72xbf16, #tpu.memory_space<vmem>>, vector<1x48x72xbf16>
    %203 = vector.shape_cast %202 : vector<1x48x72xbf16> to vector<48x72xbf16>
    %cst_212 = arith.constant dense<0.000000e+00> : vector<8x72xf32>
    %204 = tpu.matmul %201, %203, %cst_212 {dimension_numbers = #tpu.dot_dimension_numbers<[1], [0], [0], [1], [0, 0, 1, 1], [], []>} : vector<8x48xbf16>, vector<48x72xbf16>, vector<8x72xf32> -> vector<8x72xf32>
    %205 = arith.addf %193, %204 : vector<8x72xf32>
    %206 = arith.addf %199, %2 : vector<8x72xf32>
    %cst_213 = arith.constant 0.000000e+00 : f32
    %207 = vector.broadcast %cst_213 : f32 to vector<8x72xf32>
    %208 = arith.maximumf %206, %207 : vector<8x72xf32>
    %209 = arith.addf %205, %2 : vector<8x72xf32>
    %cst_214 = arith.constant 0.000000e+00 : f32
    %210 = vector.broadcast %cst_214 : f32 to vector<8x72xf32>
    %211 = arith.maximumf %209, %210 : vector<8x72xf32>
    %212 = arith.maximumf %208, %211 : vector<8x72xf32>
    %213 = vector.extract_strided_slice %212 {offsets = [0, 0], sizes = [8, 66], strides = [1, 1]} : vector<8x72xf32> to vector<8x66xf32>
    %214 = vector.extract_strided_slice %212 {offsets = [0, 6], sizes = [8, 66], strides = [1, 1]} : vector<8x72xf32> to vector<8x66xf32>
    %215 = arith.maximumf %213, %214 : vector<8x66xf32>
    %216 = arith.truncf %215 : vector<8x66xf32> to vector<8x66xbf16>
    %c2_215 = arith.constant 2 : index
    %c0_216 = arith.constant 0 : index
    %c0_217 = arith.constant 0 : index
    %217 = vector.load %arg13[%c2_215, %c0_216, %c0_217] : memref<6x8x66xbf16, #tpu.memory_space<vmem>>, vector<1x8x66xbf16>
    %218 = vector.shape_cast %217 : vector<1x8x66xbf16> to vector<8x66xbf16>
    %219 = vector.shape_cast %216 : vector<8x66xbf16> to vector<1x8x66xbf16>
    tpu.vector_store %arg13[%c2_215, %c0_216, %c0_217], %219 {strides = array<i32>} : memref<6x8x66xbf16, #tpu.memory_space<vmem>>, vector<1x8x66xbf16>,
    %c6_218 = arith.constant 6 : index
    %c0_219 = arith.constant 0 : index
    %c0_220 = arith.constant 0 : index
    %220 = vector.load %arg1[%c6_218, %c0_219, %c0_220] : memref<16x8x48xbf16, #tpu.memory_space<vmem>>, vector<1x8x48xbf16>
    %221 = vector.shape_cast %220 : vector<1x8x48xbf16> to vector<8x48xbf16>
    %c0_221 = arith.constant 0 : index
    %c0_222 = arith.constant 0 : index
    %c0_223 = arith.constant 0 : index
    %222 = vector.load %arg2[%c0_221, %c0_222, %c0_223] : memref<5x48x72xbf16, #tpu.memory_space<vmem>>, vector<1x48x72xbf16>
    %223 = vector.shape_cast %222 : vector<1x48x72xbf16> to vector<48x72xbf16>
    %cst_224 = arith.constant dense<0.000000e+00> : vector<8x72xf32>
    %224 = tpu.matmul %221, %223, %cst_224 {dimension_numbers = #tpu.dot_dimension_numbers<[1], [0], [0], [1], [0, 0, 1, 1], [], []>} : vector<8x48xbf16>, vector<48x72xbf16>, vector<8x72xf32> -> vector<8x72xf32>
    %c7_225 = arith.constant 7 : index
    %c0_226 = arith.constant 0 : index
    %c0_227 = arith.constant 0 : index
    %225 = vector.load %arg1[%c7_225, %c0_226, %c0_227] : memref<16x8x48xbf16, #tpu.memory_space<vmem>>, vector<1x8x48xbf16>
    %226 = vector.shape_cast %225 : vector<1x8x48xbf16> to vector<8x48xbf16>
    %c0_228 = arith.constant 0 : index
    %c0_229 = arith.constant 0 : index
    %c0_230 = arith.constant 0 : index
    %227 = vector.load %arg2[%c0_228, %c0_229, %c0_230] : memref<5x48x72xbf16, #tpu.memory_space<vmem>>, vector<1x48x72xbf16>
    %228 = vector.shape_cast %227 : vector<1x48x72xbf16> to vector<48x72xbf16>
    %cst_231 = arith.constant dense<0.000000e+00> : vector<8x72xf32>
    %229 = tpu.matmul %226, %228, %cst_231 {dimension_numbers = #tpu.dot_dimension_numbers<[1], [0], [0], [1], [0, 0, 1, 1], [], []>} : vector<8x48xbf16>, vector<48x72xbf16>, vector<8x72xf32> -> vector<8x72xf32>
    %c7_232 = arith.constant 7 : index
    %c0_233 = arith.constant 0 : index
    %c0_234 = arith.constant 0 : index
    %230 = vector.load %arg1[%c7_232, %c0_233, %c0_234] : memref<16x8x48xbf16, #tpu.memory_space<vmem>>, vector<1x8x48xbf16>
    %231 = vector.shape_cast %230 : vector<1x8x48xbf16> to vector<8x48xbf16>
    %c1_235 = arith.constant 1 : index
    %c0_236 = arith.constant 0 : index
    %c0_237 = arith.constant 0 : index
    %232 = vector.load %arg2[%c1_235, %c0_236, %c0_237] : memref<5x48x72xbf16, #tpu.memory_space<vmem>>, vector<1x48x72xbf16>
    %233 = vector.shape_cast %232 : vector<1x48x72xbf16> to vector<48x72xbf16>
    %cst_238 = arith.constant dense<0.000000e+00> : vector<8x72xf32>
    %234 = tpu.matmul %231, %233, %cst_238 {dimension_numbers = #tpu.dot_dimension_numbers<[1], [0], [0], [1], [0, 0, 1, 1], [], []>} : vector<8x48xbf16>, vector<48x72xbf16>, vector<8x72xf32> -> vector<8x72xf32>
    %235 = arith.addf %224, %234 : vector<8x72xf32>
    %c8_239 = arith.constant 8 : index
    %c0_240 = arith.constant 0 : index
    %c0_241 = arith.constant 0 : index
    %236 = vector.load %arg1[%c8_239, %c0_240, %c0_241] : memref<16x8x48xbf16, #tpu.memory_space<vmem>>, vector<1x8x48xbf16>
    %237 = vector.shape_cast %236 : vector<1x8x48xbf16> to vector<8x48xbf16>
    %c1_242 = arith.constant 1 : index
    %c0_243 = arith.constant 0 : index
    %c0_244 = arith.constant 0 : index
    %238 = vector.load %arg2[%c1_242, %c0_243, %c0_244] : memref<5x48x72xbf16, #tpu.memory_space<vmem>>, vector<1x48x72xbf16>
    %239 = vector.shape_cast %238 : vector<1x48x72xbf16> to vector<48x72xbf16>
    %cst_245 = arith.constant dense<0.000000e+00> : vector<8x72xf32>
    %240 = tpu.matmul %237, %239, %cst_245 {dimension_numbers = #tpu.dot_dimension_numbers<[1], [0], [0], [1], [0, 0, 1, 1], [], []>} : vector<8x48xbf16>, vector<48x72xbf16>, vector<8x72xf32> -> vector<8x72xf32>
    %241 = arith.addf %229, %240 : vector<8x72xf32>
    %c8_246 = arith.constant 8 : index
    %c0_247 = arith.constant 0 : index
    %c0_248 = arith.constant 0 : index
    %242 = vector.load %arg1[%c8_246, %c0_247, %c0_248] : memref<16x8x48xbf16, #tpu.memory_space<vmem>>, vector<1x8x48xbf16>
    %243 = vector.shape_cast %242 : vector<1x8x48xbf16> to vector<8x48xbf16>
    %c2_249 = arith.constant 2 : index
    %c0_250 = arith.constant 0 : index
    %c0_251 = arith.constant 0 : index
    %244 = vector.load %arg2[%c2_249, %c0_250, %c0_251] : memref<5x48x72xbf16, #tpu.memory_space<vmem>>, vector<1x48x72xbf16>
    %245 = vector.shape_cast %244 : vector<1x48x72xbf16> to vector<48x72xbf16>
    %cst_252 = arith.constant dense<0.000000e+00> : vector<8x72xf32>
    %246 = tpu.matmul %243, %245, %cst_252 {dimension_numbers = #tpu.dot_dimension_numbers<[1], [0], [0], [1], [0, 0, 1, 1], [], []>} : vector<8x48xbf16>, vector<48x72xbf16>, vector<8x72xf32> -> vector<8x72xf32>
    %247 = arith.addf %235, %246 : vector<8x72xf32>
    %c9_253 = arith.constant 9 : index
    %c0_254 = arith.constant 0 : index
    %c0_255 = arith.constant 0 : index
    %248 = vector.load %arg1[%c9_253, %c0_254, %c0_255] : memref<16x8x48xbf16, #tpu.memory_space<vmem>>, vector<1x8x48xbf16>
    %249 = vector.shape_cast %248 : vector<1x8x48xbf16> to vector<8x48xbf16>
    %c2_256 = arith.constant 2 : index
    %c0_257 = arith.constant 0 : index
    %c0_258 = arith.constant 0 : index
    %250 = vector.load %arg2[%c2_256, %c0_257, %c0_258] : memref<5x48x72xbf16, #tpu.memory_space<vmem>>, vector<1x48x72xbf16>
    %251 = vector.shape_cast %250 : vector<1x48x72xbf16> to vector<48x72xbf16>
    %cst_259 = arith.constant dense<0.000000e+00> : vector<8x72xf32>
    %252 = tpu.matmul %249, %251, %cst_259 {dimension_numbers = #tpu.dot_dimension_numbers<[1], [0], [0], [1], [0, 0, 1, 1], [], []>} : vector<8x48xbf16>, vector<48x72xbf16>, vector<8x72xf32> -> vector<8x72xf32>
    %253 = arith.addf %241, %252 : vector<8x72xf32>
    %c9_260 = arith.constant 9 : index
    %c0_261 = arith.constant 0 : index
    %c0_262 = arith.constant 0 : index
    %254 = vector.load %arg1[%c9_260, %c0_261, %c0_262] : memref<16x8x48xbf16, #tpu.memory_space<vmem>>, vector<1x8x48xbf16>
    %255 = vector.shape_cast %254 : vector<1x8x48xbf16> to vector<8x48xbf16>
    %c3_263 = arith.constant 3 : index
    %c0_264 = arith.constant 0 : index
    %c0_265 = arith.constant 0 : index
    %256 = vector.load %arg2[%c3_263, %c0_264, %c0_265] : memref<5x48x72xbf16, #tpu.memory_space<vmem>>, vector<1x48x72xbf16>
    %257 = vector.shape_cast %256 : vector<1x48x72xbf16> to vector<48x72xbf16>
    %cst_266 = arith.constant dense<0.000000e+00> : vector<8x72xf32>
    %258 = tpu.matmul %255, %257, %cst_266 {dimension_numbers = #tpu.dot_dimension_numbers<[1], [0], [0], [1], [0, 0, 1, 1], [], []>} : vector<8x48xbf16>, vector<48x72xbf16>, vector<8x72xf32> -> vector<8x72xf32>
    %259 = arith.addf %247, %258 : vector<8x72xf32>
    %c10 = arith.constant 10 : index
    %c0_267 = arith.constant 0 : index
    %c0_268 = arith.constant 0 : index
    %260 = vector.load %arg1[%c10, %c0_267, %c0_268] : memref<16x8x48xbf16, #tpu.memory_space<vmem>>, vector<1x8x48xbf16>
    %261 = vector.shape_cast %260 : vector<1x8x48xbf16> to vector<8x48xbf16>
    %c3_269 = arith.constant 3 : index
    %c0_270 = arith.constant 0 : index
    %c0_271 = arith.constant 0 : index
    %262 = vector.load %arg2[%c3_269, %c0_270, %c0_271] : memref<5x48x72xbf16, #tpu.memory_space<vmem>>, vector<1x48x72xbf16>
    %263 = vector.shape_cast %262 : vector<1x48x72xbf16> to vector<48x72xbf16>
    %cst_272 = arith.constant dense<0.000000e+00> : vector<8x72xf32>
    %264 = tpu.matmul %261, %263, %cst_272 {dimension_numbers = #tpu.dot_dimension_numbers<[1], [0], [0], [1], [0, 0, 1, 1], [], []>} : vector<8x48xbf16>, vector<48x72xbf16>, vector<8x72xf32> -> vector<8x72xf32>
    %265 = arith.addf %253, %264 : vector<8x72xf32>
    %c10_273 = arith.constant 10 : index
    %c0_274 = arith.constant 0 : index
    %c0_275 = arith.constant 0 : index
    %266 = vector.load %arg1[%c10_273, %c0_274, %c0_275] : memref<16x8x48xbf16, #tpu.memory_space<vmem>>, vector<1x8x48xbf16>
    %267 = vector.shape_cast %266 : vector<1x8x48xbf16> to vector<8x48xbf16>
    %c4_276 = arith.constant 4 : index
    %c0_277 = arith.constant 0 : index
    %c0_278 = arith.constant 0 : index
    %268 = vector.load %arg2[%c4_276, %c0_277, %c0_278] : memref<5x48x72xbf16, #tpu.memory_space<vmem>>, vector<1x48x72xbf16>
    %269 = vector.shape_cast %268 : vector<1x48x72xbf16> to vector<48x72xbf16>
    %cst_279 = arith.constant dense<0.000000e+00> : vector<8x72xf32>
    %270 = tpu.matmul %267, %269, %cst_279 {dimension_numbers = #tpu.dot_dimension_numbers<[1], [0], [0], [1], [0, 0, 1, 1], [], []>} : vector<8x48xbf16>, vector<48x72xbf16>, vector<8x72xf32> -> vector<8x72xf32>
    %271 = arith.addf %259, %270 : vector<8x72xf32>
    %c11 = arith.constant 11 : index
    %c0_280 = arith.constant 0 : index
    %c0_281 = arith.constant 0 : index
    %272 = vector.load %arg1[%c11, %c0_280, %c0_281] : memref<16x8x48xbf16, #tpu.memory_space<vmem>>, vector<1x8x48xbf16>
    %273 = vector.shape_cast %272 : vector<1x8x48xbf16> to vector<8x48xbf16>
    %c4_282 = arith.constant 4 : index
    %c0_283 = arith.constant 0 : index
    %c0_284 = arith.constant 0 : index
    %274 = vector.load %arg2[%c4_282, %c0_283, %c0_284] : memref<5x48x72xbf16, #tpu.memory_space<vmem>>, vector<1x48x72xbf16>
    %275 = vector.shape_cast %274 : vector<1x48x72xbf16> to vector<48x72xbf16>
    %cst_285 = arith.constant dense<0.000000e+00> : vector<8x72xf32>
    %276 = tpu.matmul %273, %275, %cst_285 {dimension_numbers = #tpu.dot_dimension_numbers<[1], [0], [0], [1], [0, 0, 1, 1], [], []>} : vector<8x48xbf16>, vector<48x72xbf16>, vector<8x72xf32> -> vector<8x72xf32>
    %277 = arith.addf %265, %276 : vector<8x72xf32>
    %278 = arith.addf %271, %2 : vector<8x72xf32>
    %cst_286 = arith.constant 0.000000e+00 : f32
    %279 = vector.broadcast %cst_286 : f32 to vector<8x72xf32>
    %280 = arith.maximumf %278, %279 : vector<8x72xf32>
    %281 = arith.addf %277, %2 : vector<8x72xf32>
    %cst_287 = arith.constant 0.000000e+00 : f32
    %282 = vector.broadcast %cst_287 : f32 to vector<8x72xf32>
    %283 = arith.maximumf %281, %282 : vector<8x72xf32>
    %284 = arith.maximumf %280, %283 : vector<8x72xf32>
    %285 = vector.extract_strided_slice %284 {offsets = [0, 0], sizes = [8, 66], strides = [1, 1]} : vector<8x72xf32> to vector<8x66xf32>
    %286 = vector.extract_strided_slice %284 {offsets = [0, 6], sizes = [8, 66], strides = [1, 1]} : vector<8x72xf32> to vector<8x66xf32>
    %287 = arith.maximumf %285, %286 : vector<8x66xf32>
    %288 = arith.truncf %287 : vector<8x66xf32> to vector<8x66xbf16>
    %c3_288 = arith.constant 3 : index
    %c0_289 = arith.constant 0 : index
    %c0_290 = arith.constant 0 : index
    %289 = vector.load %arg13[%c3_288, %c0_289, %c0_290] : memref<6x8x66xbf16, #tpu.memory_space<vmem>>, vector<1x8x66xbf16>
    %290 = vector.shape_cast %289 : vector<1x8x66xbf16> to vector<8x66xbf16>
    %291 = vector.shape_cast %288 : vector<8x66xbf16> to vector<1x8x66xbf16>
    tpu.vector_store %arg13[%c3_288, %c0_289, %c0_290], %291 {strides = array<i32>} : memref<6x8x66xbf16, #tpu.memory_space<vmem>>, vector<1x8x66xbf16>,
    %c8_291 = arith.constant 8 : index
    %c0_292 = arith.constant 0 : index
    %c0_293 = arith.constant 0 : index
    %292 = vector.load %arg1[%c8_291, %c0_292, %c0_293] : memref<16x8x48xbf16, #tpu.memory_space<vmem>>, vector<1x8x48xbf16>
    %293 = vector.shape_cast %292 : vector<1x8x48xbf16> to vector<8x48xbf16>
    %c0_294 = arith.constant 0 : index
    %c0_295 = arith.constant 0 : index
    %c0_296 = arith.constant 0 : index
    %294 = vector.load %arg2[%c0_294, %c0_295, %c0_296] : memref<5x48x72xbf16, #tpu.memory_space<vmem>>, vector<1x48x72xbf16>
    %295 = vector.shape_cast %294 : vector<1x48x72xbf16> to vector<48x72xbf16>
    %cst_297 = arith.constant dense<0.000000e+00> : vector<8x72xf32>
    %296 = tpu.matmul %293, %295, %cst_297 {dimension_numbers = #tpu.dot_dimension_numbers<[1], [0], [0], [1], [0, 0, 1, 1], [], []>} : vector<8x48xbf16>, vector<48x72xbf16>, vector<8x72xf32> -> vector<8x72xf32>
    %c9_298 = arith.constant 9 : index
    %c0_299 = arith.constant 0 : index
    %c0_300 = arith.constant 0 : index
    %297 = vector.load %arg1[%c9_298, %c0_299, %c0_300] : memref<16x8x48xbf16, #tpu.memory_space<vmem>>, vector<1x8x48xbf16>
    %298 = vector.shape_cast %297 : vector<1x8x48xbf16> to vector<8x48xbf16>
    %c0_301 = arith.constant 0 : index
    %c0_302 = arith.constant 0 : index
    %c0_303 = arith.constant 0 : index
    %299 = vector.load %arg2[%c0_301, %c0_302, %c0_303] : memref<5x48x72xbf16, #tpu.memory_space<vmem>>, vector<1x48x72xbf16>
    %300 = vector.shape_cast %299 : vector<1x48x72xbf16> to vector<48x72xbf16>
    %cst_304 = arith.constant dense<0.000000e+00> : vector<8x72xf32>
    %301 = tpu.matmul %298, %300, %cst_304 {dimension_numbers = #tpu.dot_dimension_numbers<[1], [0], [0], [1], [0, 0, 1, 1], [], []>} : vector<8x48xbf16>, vector<48x72xbf16>, vector<8x72xf32> -> vector<8x72xf32>
    %c9_305 = arith.constant 9 : index
    %c0_306 = arith.constant 0 : index
    %c0_307 = arith.constant 0 : index
    %302 = vector.load %arg1[%c9_305, %c0_306, %c0_307] : memref<16x8x48xbf16, #tpu.memory_space<vmem>>, vector<1x8x48xbf16>
    %303 = vector.shape_cast %302 : vector<1x8x48xbf16> to vector<8x48xbf16>
    %c1_308 = arith.constant 1 : index
    %c0_309 = arith.constant 0 : index
    %c0_310 = arith.constant 0 : index
    %304 = vector.load %arg2[%c1_308, %c0_309, %c0_310] : memref<5x48x72xbf16, #tpu.memory_space<vmem>>, vector<1x48x72xbf16>
    %305 = vector.shape_cast %304 : vector<1x48x72xbf16> to vector<48x72xbf16>
    %cst_311 = arith.constant dense<0.000000e+00> : vector<8x72xf32>
    %306 = tpu.matmul %303, %305, %cst_311 {dimension_numbers = #tpu.dot_dimension_numbers<[1], [0], [0], [1], [0, 0, 1, 1], [], []>} : vector<8x48xbf16>, vector<48x72xbf16>, vector<8x72xf32> -> vector<8x72xf32>
    %307 = arith.addf %296, %306 : vector<8x72xf32>
    %c10_312 = arith.constant 10 : index
    %c0_313 = arith.constant 0 : index
    %c0_314 = arith.constant 0 : index
    %308 = vector.load %arg1[%c10_312, %c0_313, %c0_314] : memref<16x8x48xbf16, #tpu.memory_space<vmem>>, vector<1x8x48xbf16>
    %309 = vector.shape_cast %308 : vector<1x8x48xbf16> to vector<8x48xbf16>
    %c1_315 = arith.constant 1 : index
    %c0_316 = arith.constant 0 : index
    %c0_317 = arith.constant 0 : index
    %310 = vector.load %arg2[%c1_315, %c0_316, %c0_317] : memref<5x48x72xbf16, #tpu.memory_space<vmem>>, vector<1x48x72xbf16>
    %311 = vector.shape_cast %310 : vector<1x48x72xbf16> to vector<48x72xbf16>
    %cst_318 = arith.constant dense<0.000000e+00> : vector<8x72xf32>
    %312 = tpu.matmul %309, %311, %cst_318 {dimension_numbers = #tpu.dot_dimension_numbers<[1], [0], [0], [1], [0, 0, 1, 1], [], []>} : vector<8x48xbf16>, vector<48x72xbf16>, vector<8x72xf32> -> vector<8x72xf32>
    %313 = arith.addf %301, %312 : vector<8x72xf32>
    %c10_319 = arith.constant 10 : index
    %c0_320 = arith.constant 0 : index
    %c0_321 = arith.constant 0 : index
    %314 = vector.load %arg1[%c10_319, %c0_320, %c0_321] : memref<16x8x48xbf16, #tpu.memory_space<vmem>>, vector<1x8x48xbf16>
    %315 = vector.shape_cast %314 : vector<1x8x48xbf16> to vector<8x48xbf16>
    %c2_322 = arith.constant 2 : index
    %c0_323 = arith.constant 0 : index
    %c0_324 = arith.constant 0 : index
    %316 = vector.load %arg2[%c2_322, %c0_323, %c0_324] : memref<5x48x72xbf16, #tpu.memory_space<vmem>>, vector<1x48x72xbf16>
    %317 = vector.shape_cast %316 : vector<1x48x72xbf16> to vector<48x72xbf16>
    %cst_325 = arith.constant dense<0.000000e+00> : vector<8x72xf32>
    %318 = tpu.matmul %315, %317, %cst_325 {dimension_numbers = #tpu.dot_dimension_numbers<[1], [0], [0], [1], [0, 0, 1, 1], [], []>} : vector<8x48xbf16>, vector<48x72xbf16>, vector<8x72xf32> -> vector<8x72xf32>
    %319 = arith.addf %307, %318 : vector<8x72xf32>
    %c11_326 = arith.constant 11 : index
    %c0_327 = arith.constant 0 : index
    %c0_328 = arith.constant 0 : index
    %320 = vector.load %arg1[%c11_326, %c0_327, %c0_328] : memref<16x8x48xbf16, #tpu.memory_space<vmem>>, vector<1x8x48xbf16>
    %321 = vector.shape_cast %320 : vector<1x8x48xbf16> to vector<8x48xbf16>
    %c2_329 = arith.constant 2 : index
    %c0_330 = arith.constant 0 : index
    %c0_331 = arith.constant 0 : index
    %322 = vector.load %arg2[%c2_329, %c0_330, %c0_331] : memref<5x48x72xbf16, #tpu.memory_space<vmem>>, vector<1x48x72xbf16>
    %323 = vector.shape_cast %322 : vector<1x48x72xbf16> to vector<48x72xbf16>
    %cst_332 = arith.constant dense<0.000000e+00> : vector<8x72xf32>
    %324 = tpu.matmul %321, %323, %cst_332 {dimension_numbers = #tpu.dot_dimension_numbers<[1], [0], [0], [1], [0, 0, 1, 1], [], []>} : vector<8x48xbf16>, vector<48x72xbf16>, vector<8x72xf32> -> vector<8x72xf32>
    %325 = arith.addf %313, %324 : vector<8x72xf32>
    %c11_333 = arith.constant 11 : index
    %c0_334 = arith.constant 0 : index
    %c0_335 = arith.constant 0 : index
    %326 = vector.load %arg1[%c11_333, %c0_334, %c0_335] : memref<16x8x48xbf16, #tpu.memory_space<vmem>>, vector<1x8x48xbf16>
    %327 = vector.shape_cast %326 : vector<1x8x48xbf16> to vector<8x48xbf16>
    %c3_336 = arith.constant 3 : index
    %c0_337 = arith.constant 0 : index
    %c0_338 = arith.constant 0 : index
    %328 = vector.load %arg2[%c3_336, %c0_337, %c0_338] : memref<5x48x72xbf16, #tpu.memory_space<vmem>>, vector<1x48x72xbf16>
    %329 = vector.shape_cast %328 : vector<1x48x72xbf16> to vector<48x72xbf16>
    %cst_339 = arith.constant dense<0.000000e+00> : vector<8x72xf32>
    %330 = tpu.matmul %327, %329, %cst_339 {dimension_numbers = #tpu.dot_dimension_numbers<[1], [0], [0], [1], [0, 0, 1, 1], [], []>} : vector<8x48xbf16>, vector<48x72xbf16>, vector<8x72xf32> -> vector<8x72xf32>
    %331 = arith.addf %319, %330 : vector<8x72xf32>
    %c12 = arith.constant 12 : index
    %c0_340 = arith.constant 0 : index
    %c0_341 = arith.constant 0 : index
    %332 = vector.load %arg1[%c12, %c0_340, %c0_341] : memref<16x8x48xbf16, #tpu.memory_space<vmem>>, vector<1x8x48xbf16>
    %333 = vector.shape_cast %332 : vector<1x8x48xbf16> to vector<8x48xbf16>
    %c3_342 = arith.constant 3 : index
    %c0_343 = arith.constant 0 : index
    %c0_344 = arith.constant 0 : index
    %334 = vector.load %arg2[%c3_342, %c0_343, %c0_344] : memref<5x48x72xbf16, #tpu.memory_space<vmem>>, vector<1x48x72xbf16>
    %335 = vector.shape_cast %334 : vector<1x48x72xbf16> to vector<48x72xbf16>
    %cst_345 = arith.constant dense<0.000000e+00> : vector<8x72xf32>
    %336 = tpu.matmul %333, %335, %cst_345 {dimension_numbers = #tpu.dot_dimension_numbers<[1], [0], [0], [1], [0, 0, 1, 1], [], []>} : vector<8x48xbf16>, vector<48x72xbf16>, vector<8x72xf32> -> vector<8x72xf32>
    %337 = arith.addf %325, %336 : vector<8x72xf32>
    %c12_346 = arith.constant 12 : index
    %c0_347 = arith.constant 0 : index
    %c0_348 = arith.constant 0 : index
    %338 = vector.load %arg1[%c12_346, %c0_347, %c0_348] : memref<16x8x48xbf16, #tpu.memory_space<vmem>>, vector<1x8x48xbf16>
    %339 = vector.shape_cast %338 : vector<1x8x48xbf16> to vector<8x48xbf16>
    %c4_349 = arith.constant 4 : index
    %c0_350 = arith.constant 0 : index
    %c0_351 = arith.constant 0 : index
    %340 = vector.load %arg2[%c4_349, %c0_350, %c0_351] : memref<5x48x72xbf16, #tpu.memory_space<vmem>>, vector<1x48x72xbf16>
    %341 = vector.shape_cast %340 : vector<1x48x72xbf16> to vector<48x72xbf16>
    %cst_352 = arith.constant dense<0.000000e+00> : vector<8x72xf32>
    %342 = tpu.matmul %339, %341, %cst_352 {dimension_numbers = #tpu.dot_dimension_numbers<[1], [0], [0], [1], [0, 0, 1, 1], [], []>} : vector<8x48xbf16>, vector<48x72xbf16>, vector<8x72xf32> -> vector<8x72xf32>
    %343 = arith.addf %331, %342 : vector<8x72xf32>
    %c13 = arith.constant 13 : index
    %c0_353 = arith.constant 0 : index
    %c0_354 = arith.constant 0 : index
    %344 = vector.load %arg1[%c13, %c0_353, %c0_354] : memref<16x8x48xbf16, #tpu.memory_space<vmem>>, vector<1x8x48xbf16>
    %345 = vector.shape_cast %344 : vector<1x8x48xbf16> to vector<8x48xbf16>
    %c4_355 = arith.constant 4 : index
    %c0_356 = arith.constant 0 : index
    %c0_357 = arith.constant 0 : index
    %346 = vector.load %arg2[%c4_355, %c0_356, %c0_357] : memref<5x48x72xbf16, #tpu.memory_space<vmem>>, vector<1x48x72xbf16>
    %347 = vector.shape_cast %346 : vector<1x48x72xbf16> to vector<48x72xbf16>
    %cst_358 = arith.constant dense<0.000000e+00> : vector<8x72xf32>
    %348 = tpu.matmul %345, %347, %cst_358 {dimension_numbers = #tpu.dot_dimension_numbers<[1], [0], [0], [1], [0, 0, 1, 1], [], []>} : vector<8x48xbf16>, vector<48x72xbf16>, vector<8x72xf32> -> vector<8x72xf32>
    %349 = arith.addf %337, %348 : vector<8x72xf32>
    %350 = arith.addf %343, %2 : vector<8x72xf32>
    %cst_359 = arith.constant 0.000000e+00 : f32
    %351 = vector.broadcast %cst_359 : f32 to vector<8x72xf32>
    %352 = arith.maximumf %350, %351 : vector<8x72xf32>
    %353 = arith.addf %349, %2 : vector<8x72xf32>
    %cst_360 = arith.constant 0.000000e+00 : f32
    %354 = vector.broadcast %cst_360 : f32 to vector<8x72xf32>
    %355 = arith.maximumf %353, %354 : vector<8x72xf32>
    %356 = arith.maximumf %352, %355 : vector<8x72xf32>
    %357 = vector.extract_strided_slice %356 {offsets = [0, 0], sizes = [8, 66], strides = [1, 1]} : vector<8x72xf32> to vector<8x66xf32>
    %358 = vector.extract_strided_slice %356 {offsets = [0, 6], sizes = [8, 66], strides = [1, 1]} : vector<8x72xf32> to vector<8x66xf32>
    %359 = arith.maximumf %357, %358 : vector<8x66xf32>
    %360 = arith.truncf %359 : vector<8x66xf32> to vector<8x66xbf16>
    %c4_361 = arith.constant 4 : index
    %c0_362 = arith.constant 0 : index
    %c0_363 = arith.constant 0 : index
    %361 = vector.load %arg13[%c4_361, %c0_362, %c0_363] : memref<6x8x66xbf16, #tpu.memory_space<vmem>>, vector<1x8x66xbf16>
    %362 = vector.shape_cast %361 : vector<1x8x66xbf16> to vector<8x66xbf16>
    %363 = vector.shape_cast %360 : vector<8x66xbf16> to vector<1x8x66xbf16>
    tpu.vector_store %arg13[%c4_361, %c0_362, %c0_363], %363 {strides = array<i32>} : memref<6x8x66xbf16, #tpu.memory_space<vmem>>, vector<1x8x66xbf16>,
    %c10_364 = arith.constant 10 : index
    %c0_365 = arith.constant 0 : index
    %c0_366 = arith.constant 0 : index
    %364 = vector.load %arg1[%c10_364, %c0_365, %c0_366] : memref<16x8x48xbf16, #tpu.memory_space<vmem>>, vector<1x8x48xbf16>
    %365 = vector.shape_cast %364 : vector<1x8x48xbf16> to vector<8x48xbf16>
    %c0_367 = arith.constant 0 : index
    %c0_368 = arith.constant 0 : index
    %c0_369 = arith.constant 0 : index
    %366 = vector.load %arg2[%c0_367, %c0_368, %c0_369] : memref<5x48x72xbf16, #tpu.memory_space<vmem>>, vector<1x48x72xbf16>
    %367 = vector.shape_cast %366 : vector<1x48x72xbf16> to vector<48x72xbf16>
    %cst_370 = arith.constant dense<0.000000e+00> : vector<8x72xf32>
    %368 = tpu.matmul %365, %367, %cst_370 {dimension_numbers = #tpu.dot_dimension_numbers<[1], [0], [0], [1], [0, 0, 1, 1], [], []>} : vector<8x48xbf16>, vector<48x72xbf16>, vector<8x72xf32> -> vector<8x72xf32>
    %c11_371 = arith.constant 11 : index
    %c0_372 = arith.constant 0 : index
    %c0_373 = arith.constant 0 : index
    %369 = vector.load %arg1[%c11_371, %c0_372, %c0_373] : memref<16x8x48xbf16, #tpu.memory_space<vmem>>, vector<1x8x48xbf16>
    %370 = vector.shape_cast %369 : vector<1x8x48xbf16> to vector<8x48xbf16>
    %c0_374 = arith.constant 0 : index
    %c0_375 = arith.constant 0 : index
    %c0_376 = arith.constant 0 : index
    %371 = vector.load %arg2[%c0_374, %c0_375, %c0_376] : memref<5x48x72xbf16, #tpu.memory_space<vmem>>, vector<1x48x72xbf16>
    %372 = vector.shape_cast %371 : vector<1x48x72xbf16> to vector<48x72xbf16>
    %cst_377 = arith.constant dense<0.000000e+00> : vector<8x72xf32>
    %373 = tpu.matmul %370, %372, %cst_377 {dimension_numbers = #tpu.dot_dimension_numbers<[1], [0], [0], [1], [0, 0, 1, 1], [], []>} : vector<8x48xbf16>, vector<48x72xbf16>, vector<8x72xf32> -> vector<8x72xf32>
    %c11_378 = arith.constant 11 : index
    %c0_379 = arith.constant 0 : index
    %c0_380 = arith.constant 0 : index
    %374 = vector.load %arg1[%c11_378, %c0_379, %c0_380] : memref<16x8x48xbf16, #tpu.memory_space<vmem>>, vector<1x8x48xbf16>
    %375 = vector.shape_cast %374 : vector<1x8x48xbf16> to vector<8x48xbf16>
    %c1_381 = arith.constant 1 : index
    %c0_382 = arith.constant 0 : index
    %c0_383 = arith.constant 0 : index
    %376 = vector.load %arg2[%c1_381, %c0_382, %c0_383] : memref<5x48x72xbf16, #tpu.memory_space<vmem>>, vector<1x48x72xbf16>
    %377 = vector.shape_cast %376 : vector<1x48x72xbf16> to vector<48x72xbf16>
    %cst_384 = arith.constant dense<0.000000e+00> : vector<8x72xf32>
    %378 = tpu.matmul %375, %377, %cst_384 {dimension_numbers = #tpu.dot_dimension_numbers<[1], [0], [0], [1], [0, 0, 1, 1], [], []>} : vector<8x48xbf16>, vector<48x72xbf16>, vector<8x72xf32> -> vector<8x72xf32>
    %379 = arith.addf %368, %378 : vector<8x72xf32>
    %c12_385 = arith.constant 12 : index
    %c0_386 = arith.constant 0 : index
    %c0_387 = arith.constant 0 : index
    %380 = vector.load %arg1[%c12_385, %c0_386, %c0_387] : memref<16x8x48xbf16, #tpu.memory_space<vmem>>, vector<1x8x48xbf16>
    %381 = vector.shape_cast %380 : vector<1x8x48xbf16> to vector<8x48xbf16>
    %c1_388 = arith.constant 1 : index
    %c0_389 = arith.constant 0 : index
    %c0_390 = arith.constant 0 : index
    %382 = vector.load %arg2[%c1_388, %c0_389, %c0_390] : memref<5x48x72xbf16, #tpu.memory_space<vmem>>, vector<1x48x72xbf16>
    %383 = vector.shape_cast %382 : vector<1x48x72xbf16> to vector<48x72xbf16>
    %cst_391 = arith.constant dense<0.000000e+00> : vector<8x72xf32>
    %384 = tpu.matmul %381, %383, %cst_391 {dimension_numbers = #tpu.dot_dimension_numbers<[1], [0], [0], [1], [0, 0, 1, 1], [], []>} : vector<8x48xbf16>, vector<48x72xbf16>, vector<8x72xf32> -> vector<8x72xf32>
    %385 = arith.addf %373, %384 : vector<8x72xf32>
    %c12_392 = arith.constant 12 : index
    %c0_393 = arith.constant 0 : index
    %c0_394 = arith.constant 0 : index
    %386 = vector.load %arg1[%c12_392, %c0_393, %c0_394] : memref<16x8x48xbf16, #tpu.memory_space<vmem>>, vector<1x8x48xbf16>
    %387 = vector.shape_cast %386 : vector<1x8x48xbf16> to vector<8x48xbf16>
    %c2_395 = arith.constant 2 : index
    %c0_396 = arith.constant 0 : index
    %c0_397 = arith.constant 0 : index
    %388 = vector.load %arg2[%c2_395, %c0_396, %c0_397] : memref<5x48x72xbf16, #tpu.memory_space<vmem>>, vector<1x48x72xbf16>
    %389 = vector.shape_cast %388 : vector<1x48x72xbf16> to vector<48x72xbf16>
    %cst_398 = arith.constant dense<0.000000e+00> : vector<8x72xf32>
    %390 = tpu.matmul %387, %389, %cst_398 {dimension_numbers = #tpu.dot_dimension_numbers<[1], [0], [0], [1], [0, 0, 1, 1], [], []>} : vector<8x48xbf16>, vector<48x72xbf16>, vector<8x72xf32> -> vector<8x72xf32>
    %391 = arith.addf %379, %390 : vector<8x72xf32>
    %c13_399 = arith.constant 13 : index
    %c0_400 = arith.constant 0 : index
    %c0_401 = arith.constant 0 : index
    %392 = vector.load %arg1[%c13_399, %c0_400, %c0_401] : memref<16x8x48xbf16, #tpu.memory_space<vmem>>, vector<1x8x48xbf16>
    %393 = vector.shape_cast %392 : vector<1x8x48xbf16> to vector<8x48xbf16>
    %c2_402 = arith.constant 2 : index
    %c0_403 = arith.constant 0 : index
    %c0_404 = arith.constant 0 : index
    %394 = vector.load %arg2[%c2_402, %c0_403, %c0_404] : memref<5x48x72xbf16, #tpu.memory_space<vmem>>, vector<1x48x72xbf16>
    %395 = vector.shape_cast %394 : vector<1x48x72xbf16> to vector<48x72xbf16>
    %cst_405 = arith.constant dense<0.000000e+00> : vector<8x72xf32>
    %396 = tpu.matmul %393, %395, %cst_405 {dimension_numbers = #tpu.dot_dimension_numbers<[1], [0], [0], [1], [0, 0, 1, 1], [], []>} : vector<8x48xbf16>, vector<48x72xbf16>, vector<8x72xf32> -> vector<8x72xf32>
    %397 = arith.addf %385, %396 : vector<8x72xf32>
    %c13_406 = arith.constant 13 : index
    %c0_407 = arith.constant 0 : index
    %c0_408 = arith.constant 0 : index
    %398 = vector.load %arg1[%c13_406, %c0_407, %c0_408] : memref<16x8x48xbf16, #tpu.memory_space<vmem>>, vector<1x8x48xbf16>
    %399 = vector.shape_cast %398 : vector<1x8x48xbf16> to vector<8x48xbf16>
    %c3_409 = arith.constant 3 : index
    %c0_410 = arith.constant 0 : index
    %c0_411 = arith.constant 0 : index
    %400 = vector.load %arg2[%c3_409, %c0_410, %c0_411] : memref<5x48x72xbf16, #tpu.memory_space<vmem>>, vector<1x48x72xbf16>
    %401 = vector.shape_cast %400 : vector<1x48x72xbf16> to vector<48x72xbf16>
    %cst_412 = arith.constant dense<0.000000e+00> : vector<8x72xf32>
    %402 = tpu.matmul %399, %401, %cst_412 {dimension_numbers = #tpu.dot_dimension_numbers<[1], [0], [0], [1], [0, 0, 1, 1], [], []>} : vector<8x48xbf16>, vector<48x72xbf16>, vector<8x72xf32> -> vector<8x72xf32>
    %403 = arith.addf %391, %402 : vector<8x72xf32>
    %c14 = arith.constant 14 : index
    %c0_413 = arith.constant 0 : index
    %c0_414 = arith.constant 0 : index
    %404 = vector.load %arg1[%c14, %c0_413, %c0_414] : memref<16x8x48xbf16, #tpu.memory_space<vmem>>, vector<1x8x48xbf16>
    %405 = vector.shape_cast %404 : vector<1x8x48xbf16> to vector<8x48xbf16>
    %c3_415 = arith.constant 3 : index
    %c0_416 = arith.constant 0 : index
    %c0_417 = arith.constant 0 : index
    %406 = vector.load %arg2[%c3_415, %c0_416, %c0_417] : memref<5x48x72xbf16, #tpu.memory_space<vmem>>, vector<1x48x72xbf16>
    %407 = vector.shape_cast %406 : vector<1x48x72xbf16> to vector<48x72xbf16>
    %cst_418 = arith.constant dense<0.000000e+00> : vector<8x72xf32>
    %408 = tpu.matmul %405, %407, %cst_418 {dimension_numbers = #tpu.dot_dimension_numbers<[1], [0], [0], [1], [0, 0, 1, 1], [], []>} : vector<8x48xbf16>, vector<48x72xbf16>, vector<8x72xf32> -> vector<8x72xf32>
    %409 = arith.addf %397, %408 : vector<8x72xf32>
    %c14_419 = arith.constant 14 : index
    %c0_420 = arith.constant 0 : index
    %c0_421 = arith.constant 0 : index
    %410 = vector.load %arg1[%c14_419, %c0_420, %c0_421] : memref<16x8x48xbf16, #tpu.memory_space<vmem>>, vector<1x8x48xbf16>
    %411 = vector.shape_cast %410 : vector<1x8x48xbf16> to vector<8x48xbf16>
    %c4_422 = arith.constant 4 : index
    %c0_423 = arith.constant 0 : index
    %c0_424 = arith.constant 0 : index
    %412 = vector.load %arg2[%c4_422, %c0_423, %c0_424] : memref<5x48x72xbf16, #tpu.memory_space<vmem>>, vector<1x48x72xbf16>
    %413 = vector.shape_cast %412 : vector<1x48x72xbf16> to vector<48x72xbf16>
    %cst_425 = arith.constant dense<0.000000e+00> : vector<8x72xf32>
    %414 = tpu.matmul %411, %413, %cst_425 {dimension_numbers = #tpu.dot_dimension_numbers<[1], [0], [0], [1], [0, 0, 1, 1], [], []>} : vector<8x48xbf16>, vector<48x72xbf16>, vector<8x72xf32> -> vector<8x72xf32>
    %415 = arith.addf %403, %414 : vector<8x72xf32>
    %c15 = arith.constant 15 : index
    %c0_426 = arith.constant 0 : index
    %c0_427 = arith.constant 0 : index
    %416 = vector.load %arg1[%c15, %c0_426, %c0_427] : memref<16x8x48xbf16, #tpu.memory_space<vmem>>, vector<1x8x48xbf16>
    %417 = vector.shape_cast %416 : vector<1x8x48xbf16> to vector<8x48xbf16>
    %c4_428 = arith.constant 4 : index
    %c0_429 = arith.constant 0 : index
    %c0_430 = arith.constant 0 : index
    %418 = vector.load %arg2[%c4_428, %c0_429, %c0_430] : memref<5x48x72xbf16, #tpu.memory_space<vmem>>, vector<1x48x72xbf16>
    %419 = vector.shape_cast %418 : vector<1x48x72xbf16> to vector<48x72xbf16>
    %cst_431 = arith.constant dense<0.000000e+00> : vector<8x72xf32>
    %420 = tpu.matmul %417, %419, %cst_431 {dimension_numbers = #tpu.dot_dimension_numbers<[1], [0], [0], [1], [0, 0, 1, 1], [], []>} : vector<8x48xbf16>, vector<48x72xbf16>, vector<8x72xf32> -> vector<8x72xf32>
    %421 = arith.addf %409, %420 : vector<8x72xf32>
    %422 = arith.addf %415, %2 : vector<8x72xf32>
    %cst_432 = arith.constant 0.000000e+00 : f32
    %423 = vector.broadcast %cst_432 : f32 to vector<8x72xf32>
    %424 = arith.maximumf %422, %423 : vector<8x72xf32>
    %425 = arith.addf %421, %2 : vector<8x72xf32>
    %cst_433 = arith.constant 0.000000e+00 : f32
    %426 = vector.broadcast %cst_433 : f32 to vector<8x72xf32>
    %427 = arith.maximumf %425, %426 : vector<8x72xf32>
    %428 = arith.maximumf %424, %427 : vector<8x72xf32>
    %429 = vector.extract_strided_slice %428 {offsets = [0, 0], sizes = [8, 66], strides = [1, 1]} : vector<8x72xf32> to vector<8x66xf32>
    %430 = vector.extract_strided_slice %428 {offsets = [0, 6], sizes = [8, 66], strides = [1, 1]} : vector<8x72xf32> to vector<8x66xf32>
    %431 = arith.maximumf %429, %430 : vector<8x66xf32>
    %432 = arith.truncf %431 : vector<8x66xf32> to vector<8x66xbf16>
    %c5_434 = arith.constant 5 : index
    %c0_435 = arith.constant 0 : index
    %c0_436 = arith.constant 0 : index
    %433 = vector.load %arg13[%c5_434, %c0_435, %c0_436] : memref<6x8x66xbf16, #tpu.memory_space<vmem>>, vector<1x8x66xbf16>
    %434 = vector.shape_cast %433 : vector<1x8x66xbf16> to vector<8x66xbf16>
    %435 = vector.shape_cast %432 : vector<8x66xbf16> to vector<1x8x66xbf16>
    tpu.vector_store %arg13[%c5_434, %c0_435, %c0_436], %435 {strides = array<i32>} : memref<6x8x66xbf16, #tpu.memory_space<vmem>>, vector<1x8x66xbf16>,
    %c0_437 = arith.constant 0 : index
    %c0_438 = arith.constant 0 : index
    %c0_439 = arith.constant 0 : index
    %436 = vector.load %arg13[%c0_437, %c0_438, %c0_439] : memref<6x8x66xbf16, #tpu.memory_space<vmem>>, vector<1x8x66xbf16>
    %437 = vector.shape_cast %436 : vector<1x8x66xbf16> to vector<8x66xbf16>
    %c0_440 = arith.constant 0 : index
    %c0_441 = arith.constant 0 : index
    %c0_442 = arith.constant 0 : index
    %438 = vector.load %arg4[%c0_440, %c0_441, %c0_442] : memref<5x66x260xbf16, #tpu.memory_space<vmem>>, vector<1x66x260xbf16>
    %439 = vector.shape_cast %438 : vector<1x66x260xbf16> to vector<66x260xbf16>
    %cst_443 = arith.constant dense<0.000000e+00> : vector<8x260xf32>
    %440 = tpu.matmul %437, %439, %cst_443 {dimension_numbers = #tpu.dot_dimension_numbers<[1], [0], [0], [1], [0, 0, 1, 1], [], []>} : vector<8x66xbf16>, vector<66x260xbf16>, vector<8x260xf32> -> vector<8x260xf32>
    %c1_444 = arith.constant 1 : index
    %c0_445 = arith.constant 0 : index
    %c0_446 = arith.constant 0 : index
    %441 = vector.load %arg13[%c1_444, %c0_445, %c0_446] : memref<6x8x66xbf16, #tpu.memory_space<vmem>>, vector<1x8x66xbf16>
    %442 = vector.shape_cast %441 : vector<1x8x66xbf16> to vector<8x66xbf16>
    %c1_447 = arith.constant 1 : index
    %c0_448 = arith.constant 0 : index
    %c0_449 = arith.constant 0 : index
    %443 = vector.load %arg4[%c1_447, %c0_448, %c0_449] : memref<5x66x260xbf16, #tpu.memory_space<vmem>>, vector<1x66x260xbf16>
    %444 = vector.shape_cast %443 : vector<1x66x260xbf16> to vector<66x260xbf16>
    %cst_450 = arith.constant dense<0.000000e+00> : vector<8x260xf32>
    %445 = tpu.matmul %442, %444, %cst_450 {dimension_numbers = #tpu.dot_dimension_numbers<[1], [0], [0], [1], [0, 0, 1, 1], [], []>} : vector<8x66xbf16>, vector<66x260xbf16>, vector<8x260xf32> -> vector<8x260xf32>
    %446 = arith.addf %440, %445 : vector<8x260xf32>
    %c2_451 = arith.constant 2 : index
    %c0_452 = arith.constant 0 : index
    %c0_453 = arith.constant 0 : index
    %447 = vector.load %arg13[%c2_451, %c0_452, %c0_453] : memref<6x8x66xbf16, #tpu.memory_space<vmem>>, vector<1x8x66xbf16>
    %448 = vector.shape_cast %447 : vector<1x8x66xbf16> to vector<8x66xbf16>
    %c2_454 = arith.constant 2 : index
    %c0_455 = arith.constant 0 : index
    %c0_456 = arith.constant 0 : index
    %449 = vector.load %arg4[%c2_454, %c0_455, %c0_456] : memref<5x66x260xbf16, #tpu.memory_space<vmem>>, vector<1x66x260xbf16>
    %450 = vector.shape_cast %449 : vector<1x66x260xbf16> to vector<66x260xbf16>
    %cst_457 = arith.constant dense<0.000000e+00> : vector<8x260xf32>
    %451 = tpu.matmul %448, %450, %cst_457 {dimension_numbers = #tpu.dot_dimension_numbers<[1], [0], [0], [1], [0, 0, 1, 1], [], []>} : vector<8x66xbf16>, vector<66x260xbf16>, vector<8x260xf32> -> vector<8x260xf32>
    %452 = arith.addf %446, %451 : vector<8x260xf32>
    %c3_458 = arith.constant 3 : index
    %c0_459 = arith.constant 0 : index
    %c0_460 = arith.constant 0 : index
    %453 = vector.load %arg13[%c3_458, %c0_459, %c0_460] : memref<6x8x66xbf16, #tpu.memory_space<vmem>>, vector<1x8x66xbf16>
    %454 = vector.shape_cast %453 : vector<1x8x66xbf16> to vector<8x66xbf16>
    %c3_461 = arith.constant 3 : index
    %c0_462 = arith.constant 0 : index
    %c0_463 = arith.constant 0 : index
    %455 = vector.load %arg4[%c3_461, %c0_462, %c0_463] : memref<5x66x260xbf16, #tpu.memory_space<vmem>>, vector<1x66x260xbf16>
    %456 = vector.shape_cast %455 : vector<1x66x260xbf16> to vector<66x260xbf16>
    %cst_464 = arith.constant dense<0.000000e+00> : vector<8x260xf32>
    %457 = tpu.matmul %454, %456, %cst_464 {dimension_numbers = #tpu.dot_dimension_numbers<[1], [0], [0], [1], [0, 0, 1, 1], [], []>} : vector<8x66xbf16>, vector<66x260xbf16>, vector<8x260xf32> -> vector<8x260xf32>
    %458 = arith.addf %452, %457 : vector<8x260xf32>
    %c4_465 = arith.constant 4 : index
    %c0_466 = arith.constant 0 : index
    %c0_467 = arith.constant 0 : index
    %459 = vector.load %arg13[%c4_465, %c0_466, %c0_467] : memref<6x8x66xbf16, #tpu.memory_space<vmem>>, vector<1x8x66xbf16>
    %460 = vector.shape_cast %459 : vector<1x8x66xbf16> to vector<8x66xbf16>
    %c4_468 = arith.constant 4 : index
    %c0_469 = arith.constant 0 : index
    %c0_470 = arith.constant 0 : index
    %461 = vector.load %arg4[%c4_468, %c0_469, %c0_470] : memref<5x66x260xbf16, #tpu.memory_space<vmem>>, vector<1x66x260xbf16>
    %462 = vector.shape_cast %461 : vector<1x66x260xbf16> to vector<66x260xbf16>
    %cst_471 = arith.constant dense<0.000000e+00> : vector<8x260xf32>
    %463 = tpu.matmul %460, %462, %cst_471 {dimension_numbers = #tpu.dot_dimension_numbers<[1], [0], [0], [1], [0, 0, 1, 1], [], []>} : vector<8x66xbf16>, vector<66x260xbf16>, vector<8x260xf32> -> vector<8x260xf32>
    %464 = arith.addf %458, %463 : vector<8x260xf32>
    %465 = vector.broadcast %3 : vector<1x260xf32> to vector<8x260xf32>
    %466 = arith.addf %464, %465 : vector<8x260xf32>
    %cst_472 = arith.constant 0.000000e+00 : f32
    %467 = vector.broadcast %cst_472 : f32 to vector<8x260xf32>
    %468 = arith.maximumf %466, %467 : vector<8x260xf32>
    %469 = arith.truncf %468 : vector<8x260xf32> to vector<8x260xbf16>
    %c0_473 = arith.constant 0 : index
    %c0_474 = arith.constant 0 : index
    %c0_475 = arith.constant 0 : index
    %470 = vector.load %arg14[%c0_473, %c0_474, %c0_475] : memref<2x8x260xbf16, #tpu.memory_space<vmem>>, vector<1x8x260xbf16>
    %471 = vector.shape_cast %470 : vector<1x8x260xbf16> to vector<8x260xbf16>
    %472 = vector.shape_cast %469 : vector<8x260xbf16> to vector<1x8x260xbf16>
    tpu.vector_store %arg14[%c0_473, %c0_474, %c0_475], %472 {strides = array<i32>} : memref<2x8x260xbf16, #tpu.memory_space<vmem>>, vector<1x8x260xbf16>,
    %c1_476 = arith.constant 1 : index
    %c0_477 = arith.constant 0 : index
    %c0_478 = arith.constant 0 : index
    %473 = vector.load %arg13[%c1_476, %c0_477, %c0_478] : memref<6x8x66xbf16, #tpu.memory_space<vmem>>, vector<1x8x66xbf16>
    %474 = vector.shape_cast %473 : vector<1x8x66xbf16> to vector<8x66xbf16>
    %c0_479 = arith.constant 0 : index
    %c0_480 = arith.constant 0 : index
    %c0_481 = arith.constant 0 : index
    %475 = vector.load %arg4[%c0_479, %c0_480, %c0_481] : memref<5x66x260xbf16, #tpu.memory_space<vmem>>, vector<1x66x260xbf16>
    %476 = vector.shape_cast %475 : vector<1x66x260xbf16> to vector<66x260xbf16>
    %cst_482 = arith.constant dense<0.000000e+00> : vector<8x260xf32>
    %477 = tpu.matmul %474, %476, %cst_482 {dimension_numbers = #tpu.dot_dimension_numbers<[1], [0], [0], [1], [0, 0, 1, 1], [], []>} : vector<8x66xbf16>, vector<66x260xbf16>, vector<8x260xf32> -> vector<8x260xf32>
    %c2_483 = arith.constant 2 : index
    %c0_484 = arith.constant 0 : index
    %c0_485 = arith.constant 0 : index
    %478 = vector.load %arg13[%c2_483, %c0_484, %c0_485] : memref<6x8x66xbf16, #tpu.memory_space<vmem>>, vector<1x8x66xbf16>
    %479 = vector.shape_cast %478 : vector<1x8x66xbf16> to vector<8x66xbf16>
    %c1_486 = arith.constant 1 : index
    %c0_487 = arith.constant 0 : index
    %c0_488 = arith.constant 0 : index
    %480 = vector.load %arg4[%c1_486, %c0_487, %c0_488] : memref<5x66x260xbf16, #tpu.memory_space<vmem>>, vector<1x66x260xbf16>
    %481 = vector.shape_cast %480 : vector<1x66x260xbf16> to vector<66x260xbf16>
    %cst_489 = arith.constant dense<0.000000e+00> : vector<8x260xf32>
    %482 = tpu.matmul %479, %481, %cst_489 {dimension_numbers = #tpu.dot_dimension_numbers<[1], [0], [0], [1], [0, 0, 1, 1], [], []>} : vector<8x66xbf16>, vector<66x260xbf16>, vector<8x260xf32> -> vector<8x260xf32>
    %483 = arith.addf %477, %482 : vector<8x260xf32>
    %c3_490 = arith.constant 3 : index
    %c0_491 = arith.constant 0 : index
    %c0_492 = arith.constant 0 : index
    %484 = vector.load %arg13[%c3_490, %c0_491, %c0_492] : memref<6x8x66xbf16, #tpu.memory_space<vmem>>, vector<1x8x66xbf16>
    %485 = vector.shape_cast %484 : vector<1x8x66xbf16> to vector<8x66xbf16>
    %c2_493 = arith.constant 2 : index
    %c0_494 = arith.constant 0 : index
    %c0_495 = arith.constant 0 : index
    %486 = vector.load %arg4[%c2_493, %c0_494, %c0_495] : memref<5x66x260xbf16, #tpu.memory_space<vmem>>, vector<1x66x260xbf16>
    %487 = vector.shape_cast %486 : vector<1x66x260xbf16> to vector<66x260xbf16>
    %cst_496 = arith.constant dense<0.000000e+00> : vector<8x260xf32>
    %488 = tpu.matmul %485, %487, %cst_496 {dimension_numbers = #tpu.dot_dimension_numbers<[1], [0], [0], [1], [0, 0, 1, 1], [], []>} : vector<8x66xbf16>, vector<66x260xbf16>, vector<8x260xf32> -> vector<8x260xf32>
    %489 = arith.addf %483, %488 : vector<8x260xf32>
    %c4_497 = arith.constant 4 : index
    %c0_498 = arith.constant 0 : index
    %c0_499 = arith.constant 0 : index
    %490 = vector.load %arg13[%c4_497, %c0_498, %c0_499] : memref<6x8x66xbf16, #tpu.memory_space<vmem>>, vector<1x8x66xbf16>
    %491 = vector.shape_cast %490 : vector<1x8x66xbf16> to vector<8x66xbf16>
    %c3_500 = arith.constant 3 : index
    %c0_501 = arith.constant 0 : index
    %c0_502 = arith.constant 0 : index
    %492 = vector.load %arg4[%c3_500, %c0_501, %c0_502] : memref<5x66x260xbf16, #tpu.memory_space<vmem>>, vector<1x66x260xbf16>
    %493 = vector.shape_cast %492 : vector<1x66x260xbf16> to vector<66x260xbf16>
    %cst_503 = arith.constant dense<0.000000e+00> : vector<8x260xf32>
    %494 = tpu.matmul %491, %493, %cst_503 {dimension_numbers = #tpu.dot_dimension_numbers<[1], [0], [0], [1], [0, 0, 1, 1], [], []>} : vector<8x66xbf16>, vector<66x260xbf16>, vector<8x260xf32> -> vector<8x260xf32>
    %495 = arith.addf %489, %494 : vector<8x260xf32>
    %c5_504 = arith.constant 5 : index
    %c0_505 = arith.constant 0 : index
    %c0_506 = arith.constant 0 : index
    %496 = vector.load %arg13[%c5_504, %c0_505, %c0_506] : memref<6x8x66xbf16, #tpu.memory_space<vmem>>, vector<1x8x66xbf16>
    %497 = vector.shape_cast %496 : vector<1x8x66xbf16> to vector<8x66xbf16>
    %c4_507 = arith.constant 4 : index
    %c0_508 = arith.constant 0 : index
    %c0_509 = arith.constant 0 : index
    %498 = vector.load %arg4[%c4_507, %c0_508, %c0_509] : memref<5x66x260xbf16, #tpu.memory_space<vmem>>, vector<1x66x260xbf16>
    %499 = vector.shape_cast %498 : vector<1x66x260xbf16> to vector<66x260xbf16>
    %cst_510 = arith.constant dense<0.000000e+00> : vector<8x260xf32>
    %500 = tpu.matmul %497, %499, %cst_510 {dimension_numbers = #tpu.dot_dimension_numbers<[1], [0], [0], [1], [0, 0, 1, 1], [], []>} : vector<8x66xbf16>, vector<66x260xbf16>, vector<8x260xf32> -> vector<8x260xf32>
    %501 = arith.addf %495, %500 : vector<8x260xf32>
    %502 = vector.broadcast %3 : vector<1x260xf32> to vector<8x260xf32>
    %503 = arith.addf %501, %502 : vector<8x260xf32>
    %cst_511 = arith.constant 0.000000e+00 : f32
    %504 = vector.broadcast %cst_511 : f32 to vector<8x260xf32>
    %505 = arith.maximumf %503, %504 : vector<8x260xf32>
    %506 = arith.truncf %505 : vector<8x260xf32> to vector<8x260xbf16>
    %c1_512 = arith.constant 1 : index
    %c0_513 = arith.constant 0 : index
    %c0_514 = arith.constant 0 : index
    %507 = vector.load %arg14[%c1_512, %c0_513, %c0_514] : memref<2x8x260xbf16, #tpu.memory_space<vmem>>, vector<1x8x260xbf16>
    %508 = vector.shape_cast %507 : vector<1x8x260xbf16> to vector<8x260xbf16>
    %509 = vector.shape_cast %506 : vector<8x260xbf16> to vector<1x8x260xbf16>
    tpu.vector_store %arg14[%c1_512, %c0_513, %c0_514], %509 {strides = array<i32>} : memref<2x8x260xbf16, #tpu.memory_space<vmem>>, vector<1x8x260xbf16>,
    %c0_515 = arith.constant 0 : index
    %c0_516 = arith.constant 0 : index
    %c0_517 = arith.constant 0 : index
    %510 = vector.load %arg14[%c0_515, %c0_516, %c0_517] : memref<2x8x260xbf16, #tpu.memory_space<vmem>>, vector<1x8x260xbf16>
    %511 = vector.shape_cast %510 : vector<1x8x260xbf16> to vector<8x260xbf16>
    %c0_518 = arith.constant 0 : index
    %c0_519 = arith.constant 0 : index
    %c0_520 = arith.constant 0 : index
    %512 = vector.load %arg6[%c0_518, %c0_519, %c0_520] : memref<2x260x120xbf16, #tpu.memory_space<vmem>>, vector<1x260x120xbf16>
    %513 = vector.shape_cast %512 : vector<1x260x120xbf16> to vector<260x120xbf16>
    %cst_521 = arith.constant dense<0.000000e+00> : vector<8x120xf32>
    %514 = tpu.matmul %511, %513, %cst_521 {dimension_numbers = #tpu.dot_dimension_numbers<[1], [0], [0], [1], [0, 0, 1, 1], [], []>} : vector<8x260xbf16>, vector<260x120xbf16>, vector<8x120xf32> -> vector<8x120xf32>
    %c1_522 = arith.constant 1 : index
    %c0_523 = arith.constant 0 : index
    %c0_524 = arith.constant 0 : index
    %515 = vector.load %arg14[%c1_522, %c0_523, %c0_524] : memref<2x8x260xbf16, #tpu.memory_space<vmem>>, vector<1x8x260xbf16>
    %516 = vector.shape_cast %515 : vector<1x8x260xbf16> to vector<8x260xbf16>
    %c1_525 = arith.constant 1 : index
    %c0_526 = arith.constant 0 : index
    %c0_527 = arith.constant 0 : index
    %517 = vector.load %arg6[%c1_525, %c0_526, %c0_527] : memref<2x260x120xbf16, #tpu.memory_space<vmem>>, vector<1x260x120xbf16>
    %518 = vector.shape_cast %517 : vector<1x260x120xbf16> to vector<260x120xbf16>
    %cst_528 = arith.constant dense<0.000000e+00> : vector<8x120xf32>
    %519 = tpu.matmul %516, %518, %cst_528 {dimension_numbers = #tpu.dot_dimension_numbers<[1], [0], [0], [1], [0, 0, 1, 1], [], []>} : vector<8x260xbf16>, vector<260x120xbf16>, vector<8x120xf32> -> vector<8x120xf32>
    %520 = arith.addf %514, %519 : vector<8x120xf32>
    %c0_529 = arith.constant 0 : index
    %c0_530 = arith.constant 0 : index
    %521 = vector.load %arg7[%c0_529, %c0_530] : memref<1x120xf32, #tpu.memory_space<vmem>>, vector<1x120xf32>
    %522 = vector.broadcast %521 : vector<1x120xf32> to vector<8x120xf32>
    %523 = arith.addf %520, %522 : vector<8x120xf32>
    %cst_531 = arith.constant 0.000000e+00 : f32
    %524 = vector.broadcast %cst_531 : f32 to vector<8x120xf32>
    %525 = arith.maximumf %523, %524 : vector<8x120xf32>
    %526 = arith.truncf %525 : vector<8x120xf32> to vector<8x120xbf16>
    %c0_532 = arith.constant 0 : index
    %c0_533 = arith.constant 0 : index
    %527 = vector.load %arg8[%c0_532, %c0_533] : memref<120x84xbf16, #tpu.memory_space<vmem>>, vector<120x84xbf16>
    %cst_534 = arith.constant dense<0.000000e+00> : vector<8x84xf32>
    %528 = tpu.matmul %526, %527, %cst_534 {dimension_numbers = #tpu.dot_dimension_numbers<[1], [0], [0], [1], [0, 0, 1, 1], [], []>} : vector<8x120xbf16>, vector<120x84xbf16>, vector<8x84xf32> -> vector<8x84xf32>
    %c0_535 = arith.constant 0 : index
    %c0_536 = arith.constant 0 : index
    %529 = vector.load %arg9[%c0_535, %c0_536] : memref<1x84xf32, #tpu.memory_space<vmem>>, vector<1x84xf32>
    %530 = vector.broadcast %529 : vector<1x84xf32> to vector<8x84xf32>
    %531 = arith.addf %528, %530 : vector<8x84xf32>
    %cst_537 = arith.constant 0.000000e+00 : f32
    %532 = vector.broadcast %cst_537 : f32 to vector<8x84xf32>
    %533 = arith.maximumf %531, %532 : vector<8x84xf32>
    %534 = arith.truncf %533 : vector<8x84xf32> to vector<8x84xbf16>
    %c0_538 = arith.constant 0 : index
    %c0_539 = arith.constant 0 : index
    %535 = vector.load %arg10[%c0_538, %c0_539] : memref<84x10xbf16, #tpu.memory_space<vmem>>, vector<84x10xbf16>
    %cst_540 = arith.constant dense<0.000000e+00> : vector<8x10xf32>
    %536 = tpu.matmul %534, %535, %cst_540 {dimension_numbers = #tpu.dot_dimension_numbers<[1], [0], [0], [1], [0, 0, 1, 1], [], []>} : vector<8x84xbf16>, vector<84x10xbf16>, vector<8x10xf32> -> vector<8x10xf32>
    %c0_541 = arith.constant 0 : index
    %c0_542 = arith.constant 0 : index
    %537 = vector.load %arg11[%c0_541, %c0_542] : memref<1x10xf32, #tpu.memory_space<vmem>>, vector<1x10xf32>
    %538 = vector.broadcast %537 : vector<1x10xf32> to vector<8x10xf32>
    %539 = arith.addf %536, %538 : vector<8x10xf32>
    %c0_543 = arith.constant 0 : index
    %c0_544 = arith.constant 0 : index
    %540 = vector.load %arg12[%c0_543, %c0_544] : memref<8x10xf32, #tpu.memory_space<vmem>>, vector<8x10xf32>
    tpu.vector_store %arg12[%c0_543, %c0_544], %539 {strides = array<i32>} : memref<8x10xf32, #tpu.memory_space<vmem>>, vector<8x10xf32>,
    return
  }
  func.func @transform_0(%arg0: i32) -> (i32, i32, i32) {
    %c0_i32 = arith.constant 0 : i32
    %c0_i32_0 = arith.constant 0 : i32
    %c0_i32_1 = arith.constant 0 : i32
    return %c0_i32, %arg0, %c0_i32_0 : i32, i32, i32
  }
  func.func @transform_1(%arg0: i32) -> (i32, i32, i32) {
    %c0_i32 = arith.constant 0 : i32
    %c0_i32_0 = arith.constant 0 : i32
    %c0_i32_1 = arith.constant 0 : i32
    %c0_i32_2 = arith.constant 0 : i32
    return %c0_i32, %c0_i32_0, %c0_i32_1 : i32, i32, i32
  }
  func.func @transform_2(%arg0: i32) -> (i32, i32) {
    %c0_i32 = arith.constant 0 : i32
    %c0_i32_0 = arith.constant 0 : i32
    %c0_i32_1 = arith.constant 0 : i32
    return %c0_i32, %c0_i32_0 : i32, i32
  }
  func.func @transform_3(%arg0: i32) -> (i32, i32, i32) {
    %c0_i32 = arith.constant 0 : i32
    %c0_i32_0 = arith.constant 0 : i32
    %c0_i32_1 = arith.constant 0 : i32
    %c0_i32_2 = arith.constant 0 : i32
    return %c0_i32, %c0_i32_0, %c0_i32_1 : i32, i32, i32
  }
  func.func @transform_4(%arg0: i32) -> (i32, i32) {
    %c0_i32 = arith.constant 0 : i32
    %c0_i32_0 = arith.constant 0 : i32
    %c0_i32_1 = arith.constant 0 : i32
    return %c0_i32, %c0_i32_0 : i32, i32
  }
  func.func @transform_5(%arg0: i32) -> (i32, i32, i32) {
    %c0_i32 = arith.constant 0 : i32
    %c0_i32_0 = arith.constant 0 : i32
    %c0_i32_1 = arith.constant 0 : i32
    %c0_i32_2 = arith.constant 0 : i32
    return %c0_i32, %c0_i32_0, %c0_i32_1 : i32, i32, i32
  }
  func.func @transform_6(%arg0: i32) -> (i32, i32) {
    %c0_i32 = arith.constant 0 : i32
    %c0_i32_0 = arith.constant 0 : i32
    %c0_i32_1 = arith.constant 0 : i32
    return %c0_i32, %c0_i32_0 : i32, i32
  }
  func.func @transform_7(%arg0: i32) -> (i32, i32) {
    %c0_i32 = arith.constant 0 : i32
    %c0_i32_0 = arith.constant 0 : i32
    %c0_i32_1 = arith.constant 0 : i32
    return %c0_i32, %c0_i32_0 : i32, i32
  }
  func.func @transform_8(%arg0: i32) -> (i32, i32) {
    %c0_i32 = arith.constant 0 : i32
    %c0_i32_0 = arith.constant 0 : i32
    %c0_i32_1 = arith.constant 0 : i32
    return %c0_i32, %c0_i32_0 : i32, i32
  }
  func.func @transform_9(%arg0: i32) -> (i32, i32) {
    %c0_i32 = arith.constant 0 : i32
    %c0_i32_0 = arith.constant 0 : i32
    %c0_i32_1 = arith.constant 0 : i32
    return %c0_i32, %c0_i32_0 : i32, i32
  }
  func.func @transform_10(%arg0: i32) -> (i32, i32) {
    %c0_i32 = arith.constant 0 : i32
    %c0_i32_0 = arith.constant 0 : i32
    %c0_i32_1 = arith.constant 0 : i32
    return %c0_i32, %c0_i32_0 : i32, i32
  }
  func.func @transform_11(%arg0: i32) -> (i32, i32) {
    %c0_i32 = arith.constant 0 : i32
    %c0_i32_0 = arith.constant 0 : i32
    return %arg0, %c0_i32 : i32, i32
  }
}

</mosaic_0001>

<bundles_post_ra>
// kernel: net_forward.1
= control target key start
LH: loop header
LB: loop body
LE: loop exit
PB: predicated region body
PF: predicated region fallthrough
CT: control target
= control target key end

     0   :  { %vm78_vm0 = vcmask 392192   ;;  %s5569_s19 = smov 122   ;;  %vm1937_vm1 = vcmask 1040384   ;;  %vm345_vm2 = vcmask 535552   ;;  %vm1933_vm3 = vcmask 539648   ;;  %s7262_s1 = inlined_call_operand.vmem [shape: bf16[5,48,72], index: 1, kind: input, shape index: {}]   ;;  %s7263_s0 = inlined_call_operand.vmem [shape: bf16[16,8,48], index: 0, kind: input, shape index: {}]   ;;  %s7264_s2 = inlined_call_operand.vmem [shape: f32[1,72], index: 2, kind: input, shape index: {}]   ;;  %s7265_s3 = inlined_call_operand.vmem [shape: bf16[5,66,260], index: 3, kind: input, shape index: {}]   ;;  %s7266_s5 = inlined_call_operand.vmem [shape: bf16[2,260,120], index: 5, kind: input, shape index: {}]   ;;  %s7267_s4 = inlined_call_operand.vmem [shape: f32[1,260], index: 4, kind: input, shape index: {}]   ;;  %s7268_s6 = inlined_call_operand.vmem [shape: f32[1,120], index: 6, kind: input, shape index: {}]   ;;  %s7269_s8 = inlined_call_operand.vmem [shape: f32[1,84], index: 8, kind: input, shape index: {}]   ;;  %s7270_s7 = inlined_call_operand.vmem [shape: bf16[120,84], index: 7, kind: input, shape index: {}]   ;;  %s7271_s9 = inlined_call_operand.vmem [shape: bf16[84,10], index: 9, kind: input, shape index: {}]   ;;  %s7272_s10 = inlined_call_operand.vmem [shape: f32[1,10], index: 10, kind: input, shape index: {}]   ;;  %s7273_s11 = inlined_call_operand.vmem [shape: f32[8,10], index: 11, kind: output, shape index: {}]  }
   0x1   :  { %v5315_v0 = vld [vmem:[%s7262_s1 + $0x28] sm:$0xff]  ;;  %v5312_v1 = vld [vmem:[%s7262_s1 + $0x10] sm:$0xff]  ;;  %v5314_v2 = vld [vmem:[%s7262_s1 + $0x20] sm:$0xff]  ;;  %vm2563_vm4 = vcmask 27648   ;;  %vm3479_vm5 = vcmask 1041408   ;;  %vm3475_vm6 = vcmask 31744  }
   0x2   :  { %87 = vmatpush.bf16.msra.mxu0 %v5315_v0  ;;  %121 = vmatpush.bf16.msra.mxu1 %v5312_v1  ;;  %v5311_v3 = vld [vmem:[%s7262_s1 + $0x8] sm:$0xff]  ;;  %v5321_v4 = vld [vmem:[%s7262_s1 + $0x58] sm:$0xff]  ;;  %v5310_v6 = vld [vmem:[%s7262_s1] sm:$0xff]  ;;  %vm3751_vm7 = vcmask 1043456   ;;  %vm3747_vm8 = vcmask 982016   ;;  %vm3818_vm9 = vcmask 687104  }
   0x3   :  { %139 = vmatpush.bf16.msra.mxu2 %v5315_v0  ;;  %267 = vmatpush.bf16.msra.mxu3 %v5321_v4  ;;  %v5313_v5 = vld [vmem:[%s7262_s1 + $0x18] sm:$0xff]  ;;  %v5320_v7 = vld [vmem:[%s7262_s1 + $0x50] sm:$0xff]  ;;  %v5318_v8 = vld [vmem:[%s7262_s1 + $0x40] sm:$0xff]  ;;  %vm3838_vm10 = vcmask 80896  }
   0x4   :  { %v3844_v9 = vld [vmem:[%s7263_s0 + $0x4] sm:$0xf]  ;;  %v44_v10 = vld [vmem:[%s7263_s0] sm:$0xf]  ;;  %v3877_v11 = vld [vmem:[%s7263_s0 + $0x8] sm:$0xf] }
   0x5   :  { %v5317_v12 = vld [vmem:[%s7262_s1 + $0x38] sm:$0xff]  ;;  %v5319_v13 = vld [vmem:[%s7262_s1 + $0x48] sm:$0xff]  ;;  %v5677_v14 = vld [vmem:[%s7262_s1 + $0x10] sm:$0xff] }
   0x6   :  { %88 = vmatpush.bf16.msra.mxu0 %v5314_v2  ;;  %122 = vmatpush.bf16.msra.mxu1 %v5311_v3  ;;  %v3920_v15 = vld [vmem:[%s7263_s0 + $0x10] sm:$0xf]  ;;  %v5687_v16 = vld [vmem:[%s7262_s1 + $0x8] sm:$0xff]  ;;  %v5325_v20 = vld [vmem:[%s7262_s1] sm:$0xff] }
   0x7   :  { %140 = vmatpush.bf16.msra.mxu2 %v5314_v2  ;;  %268 = vmatpush.bf16.msra.mxu3 %v5320_v7  ;;  %v5316_v17 = vld [vmem:[%s7262_s1 + $0x30] sm:$0xff]  ;;  %v5330_v19 = vld [vmem:[%s7262_s1 + $0x28] sm:$0xff]  ;;  %v5329_v22 = vld [vmem:[%s7262_s1 + $0x20] sm:$0xff] }
   0x8   :  { %v5324_v18 = vld [vmem:[%s7262_s1 + $0x70] sm:$0xff]  ;;  %v5323_v21 = vld [vmem:[%s7262_s1 + $0x68] sm:$0xff]  ;;  %v5333_v23 = vld [vmem:[%s7262_s1 + $0x40] sm:$0xff] }
   0x9   :  { %v5332_v24 = vld [vmem:[%s7262_s1 + $0x38] sm:$0xff]  ;;  %v3899_v25 = vld [vmem:[%s7263_s0 + $0xc] sm:$0xf]  ;;  %v5322_v26 = vld [vmem:[%s7262_s1 + $0x60] sm:$0xff] }
   0xa   :  { %89 = vmatpush.bf16.msra.mxu0 %v5313_v5  ;;  %123 = vmatpush.bf16.msra.mxu1 %v5310_v6  ;;  %v5328_v27 = vld [vmem:[%s7262_s1 + $0x18] sm:$0xff]  ;;  %v3943_v28 = vld [vmem:[%s7263_s0 + $0x8] sm:$0xf]  ;;  %v5331_v29 = vld [vmem:[%s7262_s1 + $0x30] sm:$0xff] }
   0xb   :  { %141 = vmatpush.bf16.msra.mxu2 %v5313_v5  ;;  %269 = vmatpush.bf16.msra.mxu3 %v5319_v13  ;;  %v5339_v30 = vld [vmem:[%s7262_s1 + $0x70] sm:$0xff]  ;;  %v5338_v31 = vld [vmem:[%s7262_s1 + $0x68] sm:$0xff]  ;;  %v5337_v32 = vld [vmem:[%s7262_s1 + $0x60] sm:$0xff] }
   0xc   :  { %v3944_v33 = vld [vmem:[%s7263_s0 + $0xc] sm:$0xf]  ;;  %v5336_v34 = vld [vmem:[%s7262_s1 + $0x58] sm:$0xff]  ;;  %v3999_v35 = vld [vmem:[%s7263_s0 + $0x14] sm:$0xf] }
   0xd   :  { %3863 = vmatmul.msk.bf16.vlgmr.msra.gmra.mxu0 %vm78_vm0, %v3844_v9  ;;  %3876 = vmatmul.msk.bf16.vlgmr.msra.gmra.mxu1 %vm78_vm0, %v44_v10  ;;  %v5335_v36 = vld [vmem:[%s7262_s1 + $0x50] sm:$0xff]  ;;  %v5334_v37 = vld [vmem:[%s7262_s1 + $0x48] sm:$0xff]  ;;  %v4041_v42 = vld [vmem:[%s7263_s0 + $0x1c] sm:$0xf] }
   0xe   :  { %152 = vmatpush.bf16.msrb.mxu1 %v5312_v1  ;;  %190 = vmatpush.bf16.msrb.mxu0 %v5318_v8  ;;  %v3941_v38 = vld [vmem:[%s7263_s0 + $0x14] sm:$0xf]  ;;  %v3977_v39 = vld [vmem:[%s7263_s0 + $0x10] sm:$0xf]  ;;  %v5345_v40 = vld [vmem:[%s7262_s1 + $0x28] sm:$0xff] }
   0xf   :  { %248 = vmatpush.bf16.msrb.mxu2 %v5321_v4  ;;  %421 = vmatpush.bf16.msrb.mxu3 %v5677_v14  ;;  %v5342_v41 = vld [vmem:[%s7262_s1 + $0x10] sm:$0xff]  ;;  %v5344_v43 = vld [vmem:[%s7262_s1 + $0x20] sm:$0xff]  ;;  %v5341_v44 = vld [vmem:[%s7262_s1 + $0x8] sm:$0xff] }
  0x10   :  { %3878 = vmatmul.msk.bf16.vlgmr.msra.gmra.mxu2 %vm78_vm0, %v3877_v11  ;;  %3921 = vmatmul.msk.bf16.vlgmr.msra.gmra.mxu3 %vm78_vm0, %v3920_v15  ;;  %v5343_v45 = vld [vmem:[%s7262_s1 + $0x18] sm:$0xff]  ;;  %v5340_v46 = vld [vmem:[%s7262_s1] sm:$0xff]  ;;  %v5350_v50 = vld [vmem:[%s7262_s1 + $0x50] sm:$0xff] }
  0x11   :  { %v5351_v47 = vld [vmem:[%s7262_s1 + $0x58] sm:$0xff]  ;;  %v5348_v49 = vld [vmem:[%s7262_s1 + $0x40] sm:$0xff]  ;;  %v4044_v52 = vld [vmem:[%s7263_s0 + $0x14] sm:$0xf] }
  0x12   :  { %153 = vmatpush.bf16.msrb.mxu1 %v5311_v3  ;;  %191 = vmatpush.bf16.msrb.mxu0 %v5317_v12  ;;  %v4020_v48 = vld [vmem:[%s7263_s0 + $0x18] sm:$0xf]  ;;  %v5349_v53 = vld [vmem:[%s7262_s1 + $0x48] sm:$0xff]  ;;  %v5346_v54 = vld [vmem:[%s7262_s1 + $0x30] sm:$0xff] }
  0x13   :  { %249 = vmatpush.bf16.msrb.mxu2 %v5320_v7  ;;  %422 = vmatpush.bf16.msrb.mxu3 %v5687_v16  ;;  %v5347_v51 = vld [vmem:[%s7262_s1 + $0x38] sm:$0xff]  ;;  %v5354_v56 = vld [vmem:[%s7262_s1 + $0x70] sm:$0xff]  ;;  %v5360_v57 = vld [vmem:[%s7262_s1 + $0x28] sm:$0xff] }
  0x14   :  { %v4077_v55 = vld [vmem:[%s7263_s0 + $0x18] sm:$0xf]  ;;  %v5357_v58 = vld [vmem:[%s7262_s1 + $0x10] sm:$0xff]  ;;  %v4120_v59 = vld [vmem:[%s7263_s0 + $0x20] sm:$0xf] }
  0x15   :  { %v5353_v60 = vld [vmem:[%s7262_s1 + $0x68] sm:$0xff]  ;;  %v5359_v61 = vld [vmem:[%s7262_s1 + $0x20] sm:$0xff]  ;;  %v5358_v0 = vld [vmem:[%s7262_s1 + $0x18] sm:$0xff] }
  0x16   :  { %154 = vmatpush.bf16.msrb.mxu1 %v5310_v6  ;;  %192 = vmatpush.bf16.msrb.mxu0 %v5316_v17  ;;  %v5356_v62 = vld [vmem:[%s7262_s1 + $0x8] sm:$0xff]  ;;  %v5352_v63 = vld [vmem:[%s7262_s1 + $0x60] sm:$0xff]  ;;  %v4043_v3 = vld [vmem:[%s7263_s0 + $0x10] sm:$0xf] }
  0x17   :  { %250 = vmatpush.bf16.msrb.mxu2 %v5319_v13  ;;  %423 = vmatpush.bf16.msrb.mxu3 %v5325_v20  ;;  %v5355_v1 = vld [vmem:[%s7262_s1] sm:$0xff]  ;;  %v4099_v4 = vld [vmem:[%s7263_s0 + $0x1c] sm:$0xf]  ;;  %v4143_v6 = vld [vmem:[%s7263_s0 + $0x18] sm:$0xf] }
  0x18   :  { %v5363_v2 = vld [vmem:[%s7262_s1 + $0x40] sm:$0xff]  ;;  %v5362_v5 = vld [vmem:[%s7262_s1 + $0x38] sm:$0xff]  ;;  %v5361_v7 = vld [vmem:[%s7262_s1 + $0x30] sm:$0xff] }
  0x19   :  { %v4144_v10 = vld [vmem:[%s7263_s0 + $0x1c] sm:$0xf]  ;;  %v5367_v13 = vld [vmem:[%s7262_s1 + $0x60] sm:$0xff] }
  0x1a   :  { %209 = vmatpush.bf16.msra.mxu1 %v5318_v8  ;;  %306 = vmatpush.bf16.msra.mxu0 %v5324_v18  ;;  %v5369_v8 = vld [vmem:[%s7262_s1 + $0x70] sm:$0xff] }
  0x1b   :  { %387 = vmatpush.bf16.msra.mxu2 %v5330_v19  ;;  %506 = vmatpush.bf16.msra.mxu3 %v5333_v23 }
  0x1d   :  { %3879 = vmatmul.msk.bf16.vlgmr.msrb.gmra.mxu1 %vm78_vm0, %v3844_v9  ;;  %3898 = vmatmul.msk.bf16.vlgmr.msrb.gmra.mxu0 %vm78_vm0, %v3877_v11  ;;  %v5368_v9 = vld [vmem:[%s7262_s1 + $0x68] sm:$0xff]  ;;  %v5366_v11 = vld [vmem:[%s7262_s1 + $0x58] sm:$0xff] }
  0x1e   :  { %210 = vmatpush.bf16.msra.mxu1 %v5317_v12  ;;  %307 = vmatpush.bf16.msra.mxu0 %v5323_v21  ;;  %v4199_v12 = vld [vmem:[%s7263_s0 + $0x24] sm:$0xf] }
  0x1f   :  { %388 = vmatpush.bf16.msra.mxu2 %v5329_v22  ;;  %507 = vmatpush.bf16.msra.mxu3 %v5332_v24 }
  0x20   :  { %3919 = vmatmul.msk.bf16.vlgmr.msrb.gmra.mxu2 %vm78_vm0, %v3899_v25  ;;  %3976 = vmatmul.msk.bf16.vlgmr.msrb.gmra.mxu3 %vm78_vm0, %v3943_v28 }
  0x22   :  { %211 = vmatpush.bf16.msra.mxu1 %v5316_v17  ;;  %308 = vmatpush.bf16.msra.mxu0 %v5322_v26 }
  0x23   :  { %389 = vmatpush.bf16.msra.mxu2 %v5328_v27  ;;  %508 = vmatpush.bf16.msra.mxu3 %v5331_v29 }
  0x26   :  { %325 = vmatpush.bf16.msrb.mxu1 %v5324_v18  ;;  %438 = vmatpush.bf16.msrb.mxu0 %v5330_v19  ;;  %v4141_v18 = vld [vmem:[%s7263_s0 + $0x24] sm:$0xf]  ;;  %v4177_v19 = vld [vmem:[%s7263_s0 + $0x20] sm:$0xf] }
  0x27   :  { %488 = vmatpush.bf16.msrb.mxu2 %v5333_v23  ;;  %620 = vmatpush.bf16.msrb.mxu3 %v5339_v30  ;;  %v4241_v23 = vld [vmem:[%s7263_s0 + $0x2c] sm:$0xf] }
  0x2a   :  { %326 = vmatpush.bf16.msrb.mxu1 %v5323_v21  ;;  %439 = vmatpush.bf16.msrb.mxu0 %v5329_v22  ;;  %v5375_v21 = vld [vmem:[%s7262_s1 + $0x28] sm:$0xff]  ;;  %v5372_v22 = vld [vmem:[%s7262_s1 + $0x10] sm:$0xff] }
  0x2b   :  { %489 = vmatpush.bf16.msrb.mxu2 %v5332_v24  ;;  %621 = vmatpush.bf16.msrb.mxu3 %v5338_v31  ;;  %v5374_v24 = vld [vmem:[%s7262_s1 + $0x20] sm:$0xff] }
  0x2d   :  { %3900 = vmatmul.msk.bf16.vlgmr.msra.gmra.mxu1 %vm78_vm0, %v3899_v25  ;;  %3940 = vmatmul.msk.bf16.vlgmr.msra.gmra.mxu0 %vm78_vm0, %v3920_v15  ;;  %v5364_v15 = vld [vmem:[%s7262_s1 + $0x48] sm:$0xff] }
  0x2e   :  { %327 = vmatpush.bf16.msrb.mxu1 %v5322_v26  ;;  %440 = vmatpush.bf16.msrb.mxu0 %v5328_v27  ;;  %v5371_v26 = vld [vmem:[%s7262_s1 + $0x8] sm:$0xff] }
  0x2f   :  { %490 = vmatpush.bf16.msrb.mxu2 %v5331_v29  ;;  %622 = vmatpush.bf16.msrb.mxu3 %v5337_v32  ;;  %v5373_v29 = vld [vmem:[%s7262_s1 + $0x18] sm:$0xff] }
  0x30   :  { %3963 = vmatmul.msk.bf16.vlgmr.msra.gmra.mxu2 %vm78_vm0, %v3944_v33  ;;  %4000 = vmatmul.msk.bf16.vlgmr.msra.gmra.mxu3 %vm78_vm0, %v3999_v35 }
  0x32   :  { %451 = vmatpush.bf16.msra.mxu1 %v5677_v14  ;;  %544 = vmatpush.bf16.msra.mxu0 %v5336_v34  ;;  %v5365_v14 = vld [vmem:[%s7262_s1 + $0x50] sm:$0xff] }
  0x33   :  { %601 = vmatpush.bf16.msra.mxu2 %v5339_v30  ;;  %746 = vmatpush.bf16.msra.mxu3 %v5342_v41 }
  0x36   :  { %452 = vmatpush.bf16.msra.mxu1 %v5687_v16  ;;  %545 = vmatpush.bf16.msra.mxu0 %v5335_v36 }
  0x37   :  { %602 = vmatpush.bf16.msra.mxu2 %v5338_v31  ;;  %747 = vmatpush.bf16.msra.mxu3 %v5341_v44  ;;  %v5370_v31 = vld [vmem:[%s7262_s1] sm:$0xff] }
  0x3a   :  { %453 = vmatpush.bf16.msra.mxu1 %v5325_v20  ;;  %546 = vmatpush.bf16.msra.mxu0 %v5334_v37 }
  0x3b   :  { %603 = vmatpush.bf16.msra.mxu2 %v5337_v32  ;;  %748 = vmatpush.bf16.msra.mxu3 %v5340_v46  ;;  %v5381_v32 = vld [vmem:[%s7262_s1 + $0x58] sm:$0xff] }
  0x3d   :  { %3942 = vmatmul.msk.bf16.vlgmr.msrb.gmra.mxu1 %vm78_vm0, %v3941_v38  ;;  %3978 = vmatmul.msk.bf16.vlgmr.msrb.gmra.mxu0 %vm78_vm0, %v3977_v39  ;;  %v4220_v38 = vld [vmem:[%s7263_s0 + $0x28] sm:$0xf] }
  0x3e   :  { %563 = vmatpush.bf16.msrb.mxu1 %v5336_v34  ;;  %682 = vmatpush.bf16.msrb.mxu0 %v5345_v40 }
  0x40   :  { %3998 = vmatmul.msk.bf16.vlgmr.msrb.gmra.mxu2 %vm78_vm0, %v3977_v39  ;;  %4042 = vmatmul.msk.bf16.vlgmr.msrb.gmra.mxu3 %vm78_vm0, %v4041_v42  ;;  %v5378_v39 = vld [vmem:[%s7262_s1 + $0x40] sm:$0xff]  ;;  %v5377_v42 = vld [vmem:[%s7262_s1 + $0x38] sm:$0xff] }
  0x41   :  { %733 = vmatpush.bf16.msrb.mxu2 %v5345_v40  ;;  %858 = vmatpush.bf16.msrb.mxu3 %v5351_v47 }
  0x42   :  { %564 = vmatpush.bf16.msrb.mxu1 %v5335_v36  ;;  %683 = vmatpush.bf16.msrb.mxu0 %v5344_v43 }
  0x45   :  { %734 = vmatpush.bf16.msrb.mxu2 %v5344_v43  ;;  %859 = vmatpush.bf16.msrb.mxu3 %v5350_v50  ;;  %v4244_v43 = vld [vmem:[%s7263_s0 + $0x24] sm:$0xf] }
  0x46   :  { %565 = vmatpush.bf16.msrb.mxu1 %v5334_v37  ;;  %684 = vmatpush.bf16.msrb.mxu0 %v5343_v45 }
  0x49   :  { %735 = vmatpush.bf16.msrb.mxu2 %v5343_v45  ;;  %860 = vmatpush.bf16.msrb.mxu3 %v5349_v53 }
  0x4d   :  { %3979 = vmatmul.msk.bf16.vlgmr.msra.gmra.mxu1 %vm78_vm0, %v3944_v33  ;;  %4019 = vmatmul.msk.bf16.vlgmr.msra.gmra.mxu0 %vm78_vm0, %v3999_v35 }
  0x4e   :  { %716 = vmatpush.bf16.msra.mxu1 %v5342_v41  ;;  %783 = vmatpush.bf16.msra.mxu0 %v5348_v49  ;;  %v5380_v41 = vld [vmem:[%s7262_s1 + $0x50] sm:$0xff] }
  0x50   :  { %4040 = vmatmul.msk.bf16.vlgmr.msra.gmra.mxu2 %vm78_vm0, %v4020_v48  ;;  %4079 = vmatmul.msk.bf16.vlgmr.msra.gmra.mxu3 %vm78_vm0, %v4044_v52 }
  0x51   :  { %839 = vmatpush.bf16.msra.mxu2 %v5351_v47  ;;  %1011 = vmatpush.bf16.msra.mxu3 %v5357_v58 }
  0x52   :  { %717 = vmatpush.bf16.msra.mxu1 %v5341_v44  ;;  %784 = vmatpush.bf16.msra.mxu0 %v5347_v51 }
  0x55   :  { %840 = vmatpush.bf16.msra.mxu2 %v5350_v50  ;;  %1012 = vmatpush.bf16.msra.mxu3 %v5356_v62 }
  0x56   :  { %718 = vmatpush.bf16.msra.mxu1 %v5340_v46  ;;  %785 = vmatpush.bf16.msra.mxu0 %v5346_v54 }
  0x59   :  { %841 = vmatpush.bf16.msra.mxu2 %v5349_v53  ;;  %1013 = vmatpush.bf16.msra.mxu3 %v5355_v1 }
  0x5d   :  { %4021 = vmatmul.msk.bf16.vlgmr.msrb.gmra.mxu1 %vm78_vm0, %v4020_v48  ;;  %4063 = vmatmul.msk.bf16.vlgmr.msrb.gmra.mxu0 %vm78_vm0, %v4044_v52  ;;  %v5379_v48 = vld [vmem:[%s7262_s1 + $0x48] sm:$0xff] }
  0x5e   :  { %801 = vmatpush.bf16.msrb.mxu1 %v5348_v49  ;;  %896 = vmatpush.bf16.msrb.mxu0 %v5354_v56  ;;  %v5376_v49 = vld [vmem:[%s7262_s1 + $0x30] sm:$0xff] }
  0x60   :  { %4078 = vmatmul.msk.bf16.vlgmr.msrb.gmra.mxu2 %vm78_vm0, %v4077_v55  ;;  %4121 = vmatmul.msk.bf16.vlgmr.msrb.gmra.mxu3 %vm78_vm0, %v4120_v59 }
  0x61   :  { %977 = vmatpush.bf16.msrb.mxu2 %v5360_v57  ;;  %1096 = vmatpush.bf16.msrb.mxu3 %v5363_v2 }
  0x62   :  { %802 = vmatpush.bf16.msrb.mxu1 %v5347_v51  ;;  %897 = vmatpush.bf16.msrb.mxu0 %v5353_v60 }
  0x65   :  { %978 = vmatpush.bf16.msrb.mxu2 %v5359_v61  ;;  %1097 = vmatpush.bf16.msrb.mxu3 %v5362_v5 }
  0x66   :  { %803 = vmatpush.bf16.msrb.mxu1 %v5346_v54  ;;  %898 = vmatpush.bf16.msrb.mxu0 %v5352_v63 }
  0x69   :  { %979 = vmatpush.bf16.msrb.mxu2 %v5358_v0  ;;  %1098 = vmatpush.bf16.msrb.mxu3 %v5361_v7 }
  0x6d   :  { %4076 = vmatmul.msk.bf16.vlgmr.msra.gmra.mxu1 %vm78_vm0, %v4043_v3  ;;  %4098 = vmatmul.msk.bf16.vlgmr.msra.gmra.mxu0 %vm78_vm0, %v4077_v55  ;;  %v4277_v55 = vld [vmem:[%s7263_s0 + $0x28] sm:$0xf] }
  0x6e   :  { %915 = vmatpush.bf16.msra.mxu1 %v5354_v56  ;;  %1028 = vmatpush.bf16.msra.mxu0 %v5360_v57  ;;  %v5384_v56 = vld [vmem:[%s7262_s1 + $0x70] sm:$0xff]  ;;  %v5390_v57 = vld [vmem:[%s7262_s1 + $0x28] sm:$0xff] }
  0x70   :  { %4119 = vmatmul.msk.bf16.vlgmr.msra.gmra.mxu2 %vm78_vm0, %v4099_v4  ;;  %4176 = vmatmul.msk.bf16.vlgmr.msra.gmra.mxu3 %vm78_vm0, %v4143_v6 }
  0x71   :  { %1078 = vmatpush.bf16.msra.mxu2 %v5363_v2  ;;  %1210 = vmatpush.bf16.msra.mxu3 %v5369_v8 }
  0x72   :  { %916 = vmatpush.bf16.msra.mxu1 %v5353_v60  ;;  %1029 = vmatpush.bf16.msra.mxu0 %v5359_v61  ;;  %v5985_v60 = vld [vmem:[%s7262_s1 + $0x10] sm:$0xff] }
  0x73   :  { %v5991_v61 = vld [vmem:[%s7263_s0 + $0x30] sm:$0xf] }
  0x75   :  { %1079 = vmatpush.bf16.msra.mxu2 %v5362_v5  ;;  %1211 = vmatpush.bf16.msra.mxu3 %v5368_v9  ;;  %v5388_v5 = vld [vmem:[%s7262_s1 + $0x18] sm:$0xff] }
  0x76   :  { %917 = vmatpush.bf16.msra.mxu1 %v5352_v63  ;;  %1030 = vmatpush.bf16.msra.mxu0 %v5358_v0  ;;  %v5389_v63 = vld [vmem:[%s7262_s1 + $0x20] sm:$0xff] }
  0x79   :  { %1080 = vmatpush.bf16.msra.mxu2 %v5361_v7  ;;  %1212 = vmatpush.bf16.msra.mxu3 %v5367_v13  ;;  %v6021_v7 = vld [vmem:[%s7262_s1] sm:$0xff] }
  0x7d   :  { %4100 = vmatmul.msk.bf16.vlgmr.msrb.gmra.mxu1 %vm78_vm0, %v4099_v4  ;;  %4140 = vmatmul.msk.bf16.vlgmr.msrb.gmra.mxu0 %vm78_vm0, %v4120_v59  ;;  %v5382_v4 = vld [vmem:[%s7262_s1 + $0x60] sm:$0xff] }
  0x7e   :  { %1041 = vmatpush.bf16.msrb.mxu1 %v5357_v58  ;;  %1134 = vmatpush.bf16.msrb.mxu0 %v5366_v11 }
  0x80   :  { %4163 = vmatmul.msk.bf16.vlgmr.msrb.gmra.mxu2 %vm78_vm0, %v4144_v10  ;;  %4200 = vmatmul.msk.bf16.vlgmr.msrb.gmra.mxu3 %vm78_vm0, %v4199_v12 }
  0x81   :  { %1191 = vmatpush.bf16.msrb.mxu2 %v5369_v8  ;;  %1336 = vmatpush.bf16.msrb.mxu3 %v5372_v22  ;;  %v6026_v8 = vld [vmem:[%s7264_s2] ss:$0 sm:$0xff] }
  0x82   :  { %1042 = vmatpush.bf16.msrb.mxu1 %v5356_v62  ;;  %1135 = vmatpush.bf16.msrb.mxu0 %v5365_v14  ;;  %v5383_v62 = vld [vmem:[%s7262_s1 + $0x68] sm:$0xff] }
  0x85   :  { %1192 = vmatpush.bf16.msrb.mxu2 %v5368_v9  ;;  %1337 = vmatpush.bf16.msrb.mxu3 %v5371_v26 }
  0x86   :  { %1043 = vmatpush.bf16.msrb.mxu1 %v5355_v1  ;;  %1136 = vmatpush.bf16.msrb.mxu0 %v5364_v15  ;;  %v6007_v1 = vld [vmem:[%s7262_s1 + $0x8] sm:$0xff] }
  0x89   :  { %1193 = vmatpush.bf16.msrb.mxu2 %v5367_v13  ;;  %1338 = vmatpush.bf16.msrb.mxu3 %v5370_v31  ;;  %v4243_v13 = vld [vmem:[%s7263_s0 + $0x20] sm:$0xf] }
  0x8a   :  { %v91_v16 = vpop.f32.mrf.mxu0  ;;  %v125_v17 = vpop.f32.mrf.mxu1 }
  0x8b   :  { %v126_v20 = vadd.f32 %v125_v17, %v91_v16  ;;  %v4299_v16 = vld [vmem:[%s7263_s0 + $0x2c] sm:$0xf]  ;;  %v5393_v17 = vld [vmem:[%s7262_s1 + $0x40] sm:$0xff] }
  0x8d   :  { %4142 = vmatmul.msk.bf16.vlgmr.msra.gmra.mxu1 %vm78_vm0, %v4141_v18  ;;  %4178 = vmatmul.msk.bf16.vlgmr.msra.gmra.mxu0 %vm78_vm0, %v4177_v19 }
  0x8e   :  { %1153 = vmatpush.bf16.msra.mxu1 %v5366_v11  ;;  %1272 = vmatpush.bf16.msra.mxu0 %v5375_v21 }
  0x90   :  { %4198 = vmatmul.msk.bf16.vlgmr.msra.gmra.mxu2 %vm78_vm0, %v4177_v19  ;;  %4242 = vmatmul.msk.bf16.vlgmr.msra.gmra.mxu3 %vm78_vm0, %v4241_v23  ;;  %v5392_v23 = vld [vmem:[%s7262_s1 + $0x38] sm:$0xff] }
  0x91   :  { %1323 = vmatpush.bf16.msra.mxu2 %v5375_v21  ;;  %1448 = vmatpush.bf16.msra.mxu3 %v5381_v32 }
  0x92   :  { %v93_v27 = vpop.f32.mrf.mxu0  ;;  %v127_v28 = vpop.f32.mrf.mxu1  ;;  %1154 = vmatpush.bf16.msra.mxu1 %v5365_v14  ;;  %1273 = vmatpush.bf16.msra.mxu0 %v5374_v24 }
  0x93   :  { %v143_v25 = vpop.f32.mrf.mxu2  ;;  %v271_v30 = vpop.f32.mrf.mxu3  ;;  %v5391_v28 = vld [vmem:[%s7262_s1 + $0x30] sm:$0xff] }
  0x95   :  { %1324 = vmatpush.bf16.msra.mxu2 %v5374_v24  ;;  %1449 = vmatpush.bf16.msra.mxu3 %v5380_v41 }
  0x96   :  { %1155 = vmatpush.bf16.msra.mxu1 %v5364_v15  ;;  %1274 = vmatpush.bf16.msra.mxu0 %v5373_v29 }
  0x99   :  { %1325 = vmatpush.bf16.msra.mxu2 %v5373_v29  ;;  %1450 = vmatpush.bf16.msra.mxu3 %v5379_v48 }
  0x9a   :  { %v156_v34 = vpop.f32.mrf.mxu1  ;;  %v194_v35 = vpop.f32.mrf.mxu0 }
  0x9b   :  { %v145_v33 = vpop.f32.mrf.mxu2  ;;  %v157_v36 = vadd.f32 %v156_v34, %v143_v25  ;;  %v198_v37 = vadd.f32 %v194_v35, %v126_v20  ;;  %v273_v40 = vpop.f32.mrf.mxu3  ;;  %v4343_v20 = vld [vmem:[%s7263_s0 + $0x28] sm:$0xf]  ;;  %v5399_v34 = vld [vmem:[%s7262_s1 + $0x70] sm:$0xff] }
  0x9c   :  { %v6058_v33 = vld [vmem:[%s7263_s0 + $0x2c] sm:$0xf] }
  0x9d   :  { %4179 = vmatmul.msk.bf16.vlgmr.msrb.gmra.mxu1 %vm78_vm0, %v4144_v10  ;;  %4219 = vmatmul.msk.bf16.vlgmr.msrb.gmra.mxu0 %vm78_vm0, %v4199_v12 }
  0x9e   :  { %1306 = vmatpush.bf16.msrb.mxu1 %v5372_v22  ;;  %1373 = vmatpush.bf16.msrb.mxu0 %v5378_v39 }
  0xa0   :  { %4240 = vmatmul.msk.bf16.vlgmr.msrb.gmra.mxu2 %vm78_vm0, %v4220_v38  ;;  %4279 = vmatmul.msk.bf16.vlgmr.msrb.gmra.mxu3 %vm78_vm0, %v4244_v43 }
  0xa1   :  { %1429 = vmatpush.bf16.msrb.mxu2 %v5381_v32  ;;  %1601 = vmatpush.bf16.msrb.mxu3 %v5985_v60 }
  0xa2   :  { %v158_v46 = vpop.f32.mrf.mxu1  ;;  %v196_v47 = vpop.f32.mrf.mxu0  ;;  %1307 = vmatpush.bf16.msrb.mxu1 %v5371_v26  ;;  %1374 = vmatpush.bf16.msrb.mxu0 %v5377_v42 }
  0xa3   :  { %v252_v44 = vpop.f32.mrf.mxu2  ;;  %v5969_v50 = vpop.f32.mrf.mxu3 }
  0xa4   :  { %v256_v45 = vadd.f32 %v252_v44, %v198_v37 }
  0xa5   :  { %1430 = vmatpush.bf16.msrb.mxu2 %v5380_v41  ;;  %1602 = vmatpush.bf16.msrb.mxu3 %v6007_v1 }
  0xa6   :  { %1308 = vmatpush.bf16.msrb.mxu1 %v5370_v31  ;;  %1375 = vmatpush.bf16.msrb.mxu0 %v5376_v49 }
  0xa9   :  { %1431 = vmatpush.bf16.msrb.mxu2 %v5379_v48  ;;  %1603 = vmatpush.bf16.msrb.mxu3 %v6021_v7 }
  0xaa   :  { %v213_v52 = vpop.f32.mrf.mxu1  ;;  %v310_v53 = vpop.f32.mrf.mxu0 }
  0xab   :  { %v254_v51 = vpop.f32.mrf.mxu2  ;;  %v217_v54 = vadd.f32 %v213_v52, %v157_v36  ;;  %v427_v58 = vpop.f32.mrf.mxu3  ;;  %v314_v9 = vadd.f32 %v310_v53, %v256_v45  ;;  %v6072_v36 = vld [vmem:[%s7263_s0 + $0x34] sm:$0xf]  ;;  %v5397_v45 = vld [vmem:[%s7262_s1 + $0x60] sm:$0xff] }
  0xad   :  { %v275_v59 = vadd.f32 %v271_v30, %v217_v54  ;;  %4221 = vmatmul.msk.bf16.vlgmr.msra.gmra.mxu1 %vm78_vm0, %v4220_v38  ;;  %4263 = vmatmul.msk.bf16.vlgmr.msra.gmra.mxu0 %vm78_vm0, %v4244_v43  ;;  %v334_v14 = vadd.f32 %v6026_v8, %v314_v9  ;;  %v5396_v38 = vld [vmem:[%s7262_s1 + $0x58] sm:$0xff]  ;;  %v5395_v43 = vld [vmem:[%s7262_s1 + $0x50] sm:$0xff] }
  0xae   :  { %1391 = vmatpush.bf16.msra.mxu1 %v5378_v39  ;;  %1486 = vmatpush.bf16.msra.mxu0 %v5384_v56  ;;  %v5398_v39 = vld [vmem:[%s7262_s1 + $0x68] sm:$0xff] }
  0xaf   :  { %v335_v21 = vmax.f32 %v334_v14, 0.0 }
  0xb0   :  { %4278 = vmatmul.msk.bf16.vlgmr.msra.gmra.mxu2 %vm78_vm0, %v4277_v55  ;;  %4321 = vmatmul.msk.bf16.vlgmr.msra.gmra.mxu3 %vm78_vm0, %v5991_v61 }
  0xb1   :  { %1567 = vmatpush.bf16.msra.mxu2 %v5390_v57  ;;  %1686 = vmatpush.bf16.msra.mxu3 %v5393_v17 }
  0xb2   :  { %v215_v2 = vpop.f32.mrf.mxu1  ;;  %v312_v3 = vpop.f32.mrf.mxu0  ;;  %1392 = vmatpush.bf16.msra.mxu1 %v5377_v42  ;;  %1487 = vmatpush.bf16.msra.mxu0 %v5383_v62 }
  0xb3   :  { %v6000_v0 = vpop.f32.mrf.mxu2  ;;  %v6015_v6 = vpop.f32.mrf.mxu3 }
  0xb4   :  { %v426_v37 = vadd.f32 %v5969_v50, %v6000_v0 }
  0xb5   :  { %1568 = vmatpush.bf16.msra.mxu2 %v5389_v63  ;;  %1687 = vmatpush.bf16.msra.mxu3 %v5392_v23 }
  0xb6   :  { %1393 = vmatpush.bf16.msra.mxu1 %v5376_v49  ;;  %1488 = vmatpush.bf16.msra.mxu0 %v5382_v4  ;;  %v5394_v49 = vld [vmem:[%s7262_s1 + $0x48] sm:$0xff] }
  0xb9   :  { %1569 = vmatpush.bf16.msra.mxu2 %v5388_v5  ;;  %1688 = vmatpush.bf16.msra.mxu3 %v5391_v28 }
  0xba   :  { %v329_v11 = vpop.f32.mrf.mxu1  ;;  %v442_v12 = vpop.f32.mrf.mxu0 }
  0xbb   :  { %v393_v10 = vpop.f32.mrf.mxu2  ;;  %v333_v15 = vadd.f32 %v329_v11, %v275_v59  ;;  %v512_v18 = vpop.f32.mrf.mxu3 }
  0xbc   :  { %v4420_v10 = vld [vmem:[%s7263_s0 + $0x38] sm:$0xf] }
  0xbd   :  { %v336_v19 = vadd.f32 %v6026_v8, %v333_v15  ;;  %4276 = vmatmul.msk.bf16.vlgmr.msrb.gmra.mxu1 %vm78_vm0, %v4243_v13  ;;  %4298 = vmatmul.msk.bf16.vlgmr.msrb.gmra.mxu0 %vm78_vm0, %v4277_v55  ;;  %v4341_v55 = vld [vmem:[%s7263_s0 + $0x34] sm:$0xf] }
  0xbe   :  { %1505 = vmatpush.bf16.msrb.mxu1 %v5384_v56  ;;  %1618 = vmatpush.bf16.msrb.mxu0 %v5390_v57  ;;  %v4377_v57 = vld [vmem:[%s7263_s0 + $0x30] sm:$0xf] }
  0xbf   :  { %v337_v22 = vmax.f32 %v336_v19, 0.0 }
  0xc0   :  { %4319 = vmatmul.msk.bf16.vlgmr.msrb.gmra.mxu2 %vm78_vm0, %v4299_v16  ;;  %4376 = vmatmul.msk.bf16.vlgmr.msrb.gmra.mxu3 %vm78_vm0, %v4343_v20 }
  0xc1   :  { %1668 = vmatpush.bf16.msrb.mxu2 %v5393_v17  ;;  %v6050_v25 = vmax.f32 %v335_v21, %v337_v22  ;;  %1800 = vmatpush.bf16.msrb.mxu3 %v5399_v34 }
  0xc2   :  { %v331_v26 = vpop.f32.mrf.mxu1  ;;  %v444_v27 = vpop.f32.mrf.mxu0  ;;  %1506 = vmatpush.bf16.msrb.mxu1 %v5383_v62  ;;  %1619 = vmatpush.bf16.msrb.mxu0 %v5389_v63 }
  0xc3   :  { %v492_v24 = vpop.f32.mrf.mxu2  ;;  %v624_v29 = vpop.f32.mrf.mxu3 }
  0xc4   :  { %v496_v44 = vadd.f32 %v492_v24, %v426_v37 }
  0xc5   :  { %1669 = vmatpush.bf16.msrb.mxu2 %v5392_v23  ;;  %1801 = vmatpush.bf16.msrb.mxu3 %v5398_v39 }
  0xc6   :  { %1507 = vmatpush.bf16.msrb.mxu1 %v5382_v4  ;;  %1620 = vmatpush.bf16.msrb.mxu0 %v5388_v5 }
  0xc9   :  { %1670 = vmatpush.bf16.msrb.mxu2 %v5391_v28  ;;  %1802 = vmatpush.bf16.msrb.mxu3 %v5397_v45 }
  0xca   :  { %v455_v31 = vpop.f32.mrf.mxu1  ;;  %v548_v32 = vpop.f32.mrf.mxu0 }
  0xcb   :  { %v494_v30 = vpop.f32.mrf.mxu2  ;;  %v626_v35 = vpop.f32.mrf.mxu3  ;;  %v456_v47 = vadd.f32 %v455_v31, %v442_v12  ;;  %v552_v48 = vadd.f32 %v548_v32, %v496_v44 }
  0xcd   :  { %4300 = vmatmul.msk.bf16.vlgmr.msra.gmra.mxu1 %vm78_vm0, %v4299_v16  ;;  %4340 = vmatmul.msk.bf16.vlgmr.msra.gmra.mxu0 %vm78_vm0, %v5991_v61  ;;  %v514_v50 = vadd.f32 %v6015_v6, %v456_v47  ;;  %v4441_v61 = vld [vmem:[%s7263_s0 + $0x3c] sm:$0xf] }
  0xce   :  { %1631 = vmatpush.bf16.msra.mxu1 %v5985_v60  ;;  %1724 = vmatpush.bf16.msra.mxu0 %v5396_v38 }
  0xd0   :  { %4363 = vmatmul.msk.bf16.vlgmr.msra.gmra.mxu2 %vm78_vm0, %v6058_v33  ;;  %4400 = vmatmul.msk.bf16.vlgmr.msra.gmra.mxu3 %vm78_vm0, %v6072_v36 }
  0xd1   :  { %1781 = vmatpush.bf16.msra.mxu2 %v5399_v34 }
  0xd2   :  { %v457_v41 = vpop.f32.mrf.mxu1  ;;  %v550_v42 = vpop.f32.mrf.mxu0  ;;  %1632 = vmatpush.bf16.msra.mxu1 %v6007_v1  ;;  %1725 = vmatpush.bf16.msra.mxu0 %v5395_v43 }
  0xd3   :  { %v605_v40 = vpop.f32.mrf.mxu2  ;;  %v750_v46 = vpop.f32.mrf.mxu3 }
  0xd4   :  { %v609_v51 = vadd.f32 %v605_v40, %v552_v48 }
  0xd5   :  { %1782 = vmatpush.bf16.msra.mxu2 %v5398_v39 }
  0xd6   :  { %1633 = vmatpush.bf16.msra.mxu1 %v6021_v7  ;;  %1726 = vmatpush.bf16.msra.mxu0 %v5394_v49  ;;  %v629_v59 = vadd.f32 %v6026_v8, %v609_v51 }
  0xd8   :  { %v630_v63 = vmax.f32 %v629_v59, 0.0 }
  0xd9   :  { %1783 = vmatpush.bf16.msra.mxu2 %v5397_v45 }
  0xda   :  { %v567_v53 = vpop.f32.mrf.mxu1  ;;  %v686_v54 = vpop.f32.mrf.mxu0 }
  0xdb   :  { %v607_v52 = vpop.f32.mrf.mxu2  ;;  %v571_v56 = vadd.f32 %v567_v53, %v514_v50  ;;  %v752_v58 = vpop.f32.mrf.mxu3 }
  0xdd   :  { %v628_v60 = vadd.f32 %v624_v29, %v571_v56  ;;  %4342 = vmatmul.msk.bf16.vlgmr.msrb.gmra.mxu1 %vm78_vm0, %v4341_v55  ;;  %4378 = vmatmul.msk.bf16.vlgmr.msrb.gmra.mxu0 %vm78_vm0, %v4377_v57 }
  0xde   :  { %1743 = vmatpush.bf16.msrb.mxu1 %v5396_v38 }
  0xdf   :  { %v631_v62 = vadd.f32 %v6026_v8, %v628_v60 }
  0xe0   :  { %4398 = vmatmul.msk.bf16.vlgmr.msrb.gmra.mxu2 %vm78_vm0, %v4377_v57  ;;  %4442 = vmatmul.msk.bf16.vlgmr.msrb.gmra.mxu3 %vm78_vm0, %v4441_v61 }
  0xe1   :  { %v632_v0 = vmax.f32 %v631_v62, 0.0 }
  0xe2   :  { %v569_v2 = vpop.f32.mrf.mxu1  ;;  %v688_v3 = vpop.f32.mrf.mxu0  ;;  %1744 = vmatpush.bf16.msrb.mxu1 %v5395_v43 }
  0xe3   :  { %v737_v1 = vpop.f32.mrf.mxu2  ;;  %v6111_v4 = vmax.f32 %v630_v63, %v632_v0  ;;  %v862_v5 = vpop.f32.mrf.mxu3  ;;  %v4459_v0 = vld [vmem:[%s7265_s3 + $0xcc] sm:$0x11] }
  0xe4   :  { %v751_v21 = vadd.f32 %v750_v46, %v737_v1  ;;  %v1903_v2 = vunpack.c.l.b16 %v4459_v0  ;;  %v1904_v3 = vunpack.c.h.b16 %v4459_v0  ;;  %v5410_v0 = vld [vmem:[%s7265_s3 + $0x50] sm:$0xf0] }
  0xe5   :  { %635 = vrot.lane.b32.xlu0 %v6111_v4, %s5569_s19 }
  0xe6   :  { %1745 = vmatpush.bf16.msrb.mxu1 %v5394_v49 }
  0xea   :  { %v720_v7 = vpop.f32.mrf.mxu1  ;;  %v787_v9 = vpop.f32.mrf.mxu0 }
  0xeb   :  { %v739_v6 = vpop.f32.mrf.mxu2  ;;  %v864_v11 = vpop.f32.mrf.mxu3  ;;  %v721_v20 = vadd.f32 %v720_v7, %v686_v54 }
  0xec   :  { %v1919_v11 = vpack.c.b16 %v1904_v3, %v1904_v3 }
  0xed   :  { %4379 = vmatmul.msk.bf16.vlgmr.msra.gmra.mxu1 %vm78_vm0, %v6058_v33  ;;  %340 = vrot.lane.b32.xlu0 %v6050_v25, %s5569_s19  ;;  %v791_v26 = vadd.f32 %v787_v9, %v721_v20 }
  0xee   :  { %4419 = vmatmul.msk.bf16.vlgmr.msra.gmra.mxu0 %vm78_vm0, %v6072_v36 }
  0xf0   :  { %4440 = vmatmul.msk.bf16.vlgmr.msra.gmra.mxu2 %vm78_vm0, %v4420_v10 }
  0xf2   :  { %v722_v13 = vpop.f32.mrf.mxu1  ;;  %v789_v14 = vpop.f32.mrf.mxu0 }
  0xf3   :  { %v843_v12 = vpop.f32.mrf.mxu2  ;;  %v1015_v15 = vpop.f32.mrf.mxu3 }
  0xf4   :  { %v847_v28 = vadd.f32 %v843_v12, %v791_v26 }
  0xfa   :  { %v805_v17 = vpop.f32.mrf.mxu1  ;;  %v900_v18 = vpop.f32.mrf.mxu0 }
  0xfb   :  { %v845_v16 = vpop.f32.mrf.mxu2  ;;  %v1017_v19 = vpop.f32.mrf.mxu3  ;;  %v809_v29 = vadd.f32 %v805_v17, %v751_v21  ;;  %v904_v30 = vadd.f32 %v900_v18, %v847_v28  ;;  %v4501_v28 = vld [vmem:[%s7265_s3 + $0xc0] sm:$0xf0] }
  0xfd   :  { %4421 = vmatmul.msk.bf16.vlgmr.msrb.gmra.mxu1 %vm78_vm0, %v4420_v10  ;;  %v866_v31 = vadd.f32 %v862_v5, %v809_v29  ;;  %v924_v35 = vadd.f32 %v6026_v8, %v904_v30  ;;  %v4460_v5 = vld [vmem:[%s7265_s3 + $0xd4] sm:$0x1]  ;;  %v1918_v10 = vpack.c.b16 %v1903_v2, %v1903_v2  ;;  %v4507_v29 = vld [vmem:[%s7265_s3 + $0xbc] sm:$0xf]  ;;  %v5423_v30 = vld [vmem:[%s7265_s3 + $0xc4] sm:$0xf0] }
  0xfe   :  { %v1905_v9 = vunpack.c.l.b16 %v4460_v5 }
  0xff   :  { %v925_v39 = vmax.f32 %v924_v35, 0.0  ;;  %v1939_v14 = vsel %vm1937_vm1, %v1918_v10, 0 }
 0x100   :  { %v1920_v13 = vpack.c.b16 %v1905_v9, %v1905_v9  ;;  %1950 = vmatpush.bf16.msrb.mxu0 %v1939_v14  ;;  %v5412_v9 = vld [vmem:[%s7265_s3 + $0x70] sm:$0xf] }
 0x102   :  { %v807_v23 = vpop.f32.mrf.mxu1  ;;  %v902_v24 = vpop.f32.mrf.mxu0  ;;  %v1945_v19 = vsel %vm1937_vm1, %v1920_v13, 0  ;;  %v5414_v13 = vld [vmem:[%s7265_s3 + $0x7c] sm:$0xf0] }
 0x103   :  { %v981_v22 = vpop.f32.mrf.mxu2  ;;  %v1100_v27 = vpop.f32.mrf.mxu3  ;;  %1976 = vmatpush.bf16.msrb.mxu2 %v1945_v19  ;;  %v5422_v23 = vld [vmem:[%s7265_s3 + $0xbc] sm:$0xf0]  ;;  %v5421_v24 = vld [vmem:[%s7265_s3 + $0xb8] sm:$0xf]  ;;  %v4538_v19 = vld [vmem:[%s7265_s3 + $0x30] sm:$0xf] }
 0x104   :  { %v1016_v50 = vadd.f32 %v1015_v15, %v981_v22  ;;  %v1942_v15 = vsel %vm1937_vm1, %v1919_v11, 0  ;;  %v4499_v22 = vld [vmem:[%s7265_s3 + $0xb4] sm:$0xf]  ;;  %v4465_v11 = vld [vmem:[%s7265_s3 + $0x78] sm:$0xf0] }
 0x105   :  { %1963 = vmatpush.bf16.msra.mxu1 %v1942_v15 }
 0x10a   :  { %v919_v33 = vpop.f32.mrf.mxu1  ;;  %v1032_v34 = vpop.f32.mrf.mxu0 }
 0x10b   :  { %v983_v32 = vpop.f32.mrf.mxu2  ;;  %v923_v36 = vadd.f32 %v919_v33, %v866_v31  ;;  %v1102_v37 = vpop.f32.mrf.mxu3  ;;  %v4508_v33 = vor.u32 %v5423_v30, %v4507_v29  ;;  %v4526_v29 = vld [vmem:[%s7265_s3 + $0x18] sm:$0xf]  ;;  %v5404_v30 = vld [vmem:[%s7265_s3 + $0x20] sm:$0xf0] }
 0x10c   :  { %v4504_v32 = vor.u32 %v5421_v24, %v4501_v28  ;;  %v5419_v37 = vld [vmem:[%s7265_s3 + $0xa4] sm:$0xf0] }
 0x10d   :  { %v926_v38 = vadd.f32 %v6026_v8, %v923_v36  ;;  %1977 = vmatpush.bf16.msrb.mxu2 %v4508_v33  ;;  %v4487_v36 = vld [vmem:[%s7265_s3 + $0x9c] sm:$0xf] }
 0x10e   :  { %1964 = vmatpush.bf16.msra.mxu1 %v4504_v32  ;;  %v5409_v32 = vld [vmem:[%s7265_s3 + $0x4c] sm:$0xf] }
 0x10f   :  { %v927_v40 = vmax.f32 %v926_v38, 0.0  ;;  %v5418_v38 = vld [vmem:[%s7265_s3 + $0xa0] sm:$0xf] }
 0x111   :  { %v6128_v42 = vmax.f32 %v925_v39, %v927_v40  ;;  %v4488_v39 = vor.u32 %v5419_v37, %v4487_v36  ;;  %v4489_v40 = vld [vmem:[%s7265_s3 + $0xa8] sm:$0xf0]  ;;  %v4558_v36 = vld [vmem:[%s7265_s3 + $0x50] sm:$0xf] }
 0x112   :  { %v921_v43 = vpop.f32.mrf.mxu1  ;;  %v1034_v44 = vpop.f32.mrf.mxu0 }
 0x113   :  { %v1082_v41 = vpop.f32.mrf.mxu2  ;;  %930 = vrot.lane.b32.xlu1 %v6128_v42, %s5569_s19  ;;  %v1214_v45 = vpop.f32.mrf.mxu3  ;;  %v5420_v43 = vld [vmem:[%s7265_s3 + $0xac] sm:$0xf0] }
 0x114   :  { %v1086_v54 = vadd.f32 %v1082_v41, %v1016_v50  ;;  %v4495_v41 = vld [vmem:[%s7265_s3 + $0xa4] sm:$0xf] }
 0x11a   :  { %v1045_v47 = vpop.f32.mrf.mxu1  ;;  %v1138_v48 = vpop.f32.mrf.mxu0 }
 0x11b   :  { %v1084_v46 = vpop.f32.mrf.mxu2  ;;  %v1216_v49 = vpop.f32.mrf.mxu3  ;;  %v1046_v56 = vadd.f32 %v1045_v47, %v1032_v34  ;;  %v1142_v57 = vadd.f32 %v1138_v48, %v1086_v54  ;;  %v1839_v34 = vld [vmem:[%s7265_s3 + $0x60] sm:$0x11] }
 0x11c   :  { %v2028_v35 = vunpack.c.l.b16 %v1839_v34  ;;  %v4496_v46 = vor.u32 %v5420_v43, %v4495_v41  ;;  %v2029_v3 = vunpack.c.h.b16 %v1839_v34  ;;  %v4527_v34 = vor.u32 %v5404_v30, %v4526_v29  ;;  %v5406_v43 = vld [vmem:[%s7265_s3 + $0x34] sm:$0xf] }
 0x11d   :  { %v1104_v58 = vadd.f32 %v1100_v27, %v1046_v56  ;;  %v4500_v27 = vor.u32 %v5422_v23, %v4499_v22  ;;  %v4477_v56 = vld [vmem:[%s7265_s3 + $0x90] sm:$0xf0] }
 0x11e   :  { %v2043_v44 = vpack.c.b16 %v2028_v35, %v2028_v35  ;;  %1978 = vmatpush.bf16.msrb.mxu2 %v4496_v46  ;;  %v2044_v14 = vpack.c.b16 %v2029_v3, %v2029_v3  ;;  %v4552_v35 = vld [vmem:[%s7265_s3 + $0x54] sm:$0xf0] }
 0x11f   :  { %1951 = vmatpush.bf16.msrb.mxu0 %v4500_v27  ;;  %v4555_v37 = vor.u32 %v5409_v32, %v4552_v35 }
 0x120   :  { %v2062_v48 = vsel %vm1937_vm1, %v2043_v44, 0  ;;  %v2065_v23 = vsel %vm1937_vm1, %v2044_v14, 0  ;;  %v4540_v44 = vld [vmem:[%s7265_s3 + $0x3c] sm:$0xf0] }
 0x121   :  { %2073 = vmatpush.bf16.msra.mxu3 %v2062_v48  ;;  %v5408_v48 = vld [vmem:[%s7265_s3 + $0x40] sm:$0xf0] }
 0x122   :  { %v1047_v52 = vpop.f32.mrf.mxu1  ;;  %v1140_v53 = vpop.f32.mrf.mxu0 }
 0x123   :  { %v1195_v51 = vpop.f32.mrf.mxu2  ;;  %v6132_v55 = vpop.f32.mrf.mxu3  ;;  %1952 = vmatpush.bf16.msrb.mxu0 %v4488_v39  ;;  %v5416_v52 = vld [vmem:[%s7265_s3 + $0x8c] sm:$0xf0]  ;;  %v5415_v53 = vld [vmem:[%s7265_s3 + $0x88] sm:$0xf]  ;;  %v4514_v39 = vld [vmem:[%s7265_s3] sm:$0xf] }
 0x124   :  { %v1199_v59 = vadd.f32 %v1195_v51, %v1142_v57  ;;  %v4475_v51 = vld [vmem:[%s7265_s3 + $0x84] sm:$0xf]  ;;  %v4483_v57 = vld [vmem:[%s7265_s3 + $0x8c] sm:$0xf] }
 0x125   :  { %v4476_v54 = vor.u32 %v5416_v52, %v4475_v51 }
 0x126   :  { %v1219_v6 = vadd.f32 %v6026_v8, %v1199_v59 }
 0x127   :  { %1953 = vmatpush.bf16.msrb.mxu0 %v4476_v54 }
 0x128   :  { %v1220_v16 = vmax.f32 %v1219_v6, 0.0  ;;  %v4463_v6 = vld [vmem:[%s7265_s3 + $0x6c] sm:$0xf] }
 0x12a   :  { %v1157_v61 = vpop.f32.mrf.mxu1  ;;  %v6134_v62 = vpop.f32.mrf.mxu0 }
 0x12b   :  { %v1197_v60 = vpop.f32.mrf.mxu2  ;;  %v1161_v63 = vadd.f32 %v1157_v61, %v1104_v58  ;;  %v1342_v1 = vpop.f32.mrf.mxu3  ;;  %v5417_v58 = vld [vmem:[%s7265_s3 + $0x94] sm:$0xf0] }
 0x12c   :  { %v4480_v60 = vor.u32 %v5415_v53, %v4477_v56  ;;  %v4484_v61 = vor.u32 %v5417_v58, %v4483_v57  ;;  %v1840_v1 = vld [vmem:[%s7265_s3 + $0x68] sm:$0x1]  ;;  %v5403_v56 = vld [vmem:[%s7265_s3 + $0x1c] sm:$0xf]  ;;  %v4534_v58 = vld [vmem:[%s7265_s3 + $0x20] sm:$0xf] }
 0x12d   :  { %v1218_v7 = vadd.f32 %v1214_v45, %v1161_v63  ;;  %v4492_v45 = vor.u32 %v5418_v38, %v4489_v40  ;;  %v4550_v63 = vld [vmem:[%s7265_s3 + $0x48] sm:$0xf]  ;;  %v2030_v5 = vunpack.c.l.b16 %v1840_v1  ;;  %v5411_v38 = vld [vmem:[%s7265_s3 + $0x58] sm:$0xf0]  ;;  %v5401_v40 = vld [vmem:[%s7265_s3 + $0x8] sm:$0xf0] }
 0x12e   :  { %v4551_v2 = vor.u32 %v5410_v0, %v4550_v63  ;;  %1979 = vmatpush.bf16.msrb.mxu2 %v4484_v61  ;;  %v4559_v41 = vor.u32 %v5411_v38, %v4558_v36  ;;  %v4515_v46 = vor.u32 %v5401_v40, %v4514_v39  ;;  %v4528_v57 = vld [vmem:[%s7265_s3 + $0x24] sm:$0xf0]  ;;  %v5405_v61 = vld [vmem:[%s7265_s3 + $0x28] sm:$0xf0]  ;;  %v5400_v0 = vld [vmem:[%s7265_s3 + $0x4] sm:$0xf] }
 0x12f   :  { %v1221_v12 = vadd.f32 %v6026_v8, %v1218_v7  ;;  %1965 = vmatpush.bf16.msra.mxu1 %v4492_v45  ;;  %v5413_v7 = vld [vmem:[%s7265_s3 + $0x74] sm:$0xf0]  ;;  %v2045_v15 = vpack.c.b16 %v2030_v5, %v2030_v5  ;;  %v4535_v63 = vor.u32 %v5405_v61, %v4534_v58  ;;  %v4516_v1 = vld [vmem:[%s7265_s3 + $0xc] sm:$0xf0]  ;;  %v5402_v5 = vld [vmem:[%s7265_s3 + $0x10] sm:$0xf0] }
 0x130   :  { %2074 = vmatpush.bf16.msra.mxu3 %v4551_v2  ;;  %v4464_v10 = vor.u32 %v5413_v7, %v4463_v6  ;;  %v4546_v45 = vld [vmem:[%s7265_s3 + $0x38] sm:$0xf]  ;;  %v4522_v2 = vld [vmem:[%s7265_s3 + $0x8] sm:$0xf]  ;;  %v4519_v6 = vor.u32 %v5400_v0, %v4516_v1  ;;  %v5430_v0 = vld [vmem:[%s7265_s3 + $0x10c] sm:$0xf] }
 0x131   :  { %v1222_v17 = vmax.f32 %v1221_v12, 0.0  ;;  %v4471_v12 = vld [vmem:[%s7265_s3 + $0x74] sm:$0xf]  ;;  %v2068_v24 = vsel %vm1937_vm1, %v2045_v15, 0  ;;  %v4547_v51 = vor.u32 %v5408_v48, %v4546_v45  ;;  %v4523_v7 = vor.u32 %v5402_v5, %v4522_v2  ;;  %v4619_v45 = vld [vmem:[%s7265_s3 + $0x120] sm:$0xf] }
 0x132   :  { %v1159_v20 = vpop.f32.mrf.mxu1  ;;  %v1278_v21 = vpop.f32.mrf.mxu0  ;;  %1954 = vmatpush.bf16.msrb.mxu0 %v4464_v10  ;;  %v4607_v61 = vld [vmem:[%s7265_s3 + $0x108] sm:$0xf]  ;;  %v4609_v2 = vld [vmem:[%s7265_s3 + $0x114] sm:$0xf0]  ;;  %v5432_v5 = vld [vmem:[%s7265_s3 + $0x118] sm:$0xf0] }
 0x133   :  { %v6146_v18 = vpop.f32.mrf.mxu2  ;;  %v6158_v26 = vmax.f32 %v1220_v16, %v1222_v17  ;;  %v6169_v31 = vpop.f32.mrf.mxu3  ;;  %1966 = vmatpush.bf16.msra.mxu1 %v4480_v60  ;;  %v4468_v16 = vor.u32 %v5412_v9, %v4465_v11  ;;  %v4472_v17 = vor.u32 %v5414_v13, %v4471_v12  ;;  %v5407_v20 = vld [vmem:[%s7265_s3 + $0x38] sm:$0xf0]  ;;  %v4531_v60 = vor.u32 %v5403_v56, %v4528_v57  ;;  %v5435_v56 = vld [vmem:[%s7265_s3 + $0x130] sm:$0xf0] }
 0x134   :  { %v4539_v22 = vor.u32 %v5407_v20, %v4538_v19  ;;  %v1341_v9 = vadd.f32 %v6132_v55, %v6146_v18 }
 0x135   :  { %1225 = vrot.lane.b32.xlu1 %v6158_v26, %s5569_s19  ;;  %1980 = vmatpush.bf16.msrb.mxu2 %v4472_v17 }
 0x136   :  { %2075 = vmatpush.bf16.msra.mxu3 %v4539_v22  ;;  %2086 = vmatpush.bf16.msra.mxu0 %v2065_v23  ;;  %v4580_v23 = vld [vmem:[%s7265_s3 + $0x140] sm:$0x1] }
 0x137   :  { %1967 = vmatpush.bf16.msra.mxu1 %v4468_v16 }
 0x13a   :  { %v6195_v49 = vpop.f32.mrf.mxu1  ;;  %v6197_v50 = vpop.f32.mrf.mxu0  ;;  %2076 = vmatpush.bf16.msra.mxu3 %v4527_v34  ;;  %2087 = vmatpush.bf16.msra.mxu0 %v4555_v37 }
 0x13b   :  { %v1329_v47 = vpop.f32.mrf.mxu2  ;;  %v1454_v59 = vpop.f32.mrf.mxu3  ;;  %2099 = vmatpush.bf16.msrb.mxu1 %v2068_v24  ;;  %v1311_v3 = vadd.f32 %v6195_v49, %v6134_v62 }
 0x13c   :  { %v4543_v47 = vor.u32 %v5406_v43, %v4540_v44 }
 0x13d   :  { %v1381_v11 = vadd.f32 %v6197_v50, %v1311_v3  ;;  %v4615_v3 = vld [vmem:[%s7265_s3 + $0x110] sm:$0xf] }
 0x13e   :  { %2077 = vmatpush.bf16.msra.mxu3 %v4515_v46  ;;  %2088 = vmatpush.bf16.msra.mxu0 %v4543_v47  ;;  %v5434_v46 = vld [vmem:[%s7265_s3 + $0x128] sm:$0xf0] }
 0x13f   :  { %2100 = vmatpush.bf16.msrb.mxu1 %v4559_v41 }
 0x142   :  { %v1312_v27 = vpop.f32.mrf.mxu1  ;;  %v1379_v28 = vpop.f32.mrf.mxu0  ;;  %2089 = vmatpush.bf16.msra.mxu0 %v4531_v60 }
 0x143   :  { %v1433_v21 = vpop.f32.mrf.mxu2  ;;  %v6261_v33 = vpop.f32.mrf.mxu3  ;;  %2101 = vmatpush.bf16.msrb.mxu1 %v4547_v51 }
 0x144   :  { %v1437_v14 = vadd.f32 %v1433_v21, %v1381_v11  ;;  %v4579_v21 = vld [vmem:[%s7265_s3 + $0x138] sm:$0x11]  ;;  %v4595_v11 = vld [vmem:[%s7265_s3 + $0xf0] sm:$0xf] }
 0x145   :  { %v2172_v27 = vunpack.c.h.b16 %v4579_v21 }
 0x146   :  { %2090 = vmatpush.bf16.msra.mxu0 %v4519_v6  ;;  %v4612_v6 = vor.u32 %v5430_v0, %v4609_v2  ;;  %v4684_v2 = vld [vmem:[%s7265_s3 + $0x17c] sm:$0xf] }
 0x147   :  { %2102 = vmatpush.bf16.msrb.mxu1 %v4535_v63  ;;  %v2187_v32 = vpack.c.b16 %v2172_v27, %v2172_v27  ;;  %v5431_v63 = vld [vmem:[%s7265_s3 + $0x110] sm:$0xf0] }
 0x148   :  { %v4608_v1 = vor.u32 %v5431_v63, %v4607_v61 }
 0x149   :  { %v2208_v39 = vsel %vm1937_vm1, %v2187_v32, 0 }
 0x14a   :  { %v1395_v53 = vpop.f32.mrf.mxu1  ;;  %v1490_v54 = vpop.f32.mrf.mxu0  ;;  %2229 = vmatpush.bf16.msrb.mxu3 %v2208_v39 }
 0x14b   :  { %v1435_v52 = vpop.f32.mrf.mxu2  ;;  %v1607_v59 = vpop.f32.mrf.mxu3  ;;  %2103 = vmatpush.bf16.msrb.mxu1 %v4523_v7  ;;  %v1399_v49 = vadd.f32 %v1395_v53, %v1341_v9  ;;  %v1494_v15 = vadd.f32 %v1490_v54, %v1437_v14  ;;  %v4621_v53 = vld [vmem:[%s7265_s3 + $0x12c] sm:$0xf0]  ;;  %v4627_v54 = vld [vmem:[%s7265_s3 + $0x128] sm:$0xf]  ;;  %v4616_v9 = vor.u32 %v5432_v5, %v4615_v3 }
 0x14c   :  { %v4620_v52 = vor.u32 %v5434_v46, %v4619_v45  ;;  %v4628_v60 = vor.u32 %v5435_v56, %v4627_v54  ;;  %v4690_v54 = vld [vmem:[%s7265_s3 + $0x198] sm:$0xf0]  ;;  %v5444_v3 = vld [vmem:[%s7265_s3 + $0x184] sm:$0xf0] }
 0x14d   :  { %v1456_v19 = vadd.f32 %v6169_v31, %v1399_v49  ;;  %v1514_v18 = vadd.f32 %v6026_v8, %v1494_v15  ;;  %v2173_v31 = vunpack.c.l.b16 %v4580_v23  ;;  %v4597_v15 = vld [vmem:[%s7265_s3 + $0xfc] sm:$0xf0]  ;;  %v4585_v23 = vld [vmem:[%s7265_s3 + $0xe4] sm:$0xf0] }
 0x14f   :  { %v2188_v34 = vpack.c.b16 %v2173_v31, %v2173_v31  ;;  %v1515_v35 = vmax.f32 %v1514_v18, 0.0 }
 0x151   :  { %v2211_v41 = vsel %vm1937_vm1, %v2188_v34, 0 }
 0x152   :  { %v1397_v12 = vpop.f32.mrf.mxu1  ;;  %v1492_v13 = vpop.f32.mrf.mxu0 }
 0x153   :  { %v6318_v10 = vpop.f32.mrf.mxu2  ;;  %v6321_v62 = vpop.f32.mrf.mxu3  ;;  %v5428_v12 = vld [vmem:[%s7265_s3 + $0xf8] sm:$0xf0]  ;;  %v5427_v13 = vld [vmem:[%s7265_s3 + $0xf4] sm:$0xf] }
 0x154   :  { %v4596_v49 = vor.u32 %v5428_v12, %v4595_v11  ;;  %v4600_v18 = vor.u32 %v5427_v13, %v4597_v15 }
 0x157   :  { %v636_v16 = vpop.permute.xlu0 %635 }
 0x158   :  { %v638_v17 = vmax.f32 %v6111_v4, %v636_v16  ;;  %v2171_v4 = vunpack.c.l.b16 %v4579_v21  ;;  %v4603_v16 = vld [vmem:[%s7265_s3 + $0xf8] sm:$0xf]  ;;  %v5424_v21 = vld [vmem:[%s7265_s3 + $0xdc] sm:$0xf] }
 0x15a   :  { %v639_v20 = vpack.c.bf16 %v638_v17, %v638_v17  ;;  %v1509_v50 = vpop.f32.mrf.mxu1  ;;  %v6326_v22 = vpop.f32.mrf.mxu0  ;;  %v2186_v30 = vpack.c.b16 %v2171_v4, %v2171_v4  ;;  %v5429_v17 = vld [vmem:[%s7265_s3 + $0x100] sm:$0xf0]  ;;  %v1606_v4 = vadd.f32 %v6261_v33, %v6318_v10 }
 0x15b   :  { %v1573_v55 = vpop.f32.mrf.mxu2  ;;  %v1513_v24 = vadd.f32 %v1509_v50, %v1456_v19  ;;  %v1692_v28 = vpop.f32.mrf.mxu3  ;;  %v5425_v50 = vld [vmem:[%s7265_s3 + $0xe0] sm:$0xf0]  ;;  %v4604_v27 = vor.u32 %v5429_v17, %v4603_v16  ;;  %v5442_v17 = vld [vmem:[%s7265_s3 + $0x178] sm:$0xf] }
 0x15c   :  { %641 = vst.msk [vmem:[#allocation2 + $0x4] sm:$0xf] %vm345_vm2, %v639_v20  ;;  %v2205_v38 = vsel %vm1937_vm1, %v2186_v30, 0  ;;  %v4583_v20 = vld [vmem:[%s7265_s3 + $0xd8] sm:$0xf]  ;;  %v4588_v28 = vor.u32 %v5424_v21, %v4585_v23 }
 0x15d   :  { %v1516_v29 = vadd.f32 %v6026_v8, %v1513_v24  ;;  %2216 = vmatpush.bf16.msra.mxu2 %v2205_v38  ;;  %v4584_v31 = vor.u32 %v5425_v50, %v4583_v20  ;;  %v5426_v30 = vld [vmem:[%s7265_s3 + $0xe8] sm:$0xf0]  ;;  %v4648_v38 = vld [vmem:[%s7265_s3 + $0x1a4] sm:$0x11]  ;;  %v5441_v20 = vld [vmem:[%s7265_s3 + $0x16c] sm:$0xf0] }
 0x15e   :  { %v6491_v23 = vld [vmem:[%s7265_s3 + $0xcc] sm:$0x11] }
 0x15f   :  { %v1517_v36 = vmax.f32 %v1516_v29, 0.0  ;;  %v341_v37 = vpop.permute.xlu0 %340  ;;  %v4591_v29 = vld [vmem:[%s7265_s3 + $0xe0] sm:$0xf] }
 0x160   :  { %v343_v40 = vmax.f32 %v6050_v25, %v341_v37  ;;  %v5433_v25 = vld [vmem:[%s7265_s3 + $0x124] sm:$0xf]  ;;  %v4649_v37 = vld [vmem:[%s7265_s3 + $0x1ac] sm:$0x1] }
 0x161   :  { %v6340_v43 = vmax.f32 %v1515_v35, %v1517_v36  ;;  %v4624_v58 = vor.u32 %v5433_v25, %v4621_v53  ;;  %2217 = vmatpush.bf16.msra.mxu2 %v4620_v52  ;;  %v4592_v35 = vor.u32 %v5426_v30, %v4591_v29  ;;  %v2319_v39 = vunpack.c.l.b16 %v4649_v37  ;;  %v5445_v53 = vld [vmem:[%s7265_s3 + $0x190] sm:$0xf]  ;;  %v4666_v29 = vld [vmem:[%s7265_s3 + $0x168] sm:$0xf0]  ;;  %v5436_v37 = vld [vmem:[%s7265_s3 + $0x148] sm:$0xf] }
 0x162   :  { %v344_v47 = vpack.c.bf16 %v343_v40, %v343_v40  ;;  %v1511_v48 = vpop.f32.mrf.mxu1  ;;  %v1624_v51 = vpop.f32.mrf.mxu0  ;;  %v2317_v40 = vunpack.c.l.b16 %v4648_v38  ;;  %v4660_v30 = vld [vmem:[%s7265_s3 + $0x14c] sm:$0xf] }
 0x163   :  { %v1672_v44 = vpop.f32.mrf.mxu2  ;;  %1520 = vrot.lane.b32.xlu2 %v6340_v43, %s5569_s19  ;;  %v1841_v57 = vld [vmem:[#allocation2 + $0x4] sm:$0xf]  ;;  %v6365_v59 = vpop.f32.mrf.mxu3  ;;  %2230 = vmatpush.bf16.msrb.mxu3 %v4624_v58  ;;  %v2334_v45 = vpack.c.b16 %v2319_v39, %v2319_v39  ;;  %v4688_v48 = vld [vmem:[%s7265_s3 + $0x18c] sm:$0xf]  ;;  %v5446_v51 = vld [vmem:[%s7265_s3 + $0x194] sm:$0xf0] }
 0x164   :  { %346 = vst.msk [vmem:[#allocation2] sm:$0xf] %vm345_vm2, %v344_v47  ;;  %4509 = vmatmul.msk.bf16.vlgmr.msrb.gmra.mxu0 %vm1933_vm3, %v1841_v57  ;;  %4510 = vmatmul.msk.bf16.vlgmr.msra.gmra.mxu1 %vm1933_vm3, %v1841_v57  ;;  %v1676_v32 = vadd.f32 %v1672_v44, %v1606_v4  ;;  %v2332_v46 = vpack.c.b16 %v2317_v40, %v2317_v40  ;;  %v5447_v47 = vld [vmem:[%s7265_s3 + $0x19c] sm:$0xf0]  ;;  %v4664_v4 = vld [vmem:[%s7265_s3 + $0x15c] sm:$0xf] }
 0x165   :  { %4511 = vmatmul.msk.bf16.vlgmr.msrb.gmra.mxu2 %vm1933_vm3, %v1841_v57  ;;  %2242 = vmatpush.bf16.msrb.mxu0 %v2211_v41  ;;  %v2318_v41 = vunpack.c.h.b16 %v4648_v38  ;;  %v2357_v56 = vsel %vm1937_vm1, %v2334_v45, 0  ;;  %v4654_v38 = vld [vmem:[%s7265_s3 + $0x150] sm:$0xf0] }
 0x166   :  { %2218 = vmatpush.bf16.msra.mxu2 %v4608_v1  ;;  %v2351_v57 = vsel %vm1937_vm1, %v2332_v46, 0  ;;  %v4693_v1 = vor.u32 %v5445_v53, %v4690_v54  ;;  %v4826_v45 = vld [vmem:[%s7265_s3 + $0xb4] sm:$0xf]  ;;  %v5482_v46 = vld [vmem:[%s7265_s3 + $0xbc] sm:$0xf0] }
 0x167   :  { %2231 = vmatpush.bf16.msrb.mxu3 %v4612_v6  ;;  %v2333_v25 = vpack.c.b16 %v2318_v41, %v2318_v41  ;;  %2362 = vmatpush.bf16.msra.mxu1 %v2351_v57  ;;  %v4717_v41 = vld [vmem:[%s7265_s3 + $0x210] sm:$0x11] }
 0x169   :  { %2243 = vmatpush.bf16.msrb.mxu0 %v4628_v60  ;;  %v2354_v58 = vsel %vm1937_vm1, %v2333_v25, 0  ;;  %v2463_v25 = vunpack.c.l.b16 %v4717_v41 }
 0x16a   :  { %v1635_v14 = vpop.f32.mrf.mxu1  ;;  %2219 = vmatpush.bf16.msra.mxu2 %v4596_v49 }
 0x16b   :  { %v1674_v7 = vpop.f32.mrf.mxu2  ;;  %v1822_v19 = vld [vmem:[#allocation2] sm:$0xf]  ;;  %v1728_v55 = vpop.f32.mrf.mxu0  ;;  %2232 = vmatpush.bf16.msrb.mxu3 %v4600_v18  ;;  %v1636_v33 = vadd.f32 %v1635_v14, %v6326_v22  ;;  %v4696_v22 = vld [vmem:[%s7265_s3 + $0x194] sm:$0xf]  ;;  %v4678_v18 = vld [vmem:[%s7265_s3 + $0x180] sm:$0xf0] }
 0x16c   :  { %4560 = vmatmul.msk.bf16.vlgmr.msra.gmra.mxu3 %vm1933_vm3, %v1822_v19  ;;  %v1806_v24 = vpop.f32.mrf.mxu3  ;;  %v1732_v44 = vadd.f32 %v1728_v55, %v1676_v32  ;;  %v4697_v63 = vor.u32 %v5447_v47, %v4696_v22  ;;  %v4681_v50 = vor.u32 %v5442_v17, %v4678_v18  ;;  %v5438_v32 = vld [vmem:[%s7265_s3 + $0x154] sm:$0xf0]  ;;  %v4657_v22 = vor.u32 %v5436_v37, %v4654_v38  ;;  %v4753_v17 = vld [vmem:[%s7265_s3 + $0x1e8] sm:$0xf] }
 0x16d   :  { %2244 = vmatpush.bf16.msrb.mxu0 %v4616_v9  ;;  %v1694_v52 = vadd.f32 %v6321_v62, %v1636_v33  ;;  %v4689_v62 = vor.u32 %v5446_v51, %v4688_v48  ;;  %v4685_v9 = vor.u32 %v5444_v3, %v4684_v2  ;;  %v2645_v24 = vunpack.c.l.b16 %v6491_v23  ;;  %v4652_v33 = vld [vmem:[%s7265_s3 + $0x144] sm:$0xf]  ;;  %v5457_v2 = vld [vmem:[%s7265_s3 + $0x1fc] sm:$0xf]  ;;  %v4759_v3 = vld [vmem:[%s7265_s3 + $0x204] sm:$0xf0] }
 0x16e   :  { %2220 = vmatpush.bf16.msra.mxu2 %v4584_v31  ;;  %v5439_v31 = vld [vmem:[%s7265_s3 + $0x160] sm:$0xf]  ;;  %v2464_v47 = vunpack.c.h.b16 %v4717_v41  ;;  %v5450_v41 = vld [vmem:[%s7265_s3 + $0x1c0] sm:$0xf0] }
 0x16f   :  { %2233 = vmatpush.bf16.msrb.mxu3 %v4588_v28  ;;  %2363 = vmatpush.bf16.msra.mxu1 %v4689_v62  ;;  %v4757_v62 = vld [vmem:[%s7265_s3 + $0x1f8] sm:$0xf] }
 0x170   :  { %v2479_v53 = vpack.c.b16 %v2464_v47, %v2464_v47 }
 0x171   :  { %2245 = vmatpush.bf16.msrb.mxu0 %v4604_v27  ;;  %v5440_v27 = vld [vmem:[%s7265_s3 + $0x164] sm:$0xf0] }
 0x172   :  { %v1637_v36 = vpop.f32.mrf.mxu1  ;;  %2375 = vmatpush.bf16.msrb.mxu2 %v2354_v58  ;;  %v4665_v28 = vor.u32 %v5440_v27, %v4664_v4  ;;  %v2500_v58 = vsel %vm1937_vm1, %v2479_v53, 0  ;;  %v5451_v4 = vld [vmem:[%s7265_s3 + $0x1cc] sm:$0xf] }
 0x173   :  { %v1785_v34 = vpop.f32.mrf.mxu2  ;;  %v1730_v10 = vpop.f32.mrf.mxu0  ;;  %2388 = vmatpush.bf16.msra.mxu3 %v2357_v56  ;;  %v4661_v36 = vor.u32 %v5438_v32, %v4660_v30  ;;  %v4827_v56 = vor.u32 %v5482_v46, %v4826_v45  ;;  %v2582_v45 = vld [vmem:[%s7265_s3 + $0x60] sm:$0x11]  ;;  %v5481_v46 = vld [vmem:[%s7265_s3 + $0xb8] sm:$0xf] }
 0x174   :  { %4561 = vmatmul.msk.bf16.vlgmr.msra.gmra.mxu0 %vm1933_vm3, %v1822_v19  ;;  %4562 = vmatmul.msk.bf16.vlgmr.msrb.gmra.mxu1 %vm1933_vm3, %v1822_v19  ;;  %v1789_v60 = vadd.f32 %v1785_v34, %v1732_v44  ;;  %v2660_v34 = vpack.c.b16 %v2645_v24, %v2645_v24  ;;  %v5437_v10 = vld [vmem:[%s7265_s3 + $0x14c] sm:$0xf0]  ;;  %v4718_v44 = vld [vmem:[%s7265_s3 + $0x218] sm:$0x1]  ;;  %v5452_v24 = vld [vmem:[%s7265_s3 + $0x1d0] sm:$0xf0]  ;;  %v2769_v53 = vunpack.c.h.b16 %v2582_v45 }
 0x175   :  { %2246 = vmatpush.bf16.msrb.mxu0 %v4592_v35  ;;  %v4669_v35 = vor.u32 %v5439_v31, %v4666_v29  ;;  %v4653_v40 = vor.u32 %v5437_v10, %v4652_v33  ;;  %v2465_v48 = vunpack.c.l.b16 %v4718_v44  ;;  %v4735_v31 = vld [vmem:[%s7265_s3 + $0x1d4] sm:$0xf0]  ;;  %v5453_v29 = vld [vmem:[%s7265_s3 + $0x1d8] sm:$0xf0]  ;;  %v5448_v10 = vld [vmem:[%s7265_s3 + $0x1b4] sm:$0xf] }
 0x176   :  { %v1809_v6 = vadd.f32 %v6026_v8, %v1789_v60  ;;  %2376 = vmatpush.bf16.msrb.mxu2 %v4693_v1  ;;  %v2679_v39 = vsel %vm1937_vm1, %v2660_v34, 0  ;;  %v4738_v32 = vor.u32 %v5451_v4, %v4735_v31  ;;  %v5449_v33 = vld [vmem:[%s7265_s3 + $0x1b8] sm:$0xf0] }
 0x177   :  { %2389 = vmatpush.bf16.msra.mxu3 %v4697_v63  ;;  %v2480_v54 = vpack.c.b16 %v2465_v48, %v2465_v48  ;;  %v5479_v63 = vld [vmem:[%s7265_s3 + $0xa4] sm:$0xf0]  ;;  %v4787_v48 = vld [vmem:[%s7265_s3 + $0xd4] sm:$0x1] }
 0x178   :  { %v1810_v12 = vmax.f32 %v1809_v6, 0.0 }
 0x179   :  { %v2503_v60 = vsel %vm1937_vm1, %v2480_v54, 0 }
 0x17a   :  { %v1747_v0 = vpop.f32.mrf.mxu1  ;;  %2377 = vmatpush.bf16.msrb.mxu2 %v4681_v50  ;;  %v5473_v50 = vld [vmem:[%s7265_s3 + $0x74] sm:$0xf0] }
 0x17b   :  { %v1787_v61 = vpop.f32.mrf.mxu2  ;;  %v1751_v5 = vadd.f32 %v1747_v0, %v1694_v52  ;;  %2390 = vmatpush.bf16.msra.mxu3 %v4685_v9  ;;  %v2478_v52 = vpack.c.b16 %v2463_v25, %v2463_v25  ;;  %v5458_v0 = vld [vmem:[%s7265_s3 + $0x200] sm:$0xf0]  ;;  %v5459_v9 = vld [vmem:[%s7265_s3 + $0x208] sm:$0xf0] }
 0x17c   :  { %v4814_v61 = vld [vmem:[%s7265_s3 + $0x9c] sm:$0xf]  ;;  %v4758_v1 = vor.u32 %v5458_v0, %v4757_v62  ;;  %v4828_v25 = vld [vmem:[%s7265_s3 + $0xc0] sm:$0xf0]  ;;  %v4804_v62 = vld [vmem:[%s7265_s3 + $0x90] sm:$0xf0] }
 0x17d   :  { %v1808_v7 = vadd.f32 %v6365_v59, %v1751_v5  ;;  %v4676_v59 = vld [vmem:[%s7265_s3 + $0x174] sm:$0xf]  ;;  %v2497_v57 = vsel %vm1937_vm1, %v2478_v52, 0  ;;  %v4765_v5 = vld [vmem:[%s7265_s3 + $0x200] sm:$0xf]  ;;  %v4815_v6 = vor.u32 %v5479_v63, %v4814_v61  ;;  %v2784_v63 = vpack.c.b16 %v2769_v53, %v2769_v53 }
 0x17e   :  { %2378 = vmatpush.bf16.msrb.mxu2 %v4669_v35  ;;  %2508 = vmatpush.bf16.msra.mxu0 %v2497_v57  ;;  %v2646_v35 = vunpack.c.h.b16 %v6491_v23  ;;  %v4723_v23 = vld [vmem:[%s7265_s3 + $0x1bc] sm:$0xf0]  ;;  %v2768_v57 = vunpack.c.l.b16 %v2582_v45 }
 0x17f   :  { %v1811_v11 = vadd.f32 %v6026_v8, %v1808_v7  ;;  %v5443_v8 = vld [vmem:[%s7265_s3 + $0x17c] sm:$0xf0]  ;;  %v4762_v7 = vor.u32 %v5457_v2, %v4759_v3  ;;  %v5472_v3 = vld [vmem:[%s7265_s3 + $0x70] sm:$0xf] }
 0x180   :  { %v4677_v55 = vor.u32 %v5443_v8, %v4676_v59  ;;  %v4747_v8 = vld [vmem:[%s7265_s3 + $0x1ec] sm:$0xf0]  ;;  %v2661_v38 = vpack.c.b16 %v2646_v35, %v2646_v35  ;;  %v4853_v35 = vld [vmem:[%s7265_s3 + $0x18] sm:$0xf]  ;;  %v5474_v45 = vld [vmem:[%s7265_s3 + $0x7c] sm:$0xf0] }
 0x181   :  { %v1812_v13 = vmax.f32 %v1811_v11, 0.0  ;;  %v4802_v11 = vld [vmem:[%s7265_s3 + $0x84] sm:$0xf] }
 0x182   :  { %v1749_v14 = vpop.f32.mrf.mxu1  ;;  %2364 = vmatpush.bf16.msra.mxu1 %v4677_v55  ;;  %2379 = vmatpush.bf16.msrb.mxu2 %v4657_v22  ;;  %v2682_v22 = vsel %vm1937_vm1, %v2661_v38, 0 }
 0x183   :  { %v6465_v49 = vmax.f32 %v1810_v12, %v1812_v13  ;;  %v5476_v12 = vld [vmem:[%s7265_s3 + $0x8c] sm:$0xf0]  ;;  %v4766_v13 = vor.u32 %v5459_v9, %v4765_v5  ;;  %v4745_v14 = vld [vmem:[%s7265_s3 + $0x1e0] sm:$0xf]  ;;  %2509 = vmatpush.bf16.msra.mxu0 %v4758_v1  ;;  %v2783_v1 = vpack.c.b16 %v2768_v57, %v2768_v57  ;;  %v4792_v5 = vld [vmem:[%s7265_s3 + $0x78] sm:$0xf0] }
 0x184   :  { %v4879_v9 = vld [vmem:[%s7265_s3 + $0x54] sm:$0xf0] }
 0x185   :  { %1815 = vrot.lane.b32.xlu2 %v6465_v49, %s5569_s19  ;;  %v931_v15 = vpop.permute.xlu1 %930 }
 0x186   :  { %v933_v16 = vmax.f32 %v6128_v42, %v931_v15  ;;  %v4672_v42 = vld [vmem:[%s7265_s3 + $0x164] sm:$0xf]  ;;  %2365 = vmatpush.bf16.msra.mxu1 %v4665_v28  ;;  %v5455_v15 = vld [vmem:[%s7265_s3 + $0x1e8] sm:$0xf0]  ;;  %v4741_v28 = vld [vmem:[%s7265_s3 + $0x1d0] sm:$0xf] }
 0x187   :  { %v4673_v21 = vor.u32 %v5441_v20, %v4672_v42  ;;  %v4746_v59 = vor.u32 %v5455_v15, %v4745_v14  ;;  %v4803_v42 = vor.u32 %v5476_v12, %v4802_v11  ;;  %v4790_v20 = vld [vmem:[%s7265_s3 + $0x6c] sm:$0xf]  ;;  %v4742_v34 = vor.u32 %v5453_v29, %v4741_v28  ;;  %v5483_v14 = vld [vmem:[%s7265_s3 + $0xc4] sm:$0xf0]  ;;  %v5463_v28 = vld [vmem:[%s7265_s3 + $0x1c] sm:$0xf] }
 0x188   :  { %v934_v19 = vpack.c.bf16 %v933_v16, %v933_v16  ;;  %v5454_v16 = vld [vmem:[%s7265_s3 + $0x1e4] sm:$0xf]  ;;  %v4791_v30 = vor.u32 %v5473_v50, %v4790_v20  ;;  %v2802_v12 = vsel %vm1937_vm1, %v2783_v1, 0  ;;  %v5480_v20 = vld [vmem:[%s7265_s3 + $0xac] sm:$0xf0] }
 0x189   :  { %2391 = vmatpush.bf16.msra.mxu3 %v4673_v21  ;;  %v4750_v55 = vor.u32 %v5454_v16, %v4747_v8  ;;  %2510 = vmatpush.bf16.msra.mxu0 %v4746_v59  ;;  %v4733_v21 = vld [vmem:[%s7265_s3 + $0x1c8] sm:$0xf]  ;;  %v5470_v59 = vld [vmem:[%s7265_s3 + $0x50] sm:$0xf0]  ;;  %v4795_v8 = vor.u32 %v5472_v3, %v4792_v5  ;;  %v4867_v50 = vld [vmem:[%s7265_s3 + $0x3c] sm:$0xf0] }
 0x18a   :  { %936 = vst.msk [vmem:[#allocation2 + $0x8] sm:$0xf] %vm345_vm2, %v934_v19  ;;  %2366 = vmatpush.bf16.msra.mxu1 %v4653_v40  ;;  %v5456_v19 = vld [vmem:[%s7265_s3 + $0x1f0] sm:$0xf0]  ;;  %v4734_v27 = vor.u32 %v5452_v24, %v4733_v21  ;;  %v4729_v40 = vld [vmem:[%s7265_s3 + $0x1b8] sm:$0xf] }
 0x18b   :  { %v4754_v18 = vor.u32 %v5456_v19, %v4753_v17  ;;  %v4730_v44 = vor.u32 %v5450_v41, %v4729_v40  ;;  %v4877_v16 = vld [vmem:[%s7265_s3 + $0x48] sm:$0xf]  ;;  %v4865_v21 = vld [vmem:[%s7265_s3 + $0x30] sm:$0xf]  ;;  %v5467_v24 = vld [vmem:[%s7265_s3 + $0x38] sm:$0xf0] }
 0x18c   :  { %v4866_v29 = vor.u32 %v5467_v24, %v4865_v21  ;;  %v5460_v41 = vld [vmem:[%s7265_s3 + $0x4] sm:$0xf]  ;;  %v4942_v5 = vld [vmem:[%s7265_s3 + $0x110] sm:$0xf]  ;;  %v4934_v24 = vld [vmem:[%s7265_s3 + $0x108] sm:$0xf] }
 0x18d   :  { %2392 = vmatpush.bf16.msra.mxu3 %v4661_v36  ;;  %2511 = vmatpush.bf16.msra.mxu0 %v4734_v27  ;;  %v4721_v36 = vld [vmem:[%s7265_s3 + $0x1b0] sm:$0xf]  ;;  %v4907_v27 = vld [vmem:[%s7265_s3 + $0x140] sm:$0x1]  ;;  %v5468_v21 = vld [vmem:[%s7265_s3 + $0x40] sm:$0xf0] }
 0x18e   :  { %2521 = vmatpush.bf16.msrb.mxu1 %v2500_v58  ;;  %v4722_v37 = vor.u32 %v5449_v33, %v4721_v36  ;;  %v5478_v58 = vld [vmem:[%s7265_s3 + $0xa0] sm:$0xf]  ;;  %v5464_v36 = vld [vmem:[%s7265_s3 + $0x20] sm:$0xf0]  ;;  %v2912_v33 = vunpack.c.l.b16 %v4907_v27  ;;  %v5490_v27 = vld [vmem:[%s7265_s3 + $0x10c] sm:$0xf] }
 0x191   :  { %v2109_v51 = vld [vmem:[#allocation2 + $0x8] sm:$0xf]  ;;  %2512 = vmatpush.bf16.msra.mxu0 %v4722_v37  ;;  %v4906_v37 = vld [vmem:[%s7265_s3 + $0x138] sm:$0x11] }
 0x192   :  { %4629 = vmatmul.msk.bf16.vlgmr.msra.gmra.mxu2 %vm1933_vm3, %v2109_v51  ;;  %4630 = vmatmul.msk.bf16.vlgmr.msrb.gmra.mxu3 %vm1933_vm3, %v2109_v51  ;;  %v2911_v57 = vunpack.c.h.b16 %v4906_v37 }
 0x193   :  { %4631 = vmatmul.msk.bf16.vlgmr.msrb.gmra.mxu0 %vm1933_vm3, %v2109_v51  ;;  %2690 = vmatpush.bf16.msrb.mxu3 %v2679_v39  ;;  %v4726_v39 = vor.u32 %v5448_v10, %v4723_v23  ;;  %v4831_v51 = vor.u32 %v5481_v46, %v4828_v25  ;;  %v2583_v10 = vld [vmem:[%s7265_s3 + $0x68] sm:$0x1]  ;;  %v4841_v46 = vld [vmem:[%s7265_s3] sm:$0xf]  ;;  %v5461_v25 = vld [vmem:[%s7265_s3 + $0x8] sm:$0xf0] }
 0x194   :  { %2534 = vmatpush.bf16.msra.mxu2 %v2503_v60  ;;  %2522 = vmatpush.bf16.msrb.mxu1 %v4762_v7  ;;  %v4816_v60 = vld [vmem:[%s7265_s3 + $0xa8] sm:$0xf0] }
 0x195   :  { %2703 = vmatpush.bf16.msrb.mxu0 %v2682_v22  ;;  %v4819_v61 = vor.u32 %v5478_v58, %v4816_v60  ;;  %v5469_v7 = vld [vmem:[%s7265_s3 + $0x4c] sm:$0xf]  ;;  %v4798_v22 = vld [vmem:[%s7265_s3 + $0x74] sm:$0xf]  ;;  %v6757_v58 = vld [vmem:[#allocation2 + $0x8] sm:$0xf] }
 0x196   :  { %v4882_v19 = vor.u32 %v5469_v7, %v4879_v9  ;;  %v4799_v53 = vor.u32 %v5474_v45, %v4798_v22  ;;  %v4885_v7 = vld [vmem:[%s7265_s3 + $0x50] sm:$0xf]  ;;  %v5471_v9 = vld [vmem:[%s7265_s3 + $0x58] sm:$0xf0]  ;;  %v4924_v22 = vld [vmem:[%s7265_s3 + $0xfc] sm:$0xf0] }
 0x197   :  { %2691 = vmatpush.bf16.msrb.mxu3 %v4827_v56  ;;  %v2647_v56 = vunpack.c.l.b16 %v4787_v48  ;;  %v2910_v48 = vunpack.c.l.b16 %v4906_v37  ;;  %v6858_v45 = vld [vmem:[#allocation2 + $0x4] sm:$0xf] }
 0x198   :  { %2535 = vmatpush.bf16.msra.mxu2 %v4766_v13  ;;  %2523 = vmatpush.bf16.msrb.mxu1 %v4750_v55  ;;  %v4834_v13 = vld [vmem:[%s7265_s3 + $0xbc] sm:$0xf]  ;;  %v5466_v55 = vld [vmem:[%s7265_s3 + $0x34] sm:$0xf] }
 0x199   :  { %2704 = vmatpush.bf16.msrb.mxu0 %v4831_v51  ;;  %v2662_v0 = vpack.c.b16 %v2647_v56, %v2647_v56  ;;  %v4835_v17 = vor.u32 %v5483_v14, %v4834_v13  ;;  %v4870_v31 = vor.u32 %v5466_v55, %v4867_v50  ;;  %v4842_v56 = vor.u32 %v5461_v25, %v4841_v46  ;;  %v5494_v13 = vld [vmem:[%s7265_s3 + $0x128] sm:$0xf0]  ;;  %v6791_v14 = vld [vmem:[%s7265_s3 + $0x210] sm:$0x11]  ;;  %v4930_v55 = vld [vmem:[%s7265_s3 + $0xf8] sm:$0xf] }
 0x19b   :  { %2692 = vmatpush.bf16.msrb.mxu3 %v4815_v6  ;;  %v2805_v6 = vsel %vm1937_vm1, %v2784_v63, 0  ;;  %v2685_v11 = vsel %vm1937_vm1, %v2662_v0, 0  ;;  %v2926_v0 = vpack.c.b16 %v2911_v57, %v2911_v57  ;;  %v5084_v57 = vld [vmem:[%s7265_s3 + $0x1f8] sm:$0xf] }
 0x19c   :  { %2536 = vmatpush.bf16.msra.mxu2 %v4754_v18  ;;  %2524 = vmatpush.bf16.msrb.mxu1 %v4738_v32  ;;  %v4878_v18 = vor.u32 %v5470_v59, %v4877_v16  ;;  %v5477_v32 = vld [vmem:[%s7265_s3 + $0x94] sm:$0xf0]  ;;  %v5493_v16 = vld [vmem:[%s7265_s3 + $0x124] sm:$0xf]  ;;  %v4948_v59 = vld [vmem:[%s7265_s3 + $0x12c] sm:$0xf0] }
 0x19d   :  { %2705 = vmatpush.bf16.msrb.mxu0 %v4819_v61  ;;  %v2925_v61 = vpack.c.b16 %v2910_v48, %v2910_v48  ;;  %v4951_v50 = vor.u32 %v5493_v16, %v4948_v59  ;;  %v4849_v48 = vld [vmem:[%s7265_s3 + $0x8] sm:$0xf]  ;;  %v5023_v59 = vld [vmem:[%s7265_s3 + $0x194] sm:$0xf] }
 0x19f   :  { %2693 = vmatpush.bf16.msrb.mxu3 %v4803_v42  ;;  %v4822_v42 = vld [vmem:[%s7265_s3 + $0xa4] sm:$0xf]  ;;  %v2944_v3 = vsel %vm1937_vm1, %v2925_v61, 0 }
 0x1a0   :  { %2537 = vmatpush.bf16.msra.mxu2 %v4742_v34  ;;  %2525 = vmatpush.bf16.msrb.mxu1 %v4726_v39  ;;  %v4823_v4 = vor.u32 %v5480_v20, %v4822_v42  ;;  %v4855_v34 = vld [vmem:[%s7265_s3 + $0x24] sm:$0xf0]  ;;  %v4873_v42 = vld [vmem:[%s7265_s3 + $0x38] sm:$0xf]  ;;  %v3200_v20 = vunpack.c.l.b16 %v6791_v14 }
 0x1a1   :  { %v4858_v40 = vor.u32 %v5463_v28, %v4855_v34  ;;  %v4975_v28 = vld [vmem:[%s7265_s3 + $0x1a4] sm:$0x11] }
 0x1a3   :  { %2694 = vmatpush.bf16.msrb.mxu3 %v4791_v30  ;;  %v4810_v30 = vld [vmem:[%s7265_s3 + $0x8c] sm:$0xf] }
 0x1a4   :  { %2538 = vmatpush.bf16.msra.mxu2 %v4730_v44  ;;  %v4811_v38 = vor.u32 %v5477_v32, %v4810_v30  ;;  %v4854_v44 = vor.u32 %v5464_v36, %v4853_v35  ;;  %v4918_v30 = vld [vmem:[%s7265_s3 + $0xe0] sm:$0xf]  ;;  %v4874_v32 = vor.u32 %v5468_v21, %v4873_v42  ;;  %v5486_v35 = vld [vmem:[%s7265_s3 + $0xe8] sm:$0xf0]  ;;  %v5512_v42 = vld [vmem:[%s7265_s3 + $0x1d0] sm:$0xf0] }
 0x1a5   :  { %v4861_v36 = vld [vmem:[%s7265_s3 + $0x20] sm:$0xf]  ;;  %v5003_v21 = vld [vmem:[%s7265_s3 + $0x174] sm:$0xf] }
 0x1a7   :  { %v1226_v47 = vpop.permute.xlu1 %1225 }
 0x1a8   :  { %v1228_v52 = vmax.f32 %v6158_v26, %v1226_v47  ;;  %v5475_v26 = vld [vmem:[%s7265_s3 + $0x88] sm:$0xf]  ;;  %v2770_v47 = vunpack.c.l.b16 %v2583_v10  ;;  %v3215_v10 = vpack.c.b16 %v3200_v20, %v3200_v20 }
 0x1a9   :  { %v4807_v2 = vor.u32 %v5475_v26, %v4804_v62  ;;  %v4954_v26 = vld [vmem:[%s7265_s3 + $0x128] sm:$0xf]  ;;  %v5495_v62 = vld [vmem:[%s7265_s3 + $0x130] sm:$0xf0] }
 0x1aa   :  { %v1229_v54 = vpack.c.bf16 %v1228_v52, %v1228_v52  ;;  %v2927_v52 = vpack.c.b16 %v2912_v33, %v2912_v33  ;;  %v2785_v60 = vpack.c.b16 %v2770_v47, %v2770_v47  ;;  %v4955_v1 = vor.u32 %v5495_v62, %v4954_v26  ;;  %v5465_v33 = vld [vmem:[%s7265_s3 + $0x28] sm:$0xf0]  ;;  %v5484_v26 = vld [vmem:[%s7265_s3 + $0xdc] sm:$0xf]  ;;  %v4912_v62 = vld [vmem:[%s7265_s3 + $0xe4] sm:$0xf0] }
 0x1ab   :  { %2706 = vmatpush.bf16.msrb.mxu0 %v4807_v2  ;;  %v4862_v46 = vor.u32 %v5465_v33, %v4861_v36  ;;  %v3234_v47 = vsel %vm1937_vm1, %v3215_v10, 0 }
 0x1ac   :  { %1231 = vst.msk [vmem:[#allocation2 + $0xc] sm:$0xf] %vm345_vm2, %v1229_v54  ;;  %v2950_v63 = vsel %vm1937_vm1, %v2927_v52, 0  ;;  %v2808_v2 = vsel %vm1937_vm1, %v2785_v60, 0 }
 0x1af   :  { %2707 = vmatpush.bf16.msrb.mxu0 %v4795_v8 }
 0x1b3   :  { %v2255_v15 = vld [vmem:[#allocation2 + $0xc] sm:$0xf] }
 0x1b4   :  { %4698 = vmatmul.msk.bf16.vlgmr.msra.gmra.mxu1 %vm1933_vm3, %v2255_v15  ;;  %4699 = vmatmul.msk.bf16.vlgmr.msrb.gmra.mxu2 %vm1933_vm3, %v2255_v15  ;;  %v2849_v36 = vld [vmem:[#allocation2 + $0xc] sm:$0xf] }
 0x1b5   :  { %4700 = vmatmul.msk.bf16.vlgmr.msra.gmra.mxu3 %vm1933_vm3, %v2255_v15  ;;  %2716 = vmatpush.bf16.msra.mxu1 %v2685_v11  ;;  %v4946_v11 = vld [vmem:[%s7265_s3 + $0x120] sm:$0xf]  ;;  %v2947_v15 = vsel %vm1937_vm1, %v2926_v0, 0 }
 0x1b6   :  { %2826 = vmatpush.bf16.msra.mxu3 %v2805_v6  ;;  %2813 = vmatpush.bf16.msrb.mxu2 %v2802_v12  ;;  %v5492_v6 = vld [vmem:[%s7265_s3 + $0x118] sm:$0xf0] }
 0x1b7   :  { %v4943_v8 = vor.u32 %v5492_v6, %v4942_v5  ;;  %v4915_v5 = vor.u32 %v5484_v26, %v4912_v62  ;;  %v5498_v26 = vld [vmem:[%s7265_s3 + $0x154] sm:$0xf0] }
 0x1b9   :  { %2717 = vmatpush.bf16.msra.mxu1 %v4835_v17  ;;  %v4886_v17 = vor.u32 %v5471_v9, %v4885_v7  ;;  %v5072_v9 = vld [vmem:[%s7265_s3 + $0x1e0] sm:$0xf] }
 0x1ba   :  { %2827 = vmatpush.bf16.msra.mxu3 %v4882_v19  ;;  %2814 = vmatpush.bf16.msrb.mxu2 %v4878_v18  ;;  %v4947_v19 = vor.u32 %v5494_v13, %v4946_v11  ;;  %v5489_v18 = vld [vmem:[%s7265_s3 + $0x100] sm:$0xf0]  ;;  %v5515_v11 = vld [vmem:[%s7265_s3 + $0x1e8] sm:$0xf0]  ;;  %v5506_v13 = vld [vmem:[%s7265_s3 + $0x194] sm:$0xf0] }
 0x1bd   :  { %v1521_v23 = vpop.permute.xlu2 %1520  ;;  %2718 = vmatpush.bf16.msra.mxu1 %v4823_v4  ;;  %v5491_v4 = vld [vmem:[%s7265_s3 + $0x110] sm:$0xf0] }
 0x1be   :  { %v1523_v39 = vmax.f32 %v6340_v43, %v1521_v23  ;;  %2828 = vmatpush.bf16.msra.mxu3 %v4870_v31  ;;  %2815 = vmatpush.bf16.msrb.mxu2 %v4866_v29  ;;  %v4843_v43 = vld [vmem:[%s7265_s3 + $0xc] sm:$0xf0]  ;;  %v4936_v31 = vld [vmem:[%s7265_s3 + $0x114] sm:$0xf0]  ;;  %v4931_v29 = vor.u32 %v5489_v18, %v4930_v55  ;;  %v4935_v34 = vor.u32 %v5491_v4, %v4934_v24  ;;  %v5060_v18 = vld [vmem:[%s7265_s3 + $0x1c8] sm:$0xf] }
 0x1bf   :  { %v4846_v54 = vor.u32 %v5460_v41, %v4843_v43  ;;  %v4939_v37 = vor.u32 %v5490_v27, %v4936_v31  ;;  %v4922_v23 = vld [vmem:[%s7265_s3 + $0xf0] sm:$0xf]  ;;  %v4976_v41 = vld [vmem:[%s7265_s3 + $0x1ac] sm:$0x1]  ;;  %v4919_v43 = vor.u32 %v5486_v35, %v4918_v30  ;;  %v5503_v24 = vld [vmem:[%s7265_s3 + $0x17c] sm:$0xf0] }
 0x1c0   :  { %v1524_v51 = vpack.c.bf16 %v1523_v39, %v1523_v39  ;;  %v3055_v39 = vunpack.c.l.b16 %v4975_v28  ;;  %v3057_v52 = vunpack.c.l.b16 %v4976_v41  ;;  %v5502_v4 = vld [vmem:[%s7265_s3 + $0x178] sm:$0xf]  ;;  %v5005_v31 = vld [vmem:[%s7265_s3 + $0x180] sm:$0xf0]  ;;  %v5004_v35 = vor.u32 %v5503_v24, %v5003_v21  ;;  %v5499_v41 = vld [vmem:[%s7265_s3 + $0x160] sm:$0xf] }
 0x1c1   :  { %2719 = vmatpush.bf16.msra.mxu1 %v4811_v38  ;;  %v5488_v38 = vld [vmem:[%s7265_s3 + $0xf8] sm:$0xf0]  ;;  %v5008_v33 = vor.u32 %v5502_v4, %v5005_v31  ;;  %v5511_v24 = vld [vmem:[%s7265_s3 + $0x1cc] sm:$0xf]  ;;  %v5062_v4 = vld [vmem:[%s7265_s3 + $0x1d4] sm:$0xf0] }
 0x1c2   :  { %1526 = vst.msk [vmem:[#allocation2 + $0x10] sm:$0xf] %vm345_vm2, %v1524_v51  ;;  %2829 = vmatpush.bf16.msra.mxu3 %v4858_v40  ;;  %2816 = vmatpush.bf16.msrb.mxu2 %v4854_v44  ;;  %v3056_v40 = vunpack.c.h.b16 %v4975_v28  ;;  %v5487_v44 = vld [vmem:[%s7265_s3 + $0xf4] sm:$0xf]  ;;  %v4923_v25 = vor.u32 %v5488_v38, %v4922_v23  ;;  %v3070_v60 = vpack.c.b16 %v3055_v39, %v3055_v39  ;;  %v5011_v28 = vld [vmem:[%s7265_s3 + $0x17c] sm:$0xf] }
 0x1c3   :  { %v5462_v51 = vld [vmem:[%s7265_s3 + $0x10] sm:$0xf0]  ;;  %v5509_v23 = vld [vmem:[%s7265_s3 + $0x1b8] sm:$0xf0]  ;;  %v5045_v39 = vld [vmem:[%s7265_s3 + $0x218] sm:$0x1] }
 0x1c4   :  { %v3071_v61 = vpack.c.b16 %v3056_v40, %v3056_v40  ;;  %v4850_v0 = vor.u32 %v5462_v51, %v4849_v48  ;;  %v3089_v6 = vsel %vm1937_vm1, %v3070_v60, 0  ;;  %v4991_v38 = vld [vmem:[%s7265_s3 + $0x15c] sm:$0xf]  ;;  %v5500_v40 = vld [vmem:[%s7265_s3 + $0x164] sm:$0xf0] }
 0x1c5   :  { %4836 = vmatmul.msk.bf16.vlgmr.msrb.gmra.mxu3 %vm1933_vm3, %v6757_v58  ;;  %2720 = vmatpush.bf16.msra.mxu1 %v4799_v53  ;;  %v4927_v53 = vor.u32 %v5487_v44, %v4924_v22  ;;  %v4993_v44 = vld [vmem:[%s7265_s3 + $0x168] sm:$0xf0]  ;;  %v4999_v22 = vld [vmem:[%s7265_s3 + $0x164] sm:$0xf]  ;;  %v4992_v51 = vor.u32 %v5500_v40, %v4991_v38  ;;  %v5497_v60 = vld [vmem:[%s7265_s3 + $0x14c] sm:$0xf0] }
 0x1c6   :  { %2830 = vmatpush.bf16.msra.mxu3 %v4846_v54  ;;  %2817 = vmatpush.bf16.msrb.mxu2 %v4842_v56  ;;  %v4910_v54 = vld [vmem:[%s7265_s3 + $0xd8] sm:$0xf]  ;;  %v5485_v56 = vld [vmem:[%s7265_s3 + $0xe0] sm:$0xf0]  ;;  %v3092_v7 = vsel %vm1937_vm1, %v3071_v61, 0 }
 0x1c7   :  { %v4981_v61 = vld [vmem:[%s7265_s3 + $0x150] sm:$0xf0]  ;;  %v5527_v40 = vld [vmem:[%s7266_s5 + $0x38] sm:$0xff] }
 0x1c9   :  { %v2401_v12 = vld [vmem:[#allocation2 + $0x10] sm:$0xf] }
 0x1ca   :  { %2981 = vmatpush.bf16.msrb.mxu3 %v2950_v63  ;;  %4767 = vmatmul.msk.bf16.vlgmr.msra.gmra.mxu0 %vm1933_vm3, %v2401_v12  ;;  %v5518_v63 = vld [vmem:[%s7265_s3 + $0x200] sm:$0xf0] }
 0x1cb   :  { %4768 = vmatmul.msk.bf16.vlgmr.msrb.gmra.mxu1 %vm1933_vm3, %v2401_v12  ;;  %4769 = vmatmul.msk.bf16.vlgmr.msra.gmra.mxu2 %vm1933_vm3, %v2401_v12  ;;  %v5015_v12 = vld [vmem:[%s7265_s3 + $0x18c] sm:$0xf] }
 0x1cc   :  { %2839 = vmatpush.bf16.msra.mxu0 %v2808_v2  ;;  %2955 = vmatpush.bf16.msrb.mxu1 %v2944_v3  ;;  %v3072_v2 = vpack.c.b16 %v3057_v52, %v3057_v52  ;;  %v5085_v3 = vor.u32 %v5518_v63, %v5084_v57  ;;  %v4996_v52 = vor.u32 %v5499_v41, %v4993_v44  ;;  %v4987_v63 = vld [vmem:[%s7265_s3 + $0x14c] sm:$0xf] }
 0x1cd   :  { %2968 = vmatpush.bf16.msra.mxu2 %v2947_v15  ;;  %v5017_v15 = vld [vmem:[%s7265_s3 + $0x198] sm:$0xf0] }
 0x1ce   :  { %2982 = vmatpush.bf16.msrb.mxu3 %v4955_v1  ;;  %v4911_v1 = vor.u32 %v5485_v56, %v4910_v54  ;;  %v3095_v16 = vsel %vm1937_vm1, %v3072_v2, 0 }
 0x1d0   :  { %2840 = vmatpush.bf16.msra.mxu0 %v4886_v17  ;;  %2956 = vmatpush.bf16.msrb.mxu1 %v4947_v19  ;;  %v5073_v17 = vor.u32 %v5515_v11, %v5072_v9  ;;  %v5016_v19 = vor.u32 %v5506_v13, %v5015_v12  ;;  %v5092_v11 = vld [vmem:[%s7265_s3 + $0x200] sm:$0xf]  ;;  %v5519_v12 = vld [vmem:[%s7265_s3 + $0x208] sm:$0xf0] }
 0x1d1   :  { %2969 = vmatpush.bf16.msra.mxu2 %v4951_v50 }
 0x1d2   :  { %2983 = vmatpush.bf16.msrb.mxu3 %v4943_v8  ;;  %v5507_v8 = vld [vmem:[%s7265_s3 + $0x19c] sm:$0xf0] }
 0x1d3   :  { %v5024_v50 = vor.u32 %v5507_v8, %v5023_v59 }
 0x1d4   :  { %2841 = vmatpush.bf16.msra.mxu0 %v4874_v32  ;;  %2957 = vmatpush.bf16.msrb.mxu1 %v4935_v34 }
 0x1d5   :  { %4888 = vmatmul.msk.bf16.vlgmr.msra.gmra.mxu3 %vm1933_vm3, %v6858_v45  ;;  %2970 = vmatpush.bf16.msra.mxu2 %v4939_v37  ;;  %v5048_v37 = vld [vmem:[%s7265_s3 + $0x1b0] sm:$0xf] }
 0x1d6   :  { %2984 = vmatpush.bf16.msrb.mxu3 %v4931_v29  ;;  %v5504_v29 = vld [vmem:[%s7265_s3 + $0x184] sm:$0xf0] }
 0x1d7   :  { %v5012_v10 = vor.u32 %v5504_v29, %v5011_v28  ;;  %v5068_v28 = vld [vmem:[%s7265_s3 + $0x1d0] sm:$0xf]  ;;  %v5513_v29 = vld [vmem:[%s7265_s3 + $0x1d8] sm:$0xf0] }
 0x1d8   :  { %2842 = vmatpush.bf16.msra.mxu0 %v4862_v46  ;;  %2958 = vmatpush.bf16.msrb.mxu1 %v4923_v25  ;;  %v3201_v46 = vunpack.c.h.b16 %v6791_v14  ;;  %v5049_v25 = vor.u32 %v5509_v23, %v5048_v37  ;;  %v5496_v14 = vld [vmem:[%s7265_s3 + $0x148] sm:$0xf]  ;;  %v5510_v37 = vld [vmem:[%s7265_s3 + $0x1c0] sm:$0xf0] }
 0x1d9   :  { %2971 = vmatpush.bf16.msra.mxu2 %v4927_v53  ;;  %v4979_v53 = vld [vmem:[%s7265_s3 + $0x144] sm:$0xf]  ;;  %v4984_v2 = vor.u32 %v5496_v14, %v4981_v61 }
 0x1da   :  { %2985 = vmatpush.bf16.msrb.mxu3 %v4919_v43  ;;  %4837 = vmatmul.msk.bf16.vlgmr.msrb.gmra.mxu0 %vm1933_vm3, %v6757_v58  ;;  %v5501_v43 = vld [vmem:[%s7265_s3 + $0x16c] sm:$0xf0]  ;;  %v3216_v62 = vpack.c.b16 %v3201_v46, %v3201_v46  ;;  %v5525_v46 = vld [vmem:[%s7266_s5 + $0x28] sm:$0xff] }
 0x1db   :  { %4838 = vmatmul.msk.bf16.vlgmr.msra.gmra.mxu1 %vm1933_vm3, %v6757_v58  ;;  %4887 = vmatmul.msk.bf16.vlgmr.msrb.gmra.mxu2 %vm1933_vm3, %v6858_v45  ;;  %v5505_v58 = vld [vmem:[%s7265_s3 + $0x190] sm:$0xf]  ;;  %v5000_v57 = vor.u32 %v5501_v43, %v4999_v22 }
 0x1dc   :  { %2843 = vmatpush.bf16.msra.mxu0 %v4850_v0  ;;  %2959 = vmatpush.bf16.msrb.mxu1 %v4911_v1  ;;  %v5020_v55 = vor.u32 %v5505_v58, %v5017_v15  ;;  %v4980_v1 = vor.u32 %v5497_v60, %v4979_v53  ;;  %v5526_v43 = vld [vmem:[%s7266_s5 + $0x30] sm:$0xff]  ;;  %v5521_v53 = vld [vmem:[%s7266_s5 + $0x8] sm:$0xff] }
 0x1dd   :  { %2972 = vmatpush.bf16.msra.mxu2 %v4915_v5  ;;  %v5517_v5 = vld [vmem:[%s7265_s3 + $0x1fc] sm:$0xf] }
 0x1de   :  { %3245 = vmatpush.bf16.msra.mxu3 %v3234_v47  ;;  %v3202_v47 = vunpack.c.l.b16 %v5045_v39 }
 0x1df   :  { %v1816_v20 = vpop.permute.xlu2 %1815 }
 0x1e0   :  { %3100 = vmatpush.bf16.msrb.mxu0 %v3089_v6  ;;  %3113 = vmatpush.bf16.msra.mxu1 %v3092_v7  ;;  %v1818_v27 = vmax.f32 %v6465_v49, %v1816_v20  ;;  %v5061_v49 = vor.u32 %v5512_v42, %v5060_v18  ;;  %v3217_v0 = vpack.c.b16 %v3202_v47, %v3202_v47  ;;  %v5086_v6 = vld [vmem:[%s7265_s3 + $0x204] sm:$0xf0]  ;;  %v5074_v18 = vld [vmem:[%s7265_s3 + $0x1ec] sm:$0xf0] }
 0x1e1   :  { %3126 = vmatpush.bf16.msrb.mxu2 %v3095_v16  ;;  %v1956_v30 = vpop.f32.mrf.mxu0  ;;  %v6945_v32 = vpop.f32.mrf.mxu1  ;;  %v5089_v59 = vor.u32 %v5517_v5, %v5086_v6  ;;  %v5080_v20 = vld [vmem:[%s7265_s3 + $0x1e8] sm:$0xf] }
 0x1e2   :  { %3246 = vmatpush.bf16.msra.mxu3 %v5085_v3  ;;  %v1819_v34 = vpack.c.bf16 %v1818_v27, %v1818_v27  ;;  %v3237_v3 = vsel %vm1937_vm1, %v3216_v62, 0  ;;  %v3240_v9 = vsel %vm1937_vm1, %v3217_v0, 0 }
 0x1e4   :  { %3101 = vmatpush.bf16.msrb.mxu0 %v5016_v19  ;;  %3114 = vmatpush.bf16.msra.mxu1 %v5020_v55  ;;  %1821 = vst.msk [vmem:[#allocation2 + $0x14] sm:$0xf] %vm345_vm2, %v1819_v34  ;;  %v5093_v19 = vor.u32 %v5519_v12, %v5092_v11  ;;  %v5514_v55 = vld [vmem:[%s7265_s3 + $0x1e4] sm:$0xf]  ;;  %v2994_v34 = vld [vmem:[#allocation2 + $0x10] sm:$0xf] }
 0x1e5   :  { %3127 = vmatpush.bf16.msrb.mxu2 %v5024_v50  ;;  %4958 = vmatmul.msk.bf16.vlgmr.msrb.gmra.mxu3 %vm1933_vm3, %v2849_v36  ;;  %v5516_v50 = vld [vmem:[%s7265_s3 + $0x1f0] sm:$0xf0]  ;;  %v5077_v21 = vor.u32 %v5514_v55, %v5074_v18 }
 0x1e6   :  { %3247 = vmatpush.bf16.msra.mxu3 %v5073_v17  ;;  %v5081_v31 = vor.u32 %v5516_v50, %v5080_v20 }
 0x1e8   :  { %3102 = vmatpush.bf16.msrb.mxu0 %v5004_v35  ;;  %3115 = vmatpush.bf16.msra.mxu1 %v5008_v33  ;;  %v1982_v48 = vpop.f32.mrf.mxu2  ;;  %v5508_v35 = vld [vmem:[%s7265_s3 + $0x1b4] sm:$0xf]  ;;  %v5069_v33 = vor.u32 %v5513_v29, %v5068_v28  ;;  %v5540_v29 = vld [vmem:[%s7266_s5 + $0xa4] sm:$0xff] }
 0x1e9   :  { %3128 = vmatpush.bf16.msrb.mxu2 %v5012_v10  ;;  %v1958_v54 = vpop.f32.mrf.mxu0  ;;  %v1971_v56 = vpop.f32.mrf.mxu1  ;;  %v5056_v10 = vld [vmem:[%s7265_s3 + $0x1b8] sm:$0xf] }
 0x1ea   :  { %3248 = vmatpush.bf16.msra.mxu3 %v5061_v49  ;;  %4889 = vmatmul.msk.bf16.vlgmr.msra.gmra.mxu0 %vm1933_vm3, %v6858_v45  ;;  %v4988_v45 = vor.u32 %v5498_v26, %v4987_v63  ;;  %v5065_v49 = vor.u32 %v5511_v24, %v5062_v4  ;;  %v5057_v38 = vor.u32 %v5510_v37, %v5056_v10  ;;  %v5520_v54 = vld [vmem:[%s7266_s5] sm:$0xff]  ;;  %v5550_v10 = vld [vmem:[%s7266_s5 + $0xf4] sm:$0xff] }
 0x1eb   :  { %4956 = vmatmul.msk.bf16.vlgmr.msrb.gmra.mxu1 %vm1933_vm3, %v2849_v36  ;;  %4957 = vmatmul.msk.bf16.vlgmr.msra.gmra.mxu2 %vm1933_vm3, %v2849_v36  ;;  %v3139_v42 = vld [vmem:[#allocation2 + $0x14] sm:$0xf]  ;;  %v5050_v36 = vld [vmem:[%s7265_s3 + $0x1bc] sm:$0xf0] }
 0x1ec   :  { %3103 = vmatpush.bf16.msrb.mxu0 %v4992_v51  ;;  %3116 = vmatpush.bf16.msra.mxu1 %v4996_v52  ;;  %v5053_v23 = vor.u32 %v5508_v35, %v5050_v36  ;;  %v5523_v51 = vld [vmem:[%s7266_s5 + $0x18] sm:$0xff]  ;;  %v5522_v52 = vld [vmem:[%s7266_s5 + $0x10] sm:$0xff]  ;;  %v7089_v26 = vld [vmem:[%s7267_s4] sm:$0x7] }
 0x1ed   :  { %3129 = vmatpush.bf16.msrb.mxu2 %v5000_v57  ;;  %v2550_v55 = vperm.slane %v7089_v26, 2  ;;  %v5539_v36 = vld [vmem:[%s7266_s5 + $0x9c] sm:$0xff]  ;;  %v5538_v37 = vld [vmem:[%s7266_s5 + $0x94] sm:$0xff] }
 0x1ee   :  { %3249 = vmatpush.bf16.msra.mxu3 %v5049_v25 }
 0x1ef   :  { %v2079_v7 = vpop.f32.mrf.mxu3 }
 0x1f0   :  { %v1984_v13 = vpop.f32.mrf.mxu2  ;;  %v7013_v58 = vadd.f32 %v2079_v7, %v1956_v30  ;;  %3104 = vmatpush.bf16.msrb.mxu0 %v4980_v1  ;;  %3117 = vmatpush.bf16.msra.mxu1 %v4984_v2  ;;  %v5543_v7 = vld [vmem:[%s7266_s5 + $0xbc] sm:$0xff] }
 0x1f1   :  { %v2092_v15 = vpop.f32.mrf.mxu0  ;;  %v2105_v16 = vpop.f32.mrf.mxu1  ;;  %3130 = vmatpush.bf16.msrb.mxu2 %v4988_v45  ;;  %v2548_v45 = vperm.slane %v7089_v26, 0 }
 0x1f2   :  { %v7016_v8 = vadd.f32 %v2092_v15, %v6945_v32  ;;  %v7018_v17 = vadd.f32 %v2105_v16, %v1982_v48  ;;  %v5524_v48 = vld [vmem:[%s7266_s5 + $0x20] sm:$0xff]  ;;  %v5542_v16 = vld [vmem:[%s7266_s5 + $0xb4] sm:$0xff] }
 0x1f4   :  { %3258 = vmatpush.bf16.msra.mxu0 %v3237_v3  ;;  %3271 = vmatpush.bf16.msrb.mxu1 %v3240_v9  ;;  %v2549_v3 = vperm.slane %v7089_v26, 1 }
 0x1f5   :  { %5094 = vmatmul.msk.bf16.vlgmr.msra.gmra.mxu3 %vm1933_vm3, %v3139_v42  ;;  %3483 = vmatpush.bf16.msra.mxu2 %v5543_v7 }
 0x1f7   :  { %v2081_v27 = vpop.f32.mrf.mxu3 }
 0x1f8   :  { %3259 = vmatpush.bf16.msra.mxu0 %v5089_v59  ;;  %3272 = vmatpush.bf16.msrb.mxu1 %v5093_v19 }
 0x1f9   :  { %v2094_v30 = vpop.f32.mrf.mxu0  ;;  %v2107_v32 = vpop.f32.mrf.mxu1  ;;  %3484 = vmatpush.bf16.msra.mxu2 %v5542_v16 }
 0x1fa   :  { %5025 = vmatmul.msk.bf16.vlgmr.msrb.gmra.mxu0 %vm1933_vm3, %v2994_v34  ;;  %v5551_v30 = vld [vmem:[%s7266_s5 + $0xfc] sm:$0xff] }
 0x1fb   :  { %5026 = vmatmul.msk.bf16.vlgmr.msra.gmra.mxu1 %vm1933_vm3, %v2994_v34  ;;  %5027 = vmatmul.msk.bf16.vlgmr.msrb.gmra.mxu2 %vm1933_vm3, %v2994_v34 }
 0x1fc   :  { %3260 = vmatpush.bf16.msra.mxu0 %v5077_v21  ;;  %3273 = vmatpush.bf16.msrb.mxu1 %v5081_v31 }
 0x1fd   :  { %3496 = vmatpush.bf16.msrb.mxu3 %v5551_v30 }
 0x200   :  { %3261 = vmatpush.bf16.msra.mxu0 %v5065_v49  ;;  %3274 = vmatpush.bf16.msrb.mxu1 %v5069_v33 }
 0x201   :  { %3497 = vmatpush.bf16.msrb.mxu3 %v5550_v10 }
 0x204   :  { %3262 = vmatpush.bf16.msra.mxu0 %v5053_v23  ;;  %3275 = vmatpush.bf16.msrb.mxu1 %v5057_v38  ;;  %v5549_v23 = vld [vmem:[%s7266_s5 + $0xec] sm:$0xff] }
 0x205   :  { %3498 = vmatpush.bf16.msrb.mxu3 %v5549_v23 }
 0x208   :  { %3637 = vmatpush.bf16.msra.mxu1 %v5527_v40 }
 0x20a   :  { %5095 = vmatmul.msk.bf16.vlgmr.msra.gmra.mxu0 %vm1933_vm3, %v3139_v42 }
 0x20b   :  { %5096 = vmatmul.msk.bf16.vlgmr.msrb.gmra.mxu1 %vm1933_vm3, %v3139_v42 }
 0x20c   :  { %3638 = vmatpush.bf16.msra.mxu1 %v5526_v43  ;;  %v5536_v43 = vld [vmem:[%s7266_s5 + $0x84] sm:$0xff] }
 0x210   :  { %v2248_v39 = vpop.f32.mrf.mxu0  ;;  %3639 = vmatpush.bf16.msra.mxu1 %v5525_v46  ;;  %v5547_v46 = vld [vmem:[%s7266_s5 + $0xdc] sm:$0xff] }
 0x211   :  { %v2254_v15 = vadd.f32 %v2248_v39, %v7018_v17  ;;  %v5541_v17 = vld [vmem:[%s7266_s5 + $0xac] sm:$0xff] }
 0x212   :  { %3485 = vmatpush.bf16.msra.mxu2 %v5541_v17 }
 0x214   :  { %3640 = vmatpush.bf16.msra.mxu1 %v5524_v48 }
 0x215   :  { %v2222_v41 = vpop.f32.mrf.mxu2  ;;  %v2235_v44 = vpop.f32.mrf.mxu3 }
 0x216   :  { %v2252_v62 = vadd.f32 %v2222_v41, %v7013_v58  ;;  %v2253_v0 = vadd.f32 %v2235_v44, %v7016_v8  ;;  %3486 = vmatpush.bf16.msra.mxu2 %v5540_v29  ;;  %v5537_v41 = vld [vmem:[%s7266_s5 + $0x8c] sm:$0xff] }
 0x218   :  { %v2250_v22 = vpop.f32.mrf.mxu0  ;;  %3641 = vmatpush.bf16.msra.mxu1 %v5523_v51 }
 0x219   :  { %v5548_v22 = vld [vmem:[%s7266_s5 + $0xe4] sm:$0xff] }
 0x21a   :  { %3487 = vmatpush.bf16.msra.mxu2 %v5539_v36  ;;  %3499 = vmatpush.bf16.msrb.mxu3 %v5548_v22 }
 0x21c   :  { %3642 = vmatpush.bf16.msra.mxu1 %v5522_v52 }
 0x21d   :  { %v2224_v25 = vpop.f32.mrf.mxu2  ;;  %v2237_v47 = vpop.f32.mrf.mxu3 }
 0x21e   :  { %3488 = vmatpush.bf16.msra.mxu2 %v5538_v37  ;;  %v5535_v25 = vld [vmem:[%s7266_s5 + $0x78] sm:$0xff]  ;;  %3500 = vmatpush.bf16.msrb.mxu3 %v5547_v46 }
 0x220   :  { %3643 = vmatpush.bf16.msra.mxu1 %v5521_v53  ;;  %v5546_v53 = vld [vmem:[%s7266_s5 + $0xd4] sm:$0xff] }
 0x222   :  { %3489 = vmatpush.bf16.msra.mxu2 %v5537_v41  ;;  %3501 = vmatpush.bf16.msrb.mxu3 %v5546_v53 }
 0x224   :  { %3644 = vmatpush.bf16.msra.mxu1 %v5520_v54  ;;  %v5534_v54 = vld [vmem:[%s7266_s5 + $0x70] sm:$0xff] }
 0x226   :  { %3490 = vmatpush.bf16.msra.mxu2 %v5536_v43 }
 0x22a   :  { %3650 = vmatpush.bf16.msrb.mxu2 %v5535_v25 }
 0x22e   :  { %3651 = vmatpush.bf16.msrb.mxu2 %v5534_v54 }
 0x231   :  { %v2368_v56 = vpop.f32.mrf.mxu1 }
 0x232   :  { %v2398_v1 = vadd.f32 %v2368_v56, %v2252_v62  ;;  %v5545_v56 = vld [vmem:[%s7266_s5 + $0xcc] sm:$0xff]  ;;  %v5544_v62 = vld [vmem:[%s7266_s5 + $0xc4] sm:$0xff] }
 0x233   :  { %3502 = vmatpush.bf16.msrb.mxu3 %v5545_v56 }
 0x237   :  { %v2381_v57 = vpop.f32.mrf.mxu2  ;;  %3503 = vmatpush.bf16.msrb.mxu3 %v5544_v62 }
 0x238   :  { %v2394_v60 = vpop.f32.mrf.mxu3  ;;  %v2399_v2 = vadd.f32 %v2381_v57, %v2253_v0  ;;  %v5533_v57 = vld [vmem:[%s7266_s5 + $0x68] sm:$0xff]  ;;  %v5532_v0 = vld [vmem:[%s7266_s5 + $0x60] sm:$0xff] }
 0x239   :  { %v2370_v14 = vpop.f32.mrf.mxu1  ;;  %v2400_v19 = vadd.f32 %v2394_v60, %v2254_v15  ;;  %3652 = vmatpush.bf16.msrb.mxu2 %v5533_v57  ;;  %v5530_v15 = vld [vmem:[%s7266_s5 + $0x50] sm:$0xff] }
 0x23d   :  { %3653 = vmatpush.bf16.msrb.mxu2 %v5532_v0 }
 0x23f   :  { %v2383_v61 = vpop.f32.mrf.mxu2 }
 0x240   :  { %v2396_v63 = vpop.f32.mrf.mxu3 }
 0x247   :  { %v2514_v5 = vpop.f32.mrf.mxu0 }
 0x248   :  { %v2527_v6 = vpop.f32.mrf.mxu1  ;;  %v2544_v9 = vadd.f32 %v2514_v5, %v2398_v1  ;;  %v7098_v12 = vpop.f32.mrf.mxu3  ;;  %v5129_v1 = vld [vmem:[%s7266_s5 + $0x104] sm:$0x3] }
 0x249   :  { %v2545_v11 = vadd.f32 %v2527_v6, %v2399_v2  ;;  %v3441_v2 = vunpack.c.l.b16 %v5129_v1  ;;  %v5531_v6 = vld [vmem:[%s7266_s5 + $0x58] sm:$0xff]  ;;  %v5557_v1 = vld [vmem:[%s7270_s7 + $0x28] sm:$0xff] }
 0x24a   :  { %v2554_v13 = vadd.f32 %v2548_v45, %v2544_v9  ;;  %3654 = vmatpush.bf16.msrb.mxu2 %v5531_v6  ;;  %v5554_v6 = vld [vmem:[%s7270_s7 + $0x10] sm:$0xff] }
 0x24b   :  { %v2555_v58 = vadd.f32 %v2549_v3, %v2545_v11  ;;  %v3458_v5 = vpack.c.b16 %v3441_v2, %v3441_v2  ;;  %v5556_v2 = vld [vmem:[%s7270_s7 + $0x20] sm:$0xff] }
 0x24c   :  { %v2557_v59 = vmax.f32 %v2554_v13, 0.0 }
 0x24d   :  { %v2558_v8 = vmax.f32 %v2555_v58, 0.0  ;;  %v3481_v9 = vsel %vm3479_vm5, %v3458_v5, 0  ;;  %v5555_v5 = vld [vmem:[%s7270_s7 + $0x18] sm:$0xff] }
 0x24e   :  { %v2540_v42 = vpop.f32.mrf.mxu2  ;;  %3516 = vmatpush.bf16.msrb.mxu0 %v3481_v9  ;;  %3655 = vmatpush.bf16.msrb.mxu2 %v5530_v15  ;;  %v5552_v9 = vld [vmem:[%s7270_s7] sm:$0xff] }
 0x24f   :  { %v7109_v18 = vpack.c.bf16 %v2558_v8, %v2557_v59  ;;  %v2546_v20 = vadd.f32 %v2540_v42, %v2400_v19  ;;  %v2516_v50 = vpop.f32.mrf.mxu0  ;;  %v3329_v59 = vld [vmem:[%s7266_s5 + $0x80] sm:$0x3]  ;;  %v5529_v8 = vld [vmem:[%s7266_s5 + $0x48] sm:$0xff] }
 0x250   :  { %v2529_v21 = vpop.f32.mrf.mxu1  ;;  %v2698_v24 = vpop.f32.mrf.mxu3  ;;  %v3597_v19 = vunpack.c.l.b16 %v3329_v59  ;;  %v5528_v50 = vld [vmem:[%s7266_s5 + $0x40] sm:$0xff] }
 0x251   :  { %v3524_v4 = vunpack.c.l.b16 %v7109_v18  ;;  %v2556_v27 = vadd.f32 %v2550_v55, %v2546_v20  ;;  %v3525_v53 = vunpack.c.h.b16 %v7109_v18  ;;  %v5558_v18 = vld [vmem:[%s7270_s7 + $0x30] sm:$0xff] }
 0x252   :  { %3656 = vmatpush.bf16.msrb.mxu2 %v5529_v8  ;;  %v3614_v24 = vpack.c.b16 %v3597_v19, %v3597_v19  ;;  %v5563_v8 = vld [vmem:[%s7271_s9 + $0x20] sm:$0xff] }
 0x253   :  { %v3527_v31 = vpack.c.b16 %v3524_v4, %v3524_v4  ;;  %v2559_v28 = vmax.f32 %v2556_v27, 0.0  ;;  %v3528_v56 = vpack.c.b16 %v3525_v53, %v3525_v53 }
 0x255   :  { %3645 = vmatmul.bf16.vlgmr.msra.gmra.mxu1 %v3527_v31  ;;  %v2561_v32 = vpack.c.bf16 %v2559_v28, %v2559_v28  ;;  %v3635_v31 = vsel %vm3479_vm5, %v3614_v24, 0 }
 0x256   :  { %v2542_v34 = vpop.f32.mrf.mxu2  ;;  %3670 = vmatpush.bf16.msra.mxu3 %v3635_v31  ;;  %3657 = vmatpush.bf16.msrb.mxu2 %v5528_v50 }
 0x257   :  { %2564 = vst.msk [vmem:[#allocation3 + $0x8] sm:$0xf] %vm2563_vm4, %v2561_v32  ;;  %v7124_v49 = vpop.f32.mrf.mxu0 }
 0x258   :  { %v7126_v35 = vpop.f32.mrf.mxu1  ;;  %v7131_v33 = vpop.f32.mrf.mxu3 }
 0x259   :  { %v2833_v28 = vadd.f32 %v7131_v33, %v7124_v49 }
 0x25e   :  { %v2819_v38 = vpop.f32.mrf.mxu2 }
 0x25f   :  { %v2711_v39 = vpop.f32.mrf.mxu0  ;;  %v2820_v16 = vadd.f32 %v2819_v38, %v7098_v12 }
 0x260   :  { %v2724_v40 = vpop.f32.mrf.mxu1  ;;  %v2834_v44 = vpop.f32.mrf.mxu3 }
 0x266   :  { %v2821_v47 = vpop.f32.mrf.mxu2 }
 0x267   :  { %v2845_v48 = vpop.f32.mrf.mxu0 }
 0x268   :  { %v2961_v51 = vpop.f32.mrf.mxu1  ;;  %v2987_v52 = vpop.f32.mrf.mxu3  ;;  %v2846_v12 = vadd.f32 %v2845_v48, %v7126_v35 }
 0x269   :  { %v2991_v42 = vadd.f32 %v2961_v51, %v2820_v16 }
 0x26a   :  { %v2993_v29 = vadd.f32 %v2987_v52, %v2846_v12 }
 0x26e   :  { %v2974_v60 = vpop.f32.mrf.mxu2 }
 0x26f   :  { %v2847_v14 = vpop.f32.mrf.mxu0  ;;  %v2992_v30 = vadd.f32 %v2974_v60, %v2833_v28 }
 0x270   :  { %v2963_v61 = vpop.f32.mrf.mxu1  ;;  %v2989_v63 = vpop.f32.mrf.mxu3 }
 0x271   :  { %v3697_v61 = vld [vmem:[%s7270_s7 + $0x38] sm:$0xf] }
 0x272   :  { %v3731_v63 = vunpack.c.l.b16 %v3697_v61 }
 0x274   :  { %v3739_v62 = vpack.c.b16 %v3731_v63, %v3731_v63 }
 0x276   :  { %v2976_v7 = vpop.f32.mrf.mxu2  ;;  %v3753_v0 = vsel %vm3751_vm7, %v3739_v62, 0 }
 0x277   :  { %v3106_v11 = vpop.f32.mrf.mxu0  ;;  %3755 = vmatpush.bf16.msra.mxu0 %v3753_v0  ;;  %v5553_v7 = vld [vmem:[%s7270_s7 + $0x8] sm:$0xff] }
 0x278   :  { %v3119_v13 = vpop.f32.mrf.mxu1  ;;  %v3251_v58 = vpop.f32.mrf.mxu3  ;;  %v3136_v4 = vadd.f32 %v3106_v11, %v2991_v42  ;;  %v3780_v11 = vld [vmem:[%s7271_s9 + $0x28] sm:$0x3]  ;;  %v5562_v42 = vld [vmem:[%s7271_s9 + $0x18] sm:$0xff] }
 0x279   :  { %v3137_v34 = vadd.f32 %v3119_v13, %v2992_v30  ;;  %v3806_v13 = vunpack.c.l.b16 %v3780_v11 }
 0x27a   :  { %v3281_v32 = vadd.f32 %v3251_v58, %v3136_v4 }
 0x27b   :  { %3756 = vmatpush.bf16.msra.mxu0 %v5558_v18  ;;  %v3812_v58 = vpack.c.b16 %v3806_v13, %v3806_v13 }
 0x27c   :  { %v3284_v35 = vadd.f32 %v3281_v32, %v2548_v45 }
 0x27d   :  { %v3823_v59 = vsel %vm3479_vm5, %v3812_v58, 0 }
 0x27e   :  { %v3132_v20 = vpop.f32.mrf.mxu2  ;;  %v3287_v33 = vmax.f32 %v3284_v35, 0.0  ;;  %v5559_v35 = vld [vmem:[%s7271_s9] sm:$0xff] }
 0x27f   :  { %v3108_v21 = vpop.f32.mrf.mxu0  ;;  %v3138_v36 = vadd.f32 %v3132_v20, %v2993_v29  ;;  %3757 = vmatpush.bf16.msra.mxu0 %v5557_v1  ;;  %v5566_v29 = vld [vmem:[%s7268_s6] ss:$0 sm:$0xff] }
 0x280   :  { %v3121_v17 = vpop.f32.mrf.mxu1  ;;  %v3253_v27 = vpop.f32.mrf.mxu3 }
 0x281   :  { %v5561_v17 = vld [vmem:[%s7271_s9 + $0x10] sm:$0xff] }
 0x283   :  { %3758 = vmatpush.bf16.msra.mxu0 %v5556_v2 }
 0x286   :  { %v3134_v10 = vpop.f32.mrf.mxu2 }
 0x287   :  { %v3264_v37 = vpop.f32.mrf.mxu0  ;;  %3759 = vmatpush.bf16.msra.mxu0 %v5555_v5 }
 0x288   :  { %v3277_v23 = vpop.f32.mrf.mxu1  ;;  %v3282_v38 = vadd.f32 %v3264_v37, %v3137_v34 }
 0x289   :  { %v3283_v39 = vadd.f32 %v3277_v23, %v3138_v36  ;;  %v5560_v23 = vld [vmem:[%s7271_s9 + $0x8] sm:$0xff] }
 0x28a   :  { %v3285_v40 = vadd.f32 %v3282_v38, %v2549_v3  ;;  %v5567_v38 = vld [vmem:[%s7269_s8] ss:$0 sm:$0xff] }
 0x28b   :  { %v3286_v49 = vadd.f32 %v3283_v39, %v2550_v55  ;;  %v3296_v55 = vld [vmem:[#allocation3 + $0x8] sm:$0xf]  ;;  %3760 = vmatpush.bf16.msra.mxu0 %v5554_v6 }
 0x28c   :  { %v3288_v41 = vmax.f32 %v3285_v40, 0.0  ;;  %v3526_v54 = vunpack.c.l.b16 %v3296_v55 }
 0x28d   :  { %v3289_v44 = vmax.f32 %v3286_v49, 0.0 }
 0x28e   :  { %v3290_v22 = vpack.c.bf16 %v3288_v41, %v3287_v33  ;;  %v3529_v57 = vpack.c.b16 %v3526_v54, %v3526_v54 }
 0x28f   :  { %v3291_v43 = vpack.c.bf16 %v3289_v44, %v3289_v44  ;;  %v3266_v46 = vpop.f32.mrf.mxu0  ;;  %3761 = vmatpush.bf16.msra.mxu0 %v5553_v7  ;;  %v5568_v44 = vld [vmem:[%s7272_s10] ss:$0 sm:$0xff] }
 0x290   :  { %v3279_v25 = vpop.f32.mrf.mxu1  ;;  %v3368_v47 = vunpack.c.l.b16 %v3290_v22  ;;  %v3369_v48 = vunpack.c.h.b16 %v3290_v22 }
 0x291   :  { %3294 = vst.msk [vmem:[#allocation3 + $0x14] sm:$0xf] %vm2563_vm4, %v3291_v43 }
 0x292   :  { %v3371_v45 = vpack.c.b16 %v3368_v47, %v3368_v47  ;;  %v3372_v51 = vpack.c.b16 %v3369_v48, %v3369_v48 }
 0x293   :  { %3762 = vmatpush.bf16.msra.mxu0 %v5552_v9 }
 0x294   :  { %3491 = vmatmul.bf16.vlgmr.msra.gmra.mxu2 %v3371_v45  ;;  %3504 = vmatmul.bf16.vlgmr.msrb.gmra.mxu3 %v3372_v51 }
 0x295   :  { %3827 = vmatpush.bf16.msrb.mxu3 %v3823_v59 }
 0x298   :  { %v3331_v52 = vld [vmem:[#allocation3 + $0x14] sm:$0xf] }
 0x299   :  { %v3370_v3 = vunpack.c.l.b16 %v3331_v52  ;;  %3828 = vmatpush.bf16.msrb.mxu3 %v5563_v8 }
 0x29b   :  { %v3373_v26 = vpack.c.b16 %v3370_v3, %v3370_v3 }
 0x29d   :  { %5194 = vmatmul.msk.bf16.vlgmr.msrb.gmra.mxu0 %vm3475_vm6, %v3373_v26  ;;  %3829 = vmatpush.bf16.msrb.mxu3 %v5562_v42 }
 0x2a1   :  { %3830 = vmatpush.bf16.msrb.mxu3 %v5561_v17 }
 0x2a4   :  { %3658 = vmatmul.bf16.vlgmr.msrb.gmra.mxu2 %v3528_v56  ;;  %5259 = vmatmul.msk.bf16.vlgmr.msra.gmra.mxu3 %vm3475_vm6, %v3529_v57 }
 0x2a5   :  { %3831 = vmatpush.bf16.msrb.mxu3 %v5560_v23 }
 0x2a9   :  { %3832 = vmatpush.bf16.msrb.mxu3 %v5559_v35 }
 0x2d2   :  { %v3646_v60 = vpop.f32.mrf.mxu1 }
 0x2da   :  { %v3648_v14 = vpop.f32.mrf.mxu1 }
 0x317   :  { %v3492_v15 = vpop.f32.mrf.mxu2  ;;  %v3505_v16 = vpop.f32.mrf.mxu3 }
 0x318   :  { %v3506_v20 = vadd.f32 %v3505_v16, %v3492_v15 }
 0x31a   :  { %v3518_v19 = vpop.f32.mrf.mxu0 }
 0x31b   :  { %v3519_v24 = vadd.f32 %v3518_v19, %v3506_v20 }
 0x31d   :  { %v3647_v4 = vadd.f32 %v3646_v60, %v3519_v24 }
 0x31f   :  { %v3494_v50 = vpop.f32.mrf.mxu2  ;;  %v3507_v21 = vpop.f32.mrf.mxu3 }
 0x322   :  { %v3520_v12 = vpop.f32.mrf.mxu0 }
 0x327   :  { %v3659_v27 = vpop.f32.mrf.mxu2  ;;  %v3672_v31 = vpop.f32.mrf.mxu3 }
 0x328   :  { %v3660_v28 = vadd.f32 %v3659_v27, %v3647_v4 }
 0x32a   :  { %v3673_v30 = vadd.f32 %v3672_v31, %v3660_v28 }
 0x32c   :  { %v3680_v32 = vadd.f32 %v5566_v29, %v3673_v30 }
 0x32e   :  { %v3681_v34 = vmax.f32 %v3680_v32, 0.0 }
 0x32f   :  { %v3661_v36 = vpop.f32.mrf.mxu2  ;;  %v3674_v10 = vpop.f32.mrf.mxu3 }
 0x330   :  { %v3682_v37 = vpack.c.bf16 %v3681_v34, %v3681_v34 }
 0x332   :  { %5288 = vmatmul.msk.bf16.vlgmr.msra.gmra.mxu0 %vm3747_vm8, %v3682_v37 }
 0x3af   :  { %v3764_v39 = vpop.f32.mrf.mxu0 }
 0x3b0   :  { %v3765_v40 = vadd.f32 %v5567_v38, %v3764_v39 }
 0x3b2   :  { %v3768_v49 = vmax.f32 %v3765_v40, 0.0 }
 0x3b4   :  { %v3769_v33 = vpack.c.bf16 %v3768_v49, %v3768_v49 }
 0x3b6   :  { %5309 = vmatmul.msk.bf16.vlgmr.msrb.gmra.mxu3 %vm3818_vm9, %v3769_v33 }
 0x3b7   :  { %v3766_v41 = vpop.f32.mrf.mxu0 }
 0x439   :  { %v3834_v22 = vpop.f32.mrf.mxu3 }
 0x43a   :  { %v3835_v43 = vadd.f32 %v5568_v44, %v3834_v22 }
 0x43c   :  { %3839 = vst.msk [vmem:[%s7273_s11] sm:$0xff] %vm3838_vm10, %v3835_v43 }
 0x441   :  { %v3836_v46 = vpop.f32.mrf.mxu3 }

</bundles_post_ra>
